<compile_context>
chip_gen: v7x
topology: tpu7x:2x2x1
jax: 0.10.0
libtpu: 0.0.40
codegen_flags: <defaults>
</compile_context>

<pallas_src>
import functools
import math

import jax
import jax.numpy as jnp
from jax import lax
from jax.experimental import pallas as pl
from jax.experimental.pallas import tpu as pltpu


def _softplus(x):
    # matches torch.nn.functional.softplus (threshold=20); log1p for precision near 0
    return jnp.where(x > 20.0, x, jnp.log1p(jnp.exp(jnp.minimum(x, 20.0))))


def _silu(x):
    return x * jax.nn.sigmoid(x)


def _mamba_kernel(
    x_ref,        # (1, L, D)            one sequence per grid step
    w_in_x_ref,   # (D, d_inner)
    w_in_z_ref,   # (D, d_inner)
    conv_w_ref,   # (d_conv, d_inner)    depthwise conv weights
    conv_b_ref,   # (1, d_inner)
    w_dtc_ref,    # (d_inner, d_inner)   folded w_dt @ w_dtproj (exact)
    b_dt_ref,     # (1, d_inner)
    w_B_ref,      # (d_inner, d_state)
    w_C_ref,      # (d_inner, d_state)
    a_t_ref,      # (d_state, d_inner)   == (-exp(A_log)).T
    d_ref,        # (1, d_inner)
    w_out_ref,    # (d_inner, D)
    w_cls_ref,    # (D, num_classes)
    b_cls_ref,    # (1, num_classes)
    out_ref,      # (1, 1, num_classes)
    dA_ref,       # scratch (TL, d_state, d_inner)
    dBu_ref,      # scratch (TL, d_state, d_inner)
    cz_ref,       # scratch (TL, d_state, d_inner)
    *, L, TL, d_inner, d_state, d_conv,
):
    f32 = jnp.float32
    x = x_ref[0].astype(f32)                                            # (L, D)

    # ---- in_proj (bias=False): two matmuls (no lane-64 split of a fused result)
    x_in = jnp.dot(x, w_in_x_ref[...], preferred_element_type=f32)      # (L, d_inner)
    silu_z = _silu(jnp.dot(x, w_in_z_ref[...], preferred_element_type=f32))

    # ---- depthwise causal conv1d (k=d_conv, pad=d_conv-1, [..., :L]) + SiLU
    #      pltpu.roll + row mask over the whole operand, no per-batch loop.
    row = lax.broadcasted_iota(jnp.int32, (L, d_inner), 0)
    u = jnp.zeros((L, d_inner), f32)
    for k in range(d_conv):
        shift = d_conv - 1 - k
        if shift == 0:
            xs = x_in
        else:
            xs = pltpu.roll(x_in, shift=shift, axis=0)
            xs = jnp.where(row < shift, 0.0, xs)
        u = u + conv_w_ref[k:k + 1, :] * xs
    u = _silu(u + conv_b_ref[...])                                       # (L, d_inner)

    # ---- dt / B / C projections over all L rows at once
    dt = _softplus(jnp.dot(u, w_dtc_ref[...], preferred_element_type=f32)
                   + b_dt_ref[...])                                      # (L, d_inner)
    Bm = jnp.dot(u, w_B_ref[...], preferred_element_type=f32)            # (L, d_state)
    Cm = jnp.dot(u, w_C_ref[...], preferred_element_type=f32)            # (L, d_state)

    a_t = a_t_ref[...]                                                    # (d_state, d_inner)
    a_b = a_t[None, :, :]
    dtu = dt * u                                                          # (L, d_inner)

    # ---- selective scan, chunked over L so scratch is (TL, ...) not (L, ...).
    #      Per step the serial body is just two vector FMAs on (d_state, d_inner):
    #        h = dA[t]*h + dBu[t];  acc += cz[t]*h
    #      exp(dt*A), dt*u*B and C*silu(z) are precomputed per chunk with one
    #      full-width lane-dense store per slab.
    #      (v5e option, not applied: drop the cz slab / store slabs in bf16.)
    h = jnp.zeros((d_state, d_inner), f32)
    acc = jnp.zeros((d_state, d_inner), f32)
    n_chunks = -(-L // TL)                                                # static
    for c in range(n_chunks):
        lo = c * TL
        cs = min(TL, L - lo)
        sl = slice(lo, lo + cs)
        dA_ref[:cs] = jnp.exp(dt[sl][:, None, :] * a_b)
        dBu_ref[:cs] = dtu[sl][:, None, :] * Bm[sl][:, :, None]
        cz_ref[:cs] = silu_z[sl][:, None, :] * Cm[sl][:, :, None]

        def body(t, carry):
            hh, aa = carry
            hh = dA_ref[t] * hh + dBu_ref[t]
            aa = aa + cz_ref[t] * hh
            return hh, aa

        # unroll=4: ~3 slab loads + 8 carried vregs/step fits the 64-vreg file;
        # sweep {2,4,8} per generation (v5e: 2-4; v6e/v7x: 4-8) via bundle dump.
        h, acc = lax.fori_loop(0, cs, body, (h, acc),
                               unroll=True if cs <= 8 else 4)

    # ---- epilogue: C·h reduction over d_state, D*u skip path and mean pooling
    #      hoisted out of the recurrence.  Valid ONLY because out_proj has
    #      bias=False and pooling is an unweighted mean over L.
    y_contrib = jnp.sum(acc, axis=0, keepdims=True)                       # (1, d_inner)
    skip = d_ref[...] * jnp.sum(u * silu_z, axis=0, keepdims=True)        # (1, d_inner)
    pooled = (y_contrib + skip) * (1.0 / L)                               # (1, d_inner)

    feat = jnp.dot(pooled, w_out_ref[...], preferred_element_type=f32)    # (1, D)
    logits = jnp.dot(feat, w_cls_ref[...], preferred_element_type=f32) + b_cls_ref[...]
    out_ref[0] = logits.astype(out_ref.dtype)


def _pick_chunk(L, d_state, d_inner, budget_bytes=12 * 2**20):
    """Timestep tile so the three f32 slabs stay within ~budget_bytes."""
    per_step = 3 * d_state * d_inner * 4
    return int(max(1, min(L, 256, budget_bytes // per_step)))


def mamba_mhist_forward(x, params, *, d_state, d_conv, num_classes):
    B, L, D = x.shape
    d_inner = params["w_in_x"].shape[1]
    TL = _pick_chunk(L, d_state, d_inner)

    # Host-side exact fold: w_dt @ w_dtproj -> one (d_inner, d_inner) matrix.
    w_dtc = params["w_dt"] @ params["w_dtproj"]
    plist = [params["w_in_x"], params["w_in_z"], params["conv_w"], params["conv_b"],
             w_dtc, params["b_dtproj"], params["w_B"], params["w_C"],
             params["A_T"], params["D"], params["w_out"],
             params["w_cls"], params["b_cls"]]

    def param_spec(p):
        nd = p.ndim
        return pl.BlockSpec(p.shape, lambda g, _nd=nd: (0,) * _nd)

    kernel = functools.partial(_mamba_kernel, L=L, TL=TL, d_inner=d_inner,
                               d_state=d_state, d_conv=d_conv)

    # Explicit VMEM budget (review item 1): slabs + precompute temporaries +
    # double-buffered input block + params + projection intermediates.
    est_bytes = 4 * (3 * TL * d_state * d_inner
                     + 4 * TL * d_state * d_inner
                     + 2 * L * D
                     + 2 * sum(int(p.size) for p in plist)
                     + 12 * L * d_inner)
    vmem_limit = int(min(64 * 2**20, max(32 * 2**20, 2 * est_bytes)))

    out = pl.pallas_call(
        kernel,
        out_shape=jax.ShapeDtypeStruct((B, 1, num_classes), jnp.float32),
        grid=(B,),
        in_specs=[pl.BlockSpec((1, L, D), lambda g: (g, 0, 0))]
                 + [param_spec(p) for p in plist],
        out_specs=pl.BlockSpec((1, 1, num_classes), lambda g: (g, 0, 0)),
        scratch_shapes=[pltpu.VMEM((TL, d_state, d_inner), jnp.float32)] * 3,
        compiler_params=pltpu.CompilerParams(
            # batch elements are fully independent -> shard across v7x's 2 TCs
            dimension_semantics=("parallel",),
            vmem_limit_bytes=vmem_limit),
    )(x, *plist)
    return out.reshape(B, num_classes)


def init_params(key, d_model, d_state, d_conv, expand, num_classes):
    d_inner = expand * d_model
    dt_rank = math.ceil(d_model / 16)
    ks = jax.random.split(key, 12)
    s = 0.05
    f32 = jnp.float32
    params = dict(
        w_in_x=jax.random.normal(ks[0], (d_model, d_inner), f32) * s,
        w_in_z=jax.random.normal(ks[1], (d_model, d_inner), f32) * s,
        conv_w=jax.random.normal(ks[2], (d_conv, d_inner), f32) * s,
        conv_b=jax.random.normal(ks[3], (1, d_inner), f32) * s,
        w_dt=jax.random.normal(ks[4], (d_inner, dt_rank), f32) * s,
        w_B=jax.random.normal(ks[5], (d_inner, d_state), f32) * s,
        w_C=jax.random.normal(ks[6], (d_inner, d_state), f32) * s,
        w_dtproj=jax.random.normal(ks[7], (dt_rank, d_inner), f32) * s,
        b_dtproj=jax.random.normal(ks[8], (1, d_inner), f32) * s,
        # A = -exp(A_log) with Mamba's S4D-real init: A[i, s] = -(s+1); stored transposed.
        A_T=-jnp.broadcast_to(
            jnp.arange(1, d_state + 1, dtype=f32)[:, None], (d_state, d_inner)) * 1.0,
        D=jnp.ones((1, d_inner), f32),
        w_out=jax.random.normal(ks[9], (d_inner, d_model), f32) * s,
        w_cls=jax.random.normal(ks[10], (d_model, num_classes), f32) * s,
        b_cls=jax.random.normal(ks[11], (1, num_classes), f32) * s,
    )
    return params


def reference_forward(x, p, *, d_conv):
    """Pure-JAX reference following the PyTorch/mamba_ssm op order (unfused)."""
    B, L, D = x.shape
    x_in = x @ p["w_in_x"]
    z = x @ p["w_in_z"]
    x_pad = jnp.pad(x_in, ((0, 0), (d_conv - 1, 0), (0, 0)))
    u = jnp.zeros_like(x_in)
    for k in range(d_conv):
        u = u + p["conv_w"][k][None, None, :] * x_pad[:, k:k + L, :]
    u = u + p["conv_b"][None]
    u = _silu(u)
    dt = jax.nn.softplus((u @ p["w_dt"]) @ p["w_dtproj"] + p["b_dtproj"][None])
    Bm = u @ p["w_B"]
    Cm = u @ p["w_C"]
    A = p["A_T"].T                                   # (d_inner, d_state)

    def step(h, xs):
        dt_t, B_t, C_t, u_t = xs
        dA = jnp.exp(dt_t[..., None] * A[None, :, :])
        h = dA * h + (dt_t * u_t)[..., None] * B_t[:, None, :]
        y = jnp.einsum("bis,bs->bi", h, C_t)
        return h, y

    h0 = jnp.zeros((B, A.shape[0], A.shape[1]), jnp.float32)
    _, ys = lax.scan(step, h0, (dt.transpose(1, 0, 2), Bm.transpose(1, 0, 2),
                                Cm.transpose(1, 0, 2), u.transpose(1, 0, 2)))
    y = ys.transpose(1, 0, 2) + u * p["D"][None]
    y = y * _silu(z)
    out = y @ p["w_out"]                              # (B, L, D)
    pooled = out.mean(axis=1)                         # (B, D)
    return pooled @ p["w_cls"] + p["b_cls"]


if __name__ == "__main__":
    B, L, D, num_classes = 2, 8, 32, 4                # batch, seq_len, input_dim, classes
    d_state, d_conv, expand = 64, 4, 2
    key = jax.random.PRNGKey(0)
    kx, kp = jax.random.split(key)
    x = jax.random.normal(kx, (B, L, D), jnp.float32)
    params = init_params(kp, D, d_state, d_conv, expand, num_classes)

    logits = mamba_mhist_forward(x, params, d_state=d_state, d_conv=d_conv,
                                 num_classes=num_classes)
    logits = jax.block_until_ready(logits)

    ref = reference_forward(x, params, d_conv=d_conv)
    assert logits.shape == (B, num_classes)
    assert jnp.allclose(logits, ref, atol=1e-3, rtol=1e-2), (logits, ref)
    print("KERNEL_OK")
</pallas_src>

<mosaic_0001>
module attributes {stable_mosaic.version = 11 : i64} {
  func.func @_mamba_kernel(%arg0: i32, %arg1: memref<1x8x32xf32, #tpu.memory_space<vmem>>, %arg2: memref<32x64xf32, #tpu.memory_space<vmem>>, %arg3: memref<32x64xf32, #tpu.memory_space<vmem>>, %arg4: memref<4x64xf32, #tpu.memory_space<vmem>>, %arg5: memref<1x64xf32, #tpu.memory_space<vmem>>, %arg6: memref<64x64xf32, #tpu.memory_space<vmem>>, %arg7: memref<1x64xf32, #tpu.memory_space<vmem>>, %arg8: memref<64x64xf32, #tpu.memory_space<vmem>>, %arg9: memref<64x64xf32, #tpu.memory_space<vmem>>, %arg10: memref<64x64xf32, #tpu.memory_space<vmem>>, %arg11: memref<1x64xf32, #tpu.memory_space<vmem>>, %arg12: memref<64x32xf32, #tpu.memory_space<vmem>>, %arg13: memref<32x4xf32, #tpu.memory_space<vmem>>, %arg14: memref<1x4xf32, #tpu.memory_space<vmem>>, %arg15: memref<1x1x4xf32, #tpu.memory_space<vmem>>, %arg16: memref<8x64x64xf32, #tpu.memory_space<vmem>>, %arg17: memref<8x64x64xf32, #tpu.memory_space<vmem>>, %arg18: memref<8x64x64xf32, #tpu.memory_space<vmem>>) attributes {dimension_semantics = [#tpu.dimension_semantics<parallel>], iteration_bounds = array<i64: 2>, scalar_prefetch = 0 : i64, scratch_operands = 3 : i64, tpu.core_type = #tpu.core_type<tc>, window_params = [{transform_indices = @transform_0, window_bounds = array<i64: 1, 8, 32>}, {pipeline_mode = #tpu.pipeline_mode<synchronous>, transform_indices = @transform_1, window_bounds = array<i64: 32, 64>}, {pipeline_mode = #tpu.pipeline_mode<synchronous>, transform_indices = @transform_2, window_bounds = array<i64: 32, 64>}, {pipeline_mode = #tpu.pipeline_mode<synchronous>, transform_indices = @transform_3, window_bounds = array<i64: 4, 64>}, {pipeline_mode = #tpu.pipeline_mode<synchronous>, transform_indices = @transform_4, window_bounds = array<i64: 1, 64>}, {pipeline_mode = #tpu.pipeline_mode<synchronous>, transform_indices = @transform_5, window_bounds = array<i64: 64, 64>}, {pipeline_mode = #tpu.pipeline_mode<synchronous>, transform_indices = @transform_6, window_bounds = array<i64: 1, 64>}, {pipeline_mode = #tpu.pipeline_mode<synchronous>, transform_indices = @transform_7, window_bounds = array<i64: 64, 64>}, {pipeline_mode = #tpu.pipeline_mode<synchronous>, transform_indices = @transform_8, window_bounds = array<i64: 64, 64>}, {pipeline_mode = #tpu.pipeline_mode<synchronous>, transform_indices = @transform_9, window_bounds = array<i64: 64, 64>}, {pipeline_mode = #tpu.pipeline_mode<synchronous>, transform_indices = @transform_10, window_bounds = array<i64: 1, 64>}, {pipeline_mode = #tpu.pipeline_mode<synchronous>, transform_indices = @transform_11, window_bounds = array<i64: 64, 32>}, {pipeline_mode = #tpu.pipeline_mode<synchronous>, transform_indices = @transform_12, window_bounds = array<i64: 32, 4>}, {pipeline_mode = #tpu.pipeline_mode<synchronous>, transform_indices = @transform_13, window_bounds = array<i64: 1, 4>}, {transform_indices = @transform_14, window_bounds = array<i64: 1, 1, 4>}]} {
    %c0 = arith.constant 0 : index
    %c0_0 = arith.constant 0 : index
    %c0_1 = arith.constant 0 : index
    %0 = vector.load %arg1[%c0, %c0_0, %c0_1] : memref<1x8x32xf32, #tpu.memory_space<vmem>>, vector<1x8x32xf32>
    %1 = vector.shape_cast %0 : vector<1x8x32xf32> to vector<8x32xf32>
    %c0_2 = arith.constant 0 : index
    %c0_3 = arith.constant 0 : index
    %2 = vector.load %arg2[%c0_2, %c0_3] : memref<32x64xf32, #tpu.memory_space<vmem>>, vector<32x64xf32>
    %cst = arith.constant dense<0.000000e+00> : vector<8x64xf32>
    %3 = tpu.matmul %1, %2, %cst {dimension_numbers = #tpu.dot_dimension_numbers<[1], [0], [0], [1], [0, 0, 1, 1], [], []>} : vector<8x32xf32>, vector<32x64xf32>, vector<8x64xf32> -> vector<8x64xf32>
    %c0_4 = arith.constant 0 : index
    %c0_5 = arith.constant 0 : index
    %4 = vector.load %arg3[%c0_4, %c0_5] : memref<32x64xf32, #tpu.memory_space<vmem>>, vector<32x64xf32>
    %cst_6 = arith.constant dense<0.000000e+00> : vector<8x64xf32>
    %5 = tpu.matmul %1, %4, %cst_6 {dimension_numbers = #tpu.dot_dimension_numbers<[1], [0], [0], [1], [0, 0, 1, 1], [], []>} : vector<8x32xf32>, vector<32x64xf32>, vector<8x64xf32> -> vector<8x64xf32>
    %6 = arith.negf %5 : vector<8x64xf32>
    %7 = math.exp %6 : vector<8x64xf32>
    %cst_7 = arith.constant 1.000000e+00 : f32
    %8 = vector.broadcast %cst_7 : f32 to vector<8x64xf32>
    %9 = arith.addf %8, %7 : vector<8x64xf32>
    %10 = arith.divf %8, %9 : vector<8x64xf32>
    %11 = arith.mulf %5, %10 : vector<8x64xf32>
    %12 = tpu.iota {dimensions = array<i32: 0>} : vector<8x64xi32>
    %cst_8 = arith.constant 0.000000e+00 : f32
    %13 = vector.broadcast %cst_8 : f32 to vector<8x64xf32>
    %c3_i32 = arith.constant 3 : i32
    %14 = tpu.dynamic_rotate %3 by %c3_i32 dim 0 : vector<8x64xf32>, i32 -> vector<8x64xf32>
    %c3_i32_9 = arith.constant 3 : i32
    %15 = vector.broadcast %c3_i32_9 : i32 to vector<8x64xi32>
    %16 = arith.cmpi slt, %12, %15 : vector<8x64xi32>
    %cst_10 = arith.constant 0.000000e+00 : f32
    %17 = vector.broadcast %cst_10 : f32 to vector<8x64xf32>
    %18 = arith.select %16, %17, %14 : vector<8x64xi1>, vector<8x64xf32>
    %c0_11 = arith.constant 0 : index
    %c0_12 = arith.constant 0 : index
    %19 = vector.load %arg4[%c0_11, %c0_12] : memref<4x64xf32, #tpu.memory_space<vmem>>, vector<1x64xf32>
    %20 = vector.broadcast %19 : vector<1x64xf32> to vector<8x64xf32>
    %21 = arith.mulf %20, %18 : vector<8x64xf32>
    %22 = arith.addf %13, %21 : vector<8x64xf32>
    %c2_i32 = arith.constant 2 : i32
    %23 = tpu.dynamic_rotate %3 by %c2_i32 dim 0 : vector<8x64xf32>, i32 -> vector<8x64xf32>
    %c2_i32_13 = arith.constant 2 : i32
    %24 = vector.broadcast %c2_i32_13 : i32 to vector<8x64xi32>
    %25 = arith.cmpi slt, %12, %24 : vector<8x64xi32>
    %cst_14 = arith.constant 0.000000e+00 : f32
    %26 = vector.broadcast %cst_14 : f32 to vector<8x64xf32>
    %27 = arith.select %25, %26, %23 : vector<8x64xi1>, vector<8x64xf32>
    %c1 = arith.constant 1 : index
    %c0_15 = arith.constant 0 : index
    %28 = vector.load %arg4[%c1, %c0_15] : memref<4x64xf32, #tpu.memory_space<vmem>>, vector<1x64xf32>
    %29 = vector.broadcast %28 : vector<1x64xf32> to vector<8x64xf32>
    %30 = arith.mulf %29, %27 : vector<8x64xf32>
    %31 = arith.addf %22, %30 : vector<8x64xf32>
    %c1_i32 = arith.constant 1 : i32
    %32 = tpu.dynamic_rotate %3 by %c1_i32 dim 0 : vector<8x64xf32>, i32 -> vector<8x64xf32>
    %c1_i32_16 = arith.constant 1 : i32
    %33 = vector.broadcast %c1_i32_16 : i32 to vector<8x64xi32>
    %34 = arith.cmpi slt, %12, %33 : vector<8x64xi32>
    %cst_17 = arith.constant 0.000000e+00 : f32
    %35 = vector.broadcast %cst_17 : f32 to vector<8x64xf32>
    %36 = arith.select %34, %35, %32 : vector<8x64xi1>, vector<8x64xf32>
    %c2 = arith.constant 2 : index
    %c0_18 = arith.constant 0 : index
    %37 = vector.load %arg4[%c2, %c0_18] : memref<4x64xf32, #tpu.memory_space<vmem>>, vector<1x64xf32>
    %38 = vector.broadcast %37 : vector<1x64xf32> to vector<8x64xf32>
    %39 = arith.mulf %38, %36 : vector<8x64xf32>
    %40 = arith.addf %31, %39 : vector<8x64xf32>
    %c3 = arith.constant 3 : index
    %c0_19 = arith.constant 0 : index
    %41 = vector.load %arg4[%c3, %c0_19] : memref<4x64xf32, #tpu.memory_space<vmem>>, vector<1x64xf32>
    %42 = vector.broadcast %41 : vector<1x64xf32> to vector<8x64xf32>
    %43 = arith.mulf %42, %3 : vector<8x64xf32>
    %44 = arith.addf %40, %43 : vector<8x64xf32>
    %c0_20 = arith.constant 0 : index
    %c0_21 = arith.constant 0 : index
    %45 = vector.load %arg5[%c0_20, %c0_21] : memref<1x64xf32, #tpu.memory_space<vmem>>, vector<1x64xf32>
    %46 = vector.broadcast %45 : vector<1x64xf32> to vector<8x64xf32>
    %47 = arith.addf %44, %46 : vector<8x64xf32>
    %48 = arith.negf %47 : vector<8x64xf32>
    %49 = math.exp %48 : vector<8x64xf32>
    %cst_22 = arith.constant 1.000000e+00 : f32
    %50 = vector.broadcast %cst_22 : f32 to vector<8x64xf32>
    %51 = arith.addf %50, %49 : vector<8x64xf32>
    %52 = arith.divf %50, %51 : vector<8x64xf32>
    %53 = arith.mulf %47, %52 : vector<8x64xf32>
    %c0_23 = arith.constant 0 : index
    %c0_24 = arith.constant 0 : index
    %54 = vector.load %arg6[%c0_23, %c0_24] : memref<64x64xf32, #tpu.memory_space<vmem>>, vector<64x64xf32>
    %cst_25 = arith.constant dense<0.000000e+00> : vector<8x64xf32>
    %55 = tpu.matmul %53, %54, %cst_25 {dimension_numbers = #tpu.dot_dimension_numbers<[1], [0], [0], [1], [0, 0, 1, 1], [], []>} : vector<8x64xf32>, vector<64x64xf32>, vector<8x64xf32> -> vector<8x64xf32>
    %c0_26 = arith.constant 0 : index
    %c0_27 = arith.constant 0 : index
    %56 = vector.load %arg7[%c0_26, %c0_27] : memref<1x64xf32, #tpu.memory_space<vmem>>, vector<1x64xf32>
    %57 = vector.broadcast %56 : vector<1x64xf32> to vector<8x64xf32>
    %58 = arith.addf %55, %57 : vector<8x64xf32>
    %cst_28 = arith.constant 2.000000e+01 : f32
    %59 = vector.broadcast %cst_28 : f32 to vector<8x64xf32>
    %60 = arith.cmpf ogt, %58, %59 : vector<8x64xf32>
    %cst_29 = arith.constant 2.000000e+01 : f32
    %61 = vector.broadcast %cst_29 : f32 to vector<8x64xf32>
    %62 = arith.minimumf %58, %61 : vector<8x64xf32>
    %63 = math.exp %62 : vector<8x64xf32>
    %64 = math.log1p %63 : vector<8x64xf32>
    %65 = arith.select %60, %58, %64 : vector<8x64xi1>, vector<8x64xf32>
    %c0_30 = arith.constant 0 : index
    %c0_31 = arith.constant 0 : index
    %66 = vector.load %arg8[%c0_30, %c0_31] : memref<64x64xf32, #tpu.memory_space<vmem>>, vector<64x64xf32>
    %cst_32 = arith.constant dense<0.000000e+00> : vector<8x64xf32>
    %67 = tpu.matmul %53, %66, %cst_32 {dimension_numbers = #tpu.dot_dimension_numbers<[1], [0], [0], [1], [0, 0, 1, 1], [], []>} : vector<8x64xf32>, vector<64x64xf32>, vector<8x64xf32> -> vector<8x64xf32>
    %c0_33 = arith.constant 0 : index
    %c0_34 = arith.constant 0 : index
    %68 = vector.load %arg9[%c0_33, %c0_34] : memref<64x64xf32, #tpu.memory_space<vmem>>, vector<64x64xf32>
    %cst_35 = arith.constant dense<0.000000e+00> : vector<8x64xf32>
    %69 = tpu.matmul %53, %68, %cst_35 {dimension_numbers = #tpu.dot_dimension_numbers<[1], [0], [0], [1], [0, 0, 1, 1], [], []>} : vector<8x64xf32>, vector<64x64xf32>, vector<8x64xf32> -> vector<8x64xf32>
    %c0_36 = arith.constant 0 : index
    %c0_37 = arith.constant 0 : index
    %70 = vector.load %arg10[%c0_36, %c0_37] : memref<64x64xf32, #tpu.memory_space<vmem>>, vector<64x64xf32>
    %71 = vector.shape_cast %70 : vector<64x64xf32> to vector<1x64x64xf32>
    %72 = arith.mulf %65, %53 : vector<8x64xf32>
    %cst_38 = arith.constant 0.000000e+00 : f32
    %73 = vector.broadcast %cst_38 : f32 to vector<64x64xf32>
    %cst_39 = arith.constant 0.000000e+00 : f32
    %74 = vector.broadcast %cst_39 : f32 to vector<64x64xf32>
    %75 = vector.shape_cast %65 : vector<8x64xf32> to vector<8x1x64xf32>
    %76 = vector.broadcast %75 : vector<8x1x64xf32> to vector<8x64x64xf32>
    %77 = vector.broadcast %71 : vector<1x64x64xf32> to vector<8x64x64xf32>
    %78 = arith.mulf %76, %77 : vector<8x64x64xf32>
    %79 = math.exp %78 : vector<8x64x64xf32>
    %c0_40 = arith.constant 0 : index
    %c0_41 = arith.constant 0 : index
    %c0_42 = arith.constant 0 : index
    %80 = vector.load %arg16[%c0_40, %c0_41, %c0_42] : memref<8x64x64xf32, #tpu.memory_space<vmem>>, vector<8x64x64xf32>
    tpu.vector_store %arg16[%c0_40, %c0_41, %c0_42], %79 {strides = array<i32>} : memref<8x64x64xf32, #tpu.memory_space<vmem>>, vector<8x64x64xf32>,
    %81 = vector.shape_cast %72 : vector<8x64xf32> to vector<8x1x64xf32>
    %82 = vector.shape_cast %67 : vector<8x64xf32> to vector<8x64x1xf32>
    %83 = vector.broadcast %81 : vector<8x1x64xf32> to vector<8x64x64xf32>
    %84 = vector.broadcast %82 : vector<8x64x1xf32> to vector<8x64x64xf32>
    %85 = arith.mulf %83, %84 : vector<8x64x64xf32>
    %c0_43 = arith.constant 0 : index
    %c0_44 = arith.constant 0 : index
    %c0_45 = arith.constant 0 : index
    %86 = vector.load %arg17[%c0_43, %c0_44, %c0_45] : memref<8x64x64xf32, #tpu.memory_space<vmem>>, vector<8x64x64xf32>
    tpu.vector_store %arg17[%c0_43, %c0_44, %c0_45], %85 {strides = array<i32>} : memref<8x64x64xf32, #tpu.memory_space<vmem>>, vector<8x64x64xf32>,
    %87 = vector.shape_cast %11 : vector<8x64xf32> to vector<8x1x64xf32>
    %88 = vector.shape_cast %69 : vector<8x64xf32> to vector<8x64x1xf32>
    %89 = vector.broadcast %87 : vector<8x1x64xf32> to vector<8x64x64xf32>
    %90 = vector.broadcast %88 : vector<8x64x1xf32> to vector<8x64x64xf32>
    %91 = arith.mulf %89, %90 : vector<8x64x64xf32>
    %c0_46 = arith.constant 0 : index
    %c0_47 = arith.constant 0 : index
    %c0_48 = arith.constant 0 : index
    %92 = vector.load %arg18[%c0_46, %c0_47, %c0_48] : memref<8x64x64xf32, #tpu.memory_space<vmem>>, vector<8x64x64xf32>
    tpu.vector_store %arg18[%c0_46, %c0_47, %c0_48], %91 {strides = array<i32>} : memref<8x64x64xf32, #tpu.memory_space<vmem>>, vector<8x64x64xf32>,
    %c0_i32 = arith.constant 0 : i32
    %93 = arith.index_cast %c0_i32 : i32 to index
    %c0_49 = arith.constant 0 : index
    %c0_50 = arith.constant 0 : index
    %94 = vector.load %arg16[%93, %c0_49, %c0_50] : memref<8x64x64xf32, #tpu.memory_space<vmem>>, vector<1x64x64xf32>
    %95 = vector.shape_cast %94 : vector<1x64x64xf32> to vector<64x64xf32>
    %96 = arith.mulf %95, %73 : vector<64x64xf32>
    %97 = arith.index_cast %c0_i32 : i32 to index
    %c0_51 = arith.constant 0 : index
    %c0_52 = arith.constant 0 : index
    %98 = vector.load %arg17[%97, %c0_51, %c0_52] : memref<8x64x64xf32, #tpu.memory_space<vmem>>, vector<1x64x64xf32>
    %99 = vector.shape_cast %98 : vector<1x64x64xf32> to vector<64x64xf32>
    %100 = arith.addf %96, %99 : vector<64x64xf32>
    %101 = arith.index_cast %c0_i32 : i32 to index
    %c0_53 = arith.constant 0 : index
    %c0_54 = arith.constant 0 : index
    %102 = vector.load %arg18[%101, %c0_53, %c0_54] : memref<8x64x64xf32, #tpu.memory_space<vmem>>, vector<1x64x64xf32>
    %103 = vector.shape_cast %102 : vector<1x64x64xf32> to vector<64x64xf32>
    %104 = arith.mulf %103, %100 : vector<64x64xf32>
    %105 = arith.addf %74, %104 : vector<64x64xf32>
    %c1_i32_55 = arith.constant 1 : i32
    %106 = arith.index_cast %c1_i32_55 : i32 to index
    %c0_56 = arith.constant 0 : index
    %c0_57 = arith.constant 0 : index
    %107 = vector.load %arg16[%106, %c0_56, %c0_57] : memref<8x64x64xf32, #tpu.memory_space<vmem>>, vector<1x64x64xf32>
    %108 = vector.shape_cast %107 : vector<1x64x64xf32> to vector<64x64xf32>
    %109 = arith.mulf %108, %100 : vector<64x64xf32>
    %110 = arith.index_cast %c1_i32_55 : i32 to index
    %c0_58 = arith.constant 0 : index
    %c0_59 = arith.constant 0 : index
    %111 = vector.load %arg17[%110, %c0_58, %c0_59] : memref<8x64x64xf32, #tpu.memory_space<vmem>>, vector<1x64x64xf32>
    %112 = vector.shape_cast %111 : vector<1x64x64xf32> to vector<64x64xf32>
    %113 = arith.addf %109, %112 : vector<64x64xf32>
    %114 = arith.index_cast %c1_i32_55 : i32 to index
    %c0_60 = arith.constant 0 : index
    %c0_61 = arith.constant 0 : index
    %115 = vector.load %arg18[%114, %c0_60, %c0_61] : memref<8x64x64xf32, #tpu.memory_space<vmem>>, vector<1x64x64xf32>
    %116 = vector.shape_cast %115 : vector<1x64x64xf32> to vector<64x64xf32>
    %117 = arith.mulf %116, %113 : vector<64x64xf32>
    %118 = arith.addf %105, %117 : vector<64x64xf32>
    %c2_i32_62 = arith.constant 2 : i32
    %119 = arith.index_cast %c2_i32_62 : i32 to index
    %c0_63 = arith.constant 0 : index
    %c0_64 = arith.constant 0 : index
    %120 = vector.load %arg16[%119, %c0_63, %c0_64] : memref<8x64x64xf32, #tpu.memory_space<vmem>>, vector<1x64x64xf32>
    %121 = vector.shape_cast %120 : vector<1x64x64xf32> to vector<64x64xf32>
    %122 = arith.mulf %121, %113 : vector<64x64xf32>
    %123 = arith.index_cast %c2_i32_62 : i32 to index
    %c0_65 = arith.constant 0 : index
    %c0_66 = arith.constant 0 : index
    %124 = vector.load %arg17[%123, %c0_65, %c0_66] : memref<8x64x64xf32, #tpu.memory_space<vmem>>, vector<1x64x64xf32>
    %125 = vector.shape_cast %124 : vector<1x64x64xf32> to vector<64x64xf32>
    %126 = arith.addf %122, %125 : vector<64x64xf32>
    %127 = arith.index_cast %c2_i32_62 : i32 to index
    %c0_67 = arith.constant 0 : index
    %c0_68 = arith.constant 0 : index
    %128 = vector.load %arg18[%127, %c0_67, %c0_68] : memref<8x64x64xf32, #tpu.memory_space<vmem>>, vector<1x64x64xf32>
    %129 = vector.shape_cast %128 : vector<1x64x64xf32> to vector<64x64xf32>
    %130 = arith.mulf %129, %126 : vector<64x64xf32>
    %131 = arith.addf %118, %130 : vector<64x64xf32>
    %c3_i32_69 = arith.constant 3 : i32
    %132 = arith.index_cast %c3_i32_69 : i32 to index
    %c0_70 = arith.constant 0 : index
    %c0_71 = arith.constant 0 : index
    %133 = vector.load %arg16[%132, %c0_70, %c0_71] : memref<8x64x64xf32, #tpu.memory_space<vmem>>, vector<1x64x64xf32>
    %134 = vector.shape_cast %133 : vector<1x64x64xf32> to vector<64x64xf32>
    %135 = arith.mulf %134, %126 : vector<64x64xf32>
    %136 = arith.index_cast %c3_i32_69 : i32 to index
    %c0_72 = arith.constant 0 : index
    %c0_73 = arith.constant 0 : index
    %137 = vector.load %arg17[%136, %c0_72, %c0_73] : memref<8x64x64xf32, #tpu.memory_space<vmem>>, vector<1x64x64xf32>
    %138 = vector.shape_cast %137 : vector<1x64x64xf32> to vector<64x64xf32>
    %139 = arith.addf %135, %138 : vector<64x64xf32>
    %140 = arith.index_cast %c3_i32_69 : i32 to index
    %c0_74 = arith.constant 0 : index
    %c0_75 = arith.constant 0 : index
    %141 = vector.load %arg18[%140, %c0_74, %c0_75] : memref<8x64x64xf32, #tpu.memory_space<vmem>>, vector<1x64x64xf32>
    %142 = vector.shape_cast %141 : vector<1x64x64xf32> to vector<64x64xf32>
    %143 = arith.mulf %142, %139 : vector<64x64xf32>
    %144 = arith.addf %131, %143 : vector<64x64xf32>
    %c4_i32 = arith.constant 4 : i32
    %145 = arith.index_cast %c4_i32 : i32 to index
    %c0_76 = arith.constant 0 : index
    %c0_77 = arith.constant 0 : index
    %146 = vector.load %arg16[%145, %c0_76, %c0_77] : memref<8x64x64xf32, #tpu.memory_space<vmem>>, vector<1x64x64xf32>
    %147 = vector.shape_cast %146 : vector<1x64x64xf32> to vector<64x64xf32>
    %148 = arith.mulf %147, %139 : vector<64x64xf32>
    %149 = arith.index_cast %c4_i32 : i32 to index
    %c0_78 = arith.constant 0 : index
    %c0_79 = arith.constant 0 : index
    %150 = vector.load %arg17[%149, %c0_78, %c0_79] : memref<8x64x64xf32, #tpu.memory_space<vmem>>, vector<1x64x64xf32>
    %151 = vector.shape_cast %150 : vector<1x64x64xf32> to vector<64x64xf32>
    %152 = arith.addf %148, %151 : vector<64x64xf32>
    %153 = arith.index_cast %c4_i32 : i32 to index
    %c0_80 = arith.constant 0 : index
    %c0_81 = arith.constant 0 : index
    %154 = vector.load %arg18[%153, %c0_80, %c0_81] : memref<8x64x64xf32, #tpu.memory_space<vmem>>, vector<1x64x64xf32>
    %155 = vector.shape_cast %154 : vector<1x64x64xf32> to vector<64x64xf32>
    %156 = arith.mulf %155, %152 : vector<64x64xf32>
    %157 = arith.addf %144, %156 : vector<64x64xf32>
    %c5_i32 = arith.constant 5 : i32
    %158 = arith.index_cast %c5_i32 : i32 to index
    %c0_82 = arith.constant 0 : index
    %c0_83 = arith.constant 0 : index
    %159 = vector.load %arg16[%158, %c0_82, %c0_83] : memref<8x64x64xf32, #tpu.memory_space<vmem>>, vector<1x64x64xf32>
    %160 = vector.shape_cast %159 : vector<1x64x64xf32> to vector<64x64xf32>
    %161 = arith.mulf %160, %152 : vector<64x64xf32>
    %162 = arith.index_cast %c5_i32 : i32 to index
    %c0_84 = arith.constant 0 : index
    %c0_85 = arith.constant 0 : index
    %163 = vector.load %arg17[%162, %c0_84, %c0_85] : memref<8x64x64xf32, #tpu.memory_space<vmem>>, vector<1x64x64xf32>
    %164 = vector.shape_cast %163 : vector<1x64x64xf32> to vector<64x64xf32>
    %165 = arith.addf %161, %164 : vector<64x64xf32>
    %166 = arith.index_cast %c5_i32 : i32 to index
    %c0_86 = arith.constant 0 : index
    %c0_87 = arith.constant 0 : index
    %167 = vector.load %arg18[%166, %c0_86, %c0_87] : memref<8x64x64xf32, #tpu.memory_space<vmem>>, vector<1x64x64xf32>
    %168 = vector.shape_cast %167 : vector<1x64x64xf32> to vector<64x64xf32>
    %169 = arith.mulf %168, %165 : vector<64x64xf32>
    %170 = arith.addf %157, %169 : vector<64x64xf32>
    %c6_i32 = arith.constant 6 : i32
    %171 = arith.index_cast %c6_i32 : i32 to index
    %c0_88 = arith.constant 0 : index
    %c0_89 = arith.constant 0 : index
    %172 = vector.load %arg16[%171, %c0_88, %c0_89] : memref<8x64x64xf32, #tpu.memory_space<vmem>>, vector<1x64x64xf32>
    %173 = vector.shape_cast %172 : vector<1x64x64xf32> to vector<64x64xf32>
    %174 = arith.mulf %173, %165 : vector<64x64xf32>
    %175 = arith.index_cast %c6_i32 : i32 to index
    %c0_90 = arith.constant 0 : index
    %c0_91 = arith.constant 0 : index
    %176 = vector.load %arg17[%175, %c0_90, %c0_91] : memref<8x64x64xf32, #tpu.memory_space<vmem>>, vector<1x64x64xf32>
    %177 = vector.shape_cast %176 : vector<1x64x64xf32> to vector<64x64xf32>
    %178 = arith.addf %174, %177 : vector<64x64xf32>
    %179 = arith.index_cast %c6_i32 : i32 to index
    %c0_92 = arith.constant 0 : index
    %c0_93 = arith.constant 0 : index
    %180 = vector.load %arg18[%179, %c0_92, %c0_93] : memref<8x64x64xf32, #tpu.memory_space<vmem>>, vector<1x64x64xf32>
    %181 = vector.shape_cast %180 : vector<1x64x64xf32> to vector<64x64xf32>
    %182 = arith.mulf %181, %178 : vector<64x64xf32>
    %183 = arith.addf %170, %182 : vector<64x64xf32>
    %c7_i32 = arith.constant 7 : i32
    %184 = arith.index_cast %c7_i32 : i32 to index
    %c0_94 = arith.constant 0 : index
    %c0_95 = arith.constant 0 : index
    %185 = vector.load %arg16[%184, %c0_94, %c0_95] : memref<8x64x64xf32, #tpu.memory_space<vmem>>, vector<1x64x64xf32>
    %186 = vector.shape_cast %185 : vector<1x64x64xf32> to vector<64x64xf32>
    %187 = arith.mulf %186, %178 : vector<64x64xf32>
    %188 = arith.index_cast %c7_i32 : i32 to index
    %c0_96 = arith.constant 0 : index
    %c0_97 = arith.constant 0 : index
    %189 = vector.load %arg17[%188, %c0_96, %c0_97] : memref<8x64x64xf32, #tpu.memory_space<vmem>>, vector<1x64x64xf32>
    %190 = vector.shape_cast %189 : vector<1x64x64xf32> to vector<64x64xf32>
    %191 = arith.addf %187, %190 : vector<64x64xf32>
    %192 = arith.index_cast %c7_i32 : i32 to index
    %c0_98 = arith.constant 0 : index
    %c0_99 = arith.constant 0 : index
    %193 = vector.load %arg18[%192, %c0_98, %c0_99] : memref<8x64x64xf32, #tpu.memory_space<vmem>>, vector<1x64x64xf32>
    %194 = vector.shape_cast %193 : vector<1x64x64xf32> to vector<64x64xf32>
    %195 = arith.mulf %194, %191 : vector<64x64xf32>
    %196 = arith.addf %183, %195 : vector<64x64xf32>
    %c8_i32 = arith.constant 8 : i32
    %cst_100 = arith.constant dense<0.000000e+00> : vector<64xf32>
    %197 = vector.multi_reduction <add>, %196, %cst_100 [0] : vector<64x64xf32> to vector<64xf32>
    %198 = vector.shape_cast %197 : vector<64xf32> to vector<1x64xf32>
    %c0_101 = arith.constant 0 : index
    %c0_102 = arith.constant 0 : index
    %199 = vector.load %arg11[%c0_101, %c0_102] : memref<1x64xf32, #tpu.memory_space<vmem>>, vector<1x64xf32>
    %200 = arith.mulf %53, %11 : vector<8x64xf32>
    %cst_103 = arith.constant dense<0.000000e+00> : vector<64xf32>
    %201 = vector.multi_reduction <add>, %200, %cst_103 [0] : vector<8x64xf32> to vector<64xf32>
    %202 = vector.shape_cast %201 : vector<64xf32> to vector<1x64xf32>
    %203 = arith.mulf %199, %202 : vector<1x64xf32>
    %204 = arith.addf %198, %203 : vector<1x64xf32>
    %cst_104 = arith.constant 1.250000e-01 : f32
    %205 = vector.broadcast %cst_104 : f32 to vector<1x64xf32>
    %206 = arith.mulf %204, %205 : vector<1x64xf32>
    %c0_105 = arith.constant 0 : index
    %c0_106 = arith.constant 0 : index
    %207 = vector.load %arg12[%c0_105, %c0_106] : memref<64x32xf32, #tpu.memory_space<vmem>>, vector<64x32xf32>
    %cst_107 = arith.constant dense<0.000000e+00> : vector<1x32xf32>
    %208 = tpu.matmul %206, %207, %cst_107 {dimension_numbers = #tpu.dot_dimension_numbers<[1], [0], [0], [1], [0, 0, 1, 1], [], []>} : vector<1x64xf32>, vector<64x32xf32>, vector<1x32xf32> -> vector<1x32xf32>
    %c0_108 = arith.constant 0 : index
    %c0_109 = arith.constant 0 : index
    %209 = vector.load %arg13[%c0_108, %c0_109] : memref<32x4xf32, #tpu.memory_space<vmem>>, vector<32x4xf32>
    %cst_110 = arith.constant dense<0.000000e+00> : vector<1x4xf32>
    %210 = tpu.matmul %208, %209, %cst_110 {dimension_numbers = #tpu.dot_dimension_numbers<[1], [0], [0], [1], [0, 0, 1, 1], [], []>} : vector<1x32xf32>, vector<32x4xf32>, vector<1x4xf32> -> vector<1x4xf32>
    %c0_111 = arith.constant 0 : index
    %c0_112 = arith.constant 0 : index
    %211 = vector.load %arg14[%c0_111, %c0_112] : memref<1x4xf32, #tpu.memory_space<vmem>>, vector<1x4xf32>
    %212 = arith.addf %210, %211 : vector<1x4xf32>
    %c0_113 = arith.constant 0 : index
    %c0_114 = arith.constant 0 : index
    %c0_115 = arith.constant 0 : index
    %213 = vector.load %arg15[%c0_113, %c0_114, %c0_115] : memref<1x1x4xf32, #tpu.memory_space<vmem>>, vector<1x1x4xf32>
    %214 = vector.shape_cast %213 : vector<1x1x4xf32> to vector<1x4xf32>
    %215 = vector.shape_cast %212 : vector<1x4xf32> to vector<1x1x4xf32>
    tpu.vector_store %arg15[%c0_113, %c0_114, %c0_115], %215 {strides = array<i32>} : memref<1x1x4xf32, #tpu.memory_space<vmem>>, vector<1x1x4xf32>,
    return
  }
  func.func @transform_0(%arg0: i32) -> (i32, i32, i32) {
    %c0_i32 = arith.constant 0 : i32
    %c0_i32_0 = arith.constant 0 : i32
    %c0_i32_1 = arith.constant 0 : i32
    return %arg0, %c0_i32, %c0_i32_0 : i32, i32, i32
  }
  func.func @transform_1(%arg0: i32) -> (i32, i32) {
    %c0_i32 = arith.constant 0 : i32
    %c0_i32_0 = arith.constant 0 : i32
    %c0_i32_1 = arith.constant 0 : i32
    return %c0_i32, %c0_i32_0 : i32, i32
  }
  func.func @transform_2(%arg0: i32) -> (i32, i32) {
    %c0_i32 = arith.constant 0 : i32
    %c0_i32_0 = arith.constant 0 : i32
    %c0_i32_1 = arith.constant 0 : i32
    return %c0_i32, %c0_i32_0 : i32, i32
  }
  func.func @transform_3(%arg0: i32) -> (i32, i32) {
    %c0_i32 = arith.constant 0 : i32
    %c0_i32_0 = arith.constant 0 : i32
    %c0_i32_1 = arith.constant 0 : i32
    return %c0_i32, %c0_i32_0 : i32, i32
  }
  func.func @transform_4(%arg0: i32) -> (i32, i32) {
    %c0_i32 = arith.constant 0 : i32
    %c0_i32_0 = arith.constant 0 : i32
    %c0_i32_1 = arith.constant 0 : i32
    return %c0_i32, %c0_i32_0 : i32, i32
  }
  func.func @transform_5(%arg0: i32) -> (i32, i32) {
    %c0_i32 = arith.constant 0 : i32
    %c0_i32_0 = arith.constant 0 : i32
    %c0_i32_1 = arith.constant 0 : i32
    return %c0_i32, %c0_i32_0 : i32, i32
  }
  func.func @transform_6(%arg0: i32) -> (i32, i32) {
    %c0_i32 = arith.constant 0 : i32
    %c0_i32_0 = arith.constant 0 : i32
    %c0_i32_1 = arith.constant 0 : i32
    return %c0_i32, %c0_i32_0 : i32, i32
  }
  func.func @transform_7(%arg0: i32) -> (i32, i32) {
    %c0_i32 = arith.constant 0 : i32
    %c0_i32_0 = arith.constant 0 : i32
    %c0_i32_1 = arith.constant 0 : i32
    return %c0_i32, %c0_i32_0 : i32, i32
  }
  func.func @transform_8(%arg0: i32) -> (i32, i32) {
    %c0_i32 = arith.constant 0 : i32
    %c0_i32_0 = arith.constant 0 : i32
    %c0_i32_1 = arith.constant 0 : i32
    return %c0_i32, %c0_i32_0 : i32, i32
  }
  func.func @transform_9(%arg0: i32) -> (i32, i32) {
    %c0_i32 = arith.constant 0 : i32
    %c0_i32_0 = arith.constant 0 : i32
    %c0_i32_1 = arith.constant 0 : i32
    return %c0_i32, %c0_i32_0 : i32, i32
  }
  func.func @transform_10(%arg0: i32) -> (i32, i32) {
    %c0_i32 = arith.constant 0 : i32
    %c0_i32_0 = arith.constant 0 : i32
    %c0_i32_1 = arith.constant 0 : i32
    return %c0_i32, %c0_i32_0 : i32, i32
  }
  func.func @transform_11(%arg0: i32) -> (i32, i32) {
    %c0_i32 = arith.constant 0 : i32
    %c0_i32_0 = arith.constant 0 : i32
    %c0_i32_1 = arith.constant 0 : i32
    return %c0_i32, %c0_i32_0 : i32, i32
  }
  func.func @transform_12(%arg0: i32) -> (i32, i32) {
    %c0_i32 = arith.constant 0 : i32
    %c0_i32_0 = arith.constant 0 : i32
    %c0_i32_1 = arith.constant 0 : i32
    return %c0_i32, %c0_i32_0 : i32, i32
  }
  func.func @transform_13(%arg0: i32) -> (i32, i32) {
    %c0_i32 = arith.constant 0 : i32
    %c0_i32_0 = arith.constant 0 : i32
    %c0_i32_1 = arith.constant 0 : i32
    return %c0_i32, %c0_i32_0 : i32, i32
  }
  func.func @transform_14(%arg0: i32) -> (i32, i32, i32) {
    %c0_i32 = arith.constant 0 : i32
    %c0_i32_0 = arith.constant 0 : i32
    %c0_i32_1 = arith.constant 0 : i32
    return %arg0, %c0_i32, %c0_i32_0 : i32, i32, i32
  }
}

</mosaic_0001>

<bundles_post_ra>
// kernel: tpu_custom_call.1
= control target key start
LH: loop header
LB: loop body
LE: loop exit
PB: predicated region body
PF: predicated region fallthrough
CT: control target
= control target key end

     0   :  { %s5514_s0 = inlined_call_operand.hbm [shape: f32[2,8,32], index: 0, kind: input, shape index: {}]   ;;  %s5515_s1 = inlined_call_operand.hbm [shape: f32[32,64], index: 1, kind: input, shape index: {}]   ;;  %s5516_s2 = inlined_call_operand.hbm [shape: f32[32,64], index: 2, kind: input, shape index: {}]   ;;  %s5517_s3 = inlined_call_operand.hbm [shape: f32[4,64], index: 3, kind: input, shape index: {}]   ;;  %s5518_s4 = inlined_call_operand.vmem [shape: f32[1,64], index: 4, kind: input, shape index: {}]   ;;  %s5519_s5 = inlined_call_operand.vmem [shape: f32[64,64], index: 5, kind: input, shape index: {}]   ;;  %s5520_s6 = inlined_call_operand.vmem [shape: f32[1,64], index: 6, kind: input, shape index: {}]   ;;  %s5521_s7 = inlined_call_operand.vmem [shape: f32[64,64], index: 7, kind: input, shape index: {}]   ;;  %s5522_s8 = inlined_call_operand.hbm [shape: f32[64,64], index: 8, kind: input, shape index: {}]   ;;  %s5523_s9 = inlined_call_operand.hbm [shape: f32[64,64], index: 9, kind: input, shape index: {}]   ;;  %s5524_s10 = inlined_call_operand.vmem [shape: f32[1,64], index: 10, kind: input, shape index: {}]   ;;  %s5525_s11 = inlined_call_operand.vmem [shape: f32[64,32], index: 11, kind: input, shape index: {}]   ;;  %s5526_s12 = inlined_call_operand.vmem [shape: f32[32,4], index: 12, kind: input, shape index: {}]   ;;  %s5527_s13 = inlined_call_operand.vmem [shape: f32[1,4], index: 13, kind: input, shape index: {}]   ;;  %s5528_s14 = inlined_call_operand.hbm [shape: f32[2,1,4], index: 14, kind: output, shape index: {}]  }
   0x1   :  { %5560 = sst [smem:[#allocation46_spill]] %s5515_s1 }
   0x2   :  { %5561 = sst [smem:[#allocation47_spill]] %s5520_s6 }
   0x3   :  { %5562 = sst [smem:[#allocation48_spill]] %s5524_s10 }
   0x4   :  { %5563 = sst [smem:[#allocation49_spill]] %s5525_s11 }
   0x5   :  { %5564 = sst [smem:[#allocation50_spill]] %s5526_s12 }
   0x6   :  { %5565 = sst [smem:[#allocation51_spill]] %s5527_s13 }
   0x7   :  { %5566 = sst [smem:[#allocation52_spill]] %s5528_s14 }
   0x8   :  { %19 = vsyncpa [#allocation6], 0 }
   0x9   :  { %21 = vsyncpa [#allocation6 + $0x1], 0 }
   0xa   :  { %22 = vsyncpa [#allocation9], 0 }
   0xb   :  { %23 = vsyncpa [#allocation12], 0 }
   0xc   :  { %24 = vsyncpa [#allocation15], 0 }
   0xd   :  { %25 = vsyncpa [#allocation7], 0 }
   0xe   :  { %27 = vsyncpa [#allocation7 + $0x1], 0  ;;  %s4009_s29 = smov 0   ;;  %s4011_s30 = smov 0  }
   0xf   :  { %s4013_s15 = smov 0   ;;  %s4015_s16 = smov 0  }
  0x10 LB: > { %s3921_s17 = smov [#allocation8]   ;;  %s4030_s19 = sadd.s32 4294967295, %s3919_s16   ;;  %s3919_s16 = sphi %s4015_s16, %s5644_s16   ;;  %s3915_s15 = sphi %s4013_s15, %s5643_s15   ;;  %s3911_s30 = sphi %s4011_s30, %s5642_s30   ;;  %s3907_s29 = sphi %s4009_s29, %s5641_s29  }
  0x11   : > { %s375_s18 = sshll.u32 %s3921_s17, 4  ;;  %p3168_p0 = scmp.ge.s32.totalorder %s3919_s16, 1  ;;  %s4035_s18 = int_to_ptr.vmem [resolvable:$true] %s375_s18 }
  0x12   : > { %p5532_p1 = scmp.eq.s32.totalorder %s4030_s19, 0  ;;  %p363_p2 = scmp.lt.s32.totalorder %s3919_s16, 3 }
  0x13   : > { %s3922_s21 = smov [#allocation11]   ;;  %s3923_s24 = smov [#allocation10]  }
  0x14   : > { %p4037_p3 = pnand %p3168_p0, %p363_p2  ;;  %s402_s22 = sshll.u32 %s3922_s21, 4  ;;  %s4050_s22 = int_to_ptr.vmem [resolvable:$true] %s402_s22 }
  0x15   : > { %s388_s25 = sshll.u32 %s3923_s24, 4  ;;  %s5569_s1 = sld [smem:[#allocation46_spill]]  ;;  %s4052_s25 = int_to_ptr.vmem [resolvable:$true] %s388_s25 }
  0x16   : > { %s5567_s20 = scalar_select %p4037_p3, 1, 0 }
  0x17   : > { %p3452_p5 = pneg %p4037_p3 }
  0x19   : > { %p4046_p6 = pnand %p3452_p5, %p5532_p1 }
  0x1b   : > { %s3671_s28 = scalar_lea.hbm %s5569_s1, 512  ;;  %p4062_p8 = pneg %p4046_p6 }
  0x1c   : > { %p3672_p7 = scmp.ne.s32.totalorder %s5569_s1, %s3671_s28  ;;  %p3678_p11 = scmp.lt.u32.totalorder %s3671_s28, %s5569_s1 }
  0x1e   : > { %p3674_p9 = pnand %p4062_p8, %p3672_p7 }
  0x20   : > { %p3675_p10 = pneg %p3674_p9 }
  0x22   : > { %p3680_p12 = pnand %p3678_p11, %p3675_p10 }
  0x24   : > { %3683 = shalt.err (!%p3680_p12)
}
  0x25   : > { %s3684_s14 = scalar_lea.vmem %s4035_s18, 512  ;;  %p3692_p5 = scmp.lt.s32.totalorder %s4035_s18, %s4035_s18 }
  0x26   : > { %p3685_p13 = scmp.ne.s32.totalorder %s4035_s18, %s3684_s14  ;;  %p3693_p4 = scmp.lt.s32.totalorder %s3684_s14, %s3684_s14 }
  0x28   : > { %p3687_p0 = pnand %p3685_p13, %p4062_p8  ;;  %p3694_p7 = por %p3693_p4, %p3692_p5 }
  0x2a   : > { %p3688_p2 = pneg %p3687_p0 }
  0x2c   : > { %p3695_p9 = pnand %p3694_p7, %p3688_p2 }
  0x2e   : > { %3698 = shalt.err (!%p3695_p9)
}
  0x2f   : > { %s3924_s26 = smov 128   ;;  %s3925_s13 = smov 8  }
  0x30   : > { %3455 = dma.hbm_to_vmem [thread:$0]  (!%p4046_p6), %s5569_s1, 512, %s4035_s18, [#allocation9], %s3924_s26, %s3924_s26, %s3925_s13  }
  0x31   : > { %s3699_s14 = scalar_lea.hbm %s5517_s3, 64 }
  0x32   : > { %p3700_p4 = scmp.ne.s32.totalorder %s5517_s3, %s3699_s14  ;;  %p3706_p12 = scmp.lt.u32.totalorder %s3699_s14, %s5517_s3 }
  0x34   : > { %p3702_p10 = pnand %p3700_p4, %p4062_p8 }
  0x36   : > { %p3703_p11 = pneg %p3702_p10 }
  0x38   : > { %p3708_p13 = pnand %p3706_p12, %p3703_p11 }
  0x3a   : > { %3711 = shalt.err (!%p3708_p13)
}
  0x3b   : > { %s3712_s18 = scalar_lea.vmem %s4050_s22, 64  ;;  %p3720_p7 = scmp.lt.s32.totalorder %s4050_s22, %s4050_s22 }
  0x3c   : > { %p3713_p0 = scmp.ne.s32.totalorder %s4050_s22, %s3712_s18  ;;  %p3721_p9 = scmp.lt.s32.totalorder %s3712_s18, %s3712_s18 }
  0x3e   : > { %p3715_p2 = pnand %p3713_p0, %p4062_p8  ;;  %p3722_p4 = por %p3721_p9, %p3720_p7 }
  0x40   : > { %p3716_p5 = pneg %p3715_p2 }
  0x42   : > { %p3723_p10 = pnand %p3722_p4, %p3716_p5 }
  0x44   : > { %3726 = shalt.err (!%p3723_p10)
}
  0x45   : > { %3461 = dma.hbm_to_vmem [thread:$0]  (!%p4046_p6), %s5517_s3, 64, %s4050_s22, [#allocation12]  }
  0x46   : > { %s3727_s27 = scalar_lea.hbm %s5516_s2, 512 }
  0x47   : > { %p3728_p11 = scmp.ne.s32.totalorder %s5516_s2, %s3727_s27  ;;  %p3734_p0 = scmp.lt.u32.totalorder %s3727_s27, %s5516_s2 }
  0x49   : > { %p3730_p12 = pnand %p3728_p11, %p4062_p8 }
  0x4b   : > { %p3731_p13 = pneg %p3730_p12 }
  0x4d   : > { %p3736_p2 = pnand %p3734_p0, %p3731_p13 }
  0x4f   : > { %3739 = shalt.err (!%p3736_p2)
}
  0x50   : > { %s3740_s22 = scalar_lea.vmem %s4052_s25, 512  ;;  %p3748_p4 = scmp.lt.s32.totalorder %s4052_s25, %s4052_s25 }
  0x51   : > { %p3741_p5 = scmp.ne.s32.totalorder %s4052_s25, %s3740_s22  ;;  %p3749_p10 = scmp.lt.s32.totalorder %s3740_s22, %s3740_s22 }
  0x53   : > { %p3743_p7 = pnand %p3741_p5, %p4062_p8  ;;  %p3750_p11 = por %p3749_p10, %p3748_p4 }
  0x55   : > { %p3744_p9 = pneg %p3743_p7 }
  0x57   : > { %p3751_p12 = pnand %p3750_p11, %p3744_p9 }
  0x59   : > { %3754 = shalt.err (!%p3751_p12)
}
  0x5a   : > { %3458 = dma.hbm_to_vmem [thread:$0]  (!%p4046_p6), %s5516_s2, 512, %s4052_s25, [#allocation9], %s3924_s26, %s3924_s26, %s3925_s13  }
  0x5b   : > { %s3926_s10 = smov [#allocation13]   ;;  %s3927_s12 = smov [#allocation14]  }
  0x5c   : > { %s424_s11 = sshll.u32 %s3926_s10, 4  ;;  %s437_s27 = sshll.u32 %s3927_s12, 4  ;;  %s425_s11 = int_to_ptr.vmem [resolvable:$true] %s424_s11  ;;  %s438_s27 = int_to_ptr.vmem [resolvable:$true] %s437_s27 }
  0x5d   : > { %s3755_s24 = scalar_lea.hbm %s5522_s8, 1024 }
  0x5e   : > { %p3756_p13 = scmp.ne.s32.totalorder %s5522_s8, %s3755_s24  ;;  %p3762_p5 = scmp.lt.u32.totalorder %s3755_s24, %s5522_s8 }
  0x60   : > { %p3758_p0 = pnand %p3756_p13, %p4062_p8 }
  0x62   : > { %p3759_p2 = pneg %p3758_p0 }
  0x64   : > { %p3764_p7 = pnand %p3762_p5, %p3759_p2 }
  0x66   : > { %3767 = shalt.err (!%p3764_p7)
}
  0x67   : > { %s3768_s25 = scalar_lea.vmem %s425_s11, 1024  ;;  %p3776_p11 = scmp.lt.s32.totalorder %s425_s11, %s425_s11 }
  0x68   : > { %p3769_p9 = scmp.ne.s32.totalorder %s425_s11, %s3768_s25  ;;  %p3777_p12 = scmp.lt.s32.totalorder %s3768_s25, %s3768_s25 }
  0x6a   : > { %p3771_p4 = pnand %p3769_p9, %p4062_p8  ;;  %p3778_p1 = por %p3777_p12, %p3776_p11 }
  0x6c   : > { %p3772_p10 = pneg %p3771_p4 }
  0x6e   : > { %p3779_p3 = pnand %p3778_p1, %p3772_p10 }
  0x70   : > { %3782 = shalt.err (!%p3779_p3)
}
  0x71   : > { %3464 = dma.hbm_to_vmem [thread:$0]  (!%p4046_p6), %s5522_s8, 1024, %s425_s11, [#allocation12], %s3924_s26, %s3924_s26, %s3925_s13  }
  0x72   : > { %s3783_s28 = scalar_lea.hbm %s5523_s9, 1024 }
  0x73   : > { %p3784_p1 = scmp.ne.s32.totalorder %s5523_s9, %s3783_s28  ;;  %p3790_p0 = scmp.lt.u32.totalorder %s3783_s28, %s5523_s9 }
  0x75   : > { %p3786_p3 = pnand %p3784_p1, %p4062_p8 }
  0x77   : > { %p3787_p13 = pneg %p3786_p3 }
  0x79   : > { %p3792_p2 = pnand %p3790_p0, %p3787_p13 }
  0x7b   : > { %3795 = shalt.err (!%p3792_p2)
}
  0x7c   : > { %s3796_s18 = scalar_lea.vmem %s438_s27, 1024  ;;  %p3804_p4 = scmp.lt.s32.totalorder %s438_s27, %s438_s27 }
  0x7d   : > { %p3797_p5 = scmp.ne.s32.totalorder %s438_s27, %s3796_s18  ;;  %p3805_p10 = scmp.lt.s32.totalorder %s3796_s18, %s3796_s18 }
  0x7f   : > { %p3799_p7 = pnand %p3797_p5, %p4062_p8  ;;  %p3806_p11 = por %p3805_p10, %p3804_p4 }
  0x81   : > { %p3800_p9 = pneg %p3799_p7 }
  0x83   : > { %p3807_p12 = pnand %p3806_p11, %p3800_p9 }
  0x85   : > { %3810 = shalt.err (!%p3807_p12)
}
  0x86   : > { %3467 = dma.hbm_to_vmem [thread:$0]  (!%p4046_p6), %s5523_s9, 1024, %s438_s27, [#allocation15], %s3924_s26, %s3924_s26, %s3925_s13  }
  0x87   : > { %s3167_s23 = sadd.s32 4294967294, %s3919_s16   ;;  %s4179_s21 = sadd.s32 1, %s3919_s16  }
  0x88   : > { %s40_s1 = sadd.s32 1, %s3915_s15  ;;  %s37_s6 = ssub.s32 %s3919_s16, %s4179_s21 }
  0x89   : > { %p47_p8 = scmp.ne.s32.totalorder %s3915_s15, %s3911_s30  ;;  %p38_p1 = scmp.eq.s32.totalorder %s37_s6, 0 }
  0x8a   : > { %p48_p3 = scmp.eq.s32.totalorder %s3919_s16, 0  ;;  %p53_p13 = scmp.ne.s32.totalorder %s3911_s30, %s3907_s29 }
  0x8b   : > { %p350_p0 = scmp.eq.s32.totalorder %s4030_s19, 1  ;;  %p5571_p5 = scmp.eq.s32.totalorder %s4030_s19, 0 }
  0x8c   : > { %s4191_s10 = scalar_select %p38_p1, %s3915_s15, %s40_s1  }
  0x8d   : > { %p49_p2 = por %p48_p3, %p47_p8  ;;  %p4195_p7 = por %p5571_p5, %p53_p13 }
  0x8e   : > { %p4199_p6 = por %p350_p0, %p47_p8  ;;  %p356_p9 = scmp.eq.s32.totalorder %s3167_s23, 1 }
  0x8f   : > { %p3481_p4 = scmp.lt.s32.totalorder %s3919_s16, 2  ;;  %s463_s13 = sand.u32 1, %s3915_s15  }
  0x90   : > { %s5573_s26 = scalar_select %p4199_p6, 1, 0 }
  0x91   : > { %p4205_p10 = por %p356_p9, %p53_p13  ;;  %s3175_s28 = sshll.u32 %s463_s13, 3 }
  0x92   : > { %s3176_s17 = sshll.u32 %s3919_s16, 7  ;;  %s467_s18 = scalar_lea.vmem [#allocation5], %s3175_s28 }
  0x93   : > { %s5574_s27 = scalar_select %p4205_p10, 1, 0 }
  0x94   : > { %s4213_s22 = scalar_lea.hbm %s5514_s0, %s3176_s17  ;;  %s474_s11 = sshll.u32 %s467_s18, 4  ;;  %s4219_s11 = int_to_ptr.vmem [resolvable:$true] %s474_s11 }
  0x95   : > { %p4215_p11 = pnand %p3481_p4, %p49_p2  ;;  %s464_s23 = scalar_lea.sflag [#allocation6], %s463_s13 }
  0x96   : > { %s3811_s1 = scalar_lea.hbm %s4213_s22, 128  ;;  %s3816_s17 = scalar_lea.hbm %s5514_s0, 256 }
  0x97   : > { %p3812_p12 = scmp.ne.s32.totalorder %s4213_s22, %s3811_s1  ;;  %p3813_p8 = pneg %p4215_p11 }
  0x98   : > { %p3817_p13 = scmp.lt.u32.totalorder %s4213_s22, %s5514_s0  ;;  %p3818_p0 = scmp.lt.u32.totalorder %s3816_s17, %s3811_s1 }
  0x99   : > { %p3814_p1 = pnand %p3813_p8, %p3812_p12  ;;  %p3820_p5 = scmp.lt.u32.totalorder %s3811_s1, %s4213_s22 }
  0x9a   : > { %p3819_p2 = por %p3818_p0, %p3817_p13 }
  0x9b   : > { %p3815_p3 = pneg %p3814_p1 }
  0x9c   : > { %p3821_p9 = por %p3820_p5, %p3819_p2 }
  0x9e   : > { %p3822_p4 = pnand %p3821_p9, %p3815_p3 }
  0xa0   : > { %3825 = shalt.err (!%p3822_p4)
}
  0xa1   : > { %s3826_s13 = scalar_lea.vmem %s4219_s11, 128  ;;  %s3928_s18 = smov [#allocation5]  }
  0xa2   : > { %p3827_p12 = scmp.ne.s32.totalorder %s4219_s11, %s3826_s13  ;;  %s3831_s6 = sshll.u32 %s3928_s18, 4  ;;  %s3832_s6 = int_to_ptr.vmem [resolvable:$false] %s3831_s6 }
  0xa3   : > { %s3833_s28 = scalar_lea.vmem %s3832_s6, 256  ;;  %p3834_p6 = scmp.lt.s32.totalorder %s4219_s11, %s3832_s6 }
  0xa4   : > { %p3829_p1 = pnand %p3827_p12, %p3813_p8  ;;  %p3835_p13 = scmp.lt.s32.totalorder %s3833_s28, %s3826_s13 }
  0xa6   : > { %p3830_p10 = pneg %p3829_p1  ;;  %p3836_p0 = por %p3835_p13, %p3834_p6 }
  0xa8   : > { %p3837_p2 = pnand %p3836_p0, %p3830_p10 }
  0xaa   : > { %3840 = shalt.err (!%p3837_p2)
}
  0xab   : > { %3471 = dma.hbm_to_vmem [thread:$0]  (!%p4215_p11), %s4213_s22, 128, %s4219_s11, %s464_s23  }
  0xac   : > { %p5576_p3 = scmp.ne.s32.totalorder %s5567_s20, 0 }
  0xae   : > { %483 = sbr.rel (%p5576_p3) target bundleno = 1514 (0x5ea), region = 76 }
  0xb5   : > { %s4249_s1 = sand.u32 1, %s3911_s30  }
  0xb6   : > { %s3178_s17 = sshll.u32 %s4249_s1, 3  ;;  %s486_s24 = scalar_lea.sflag [#allocation6], %s4249_s1 }
  0xb7   : > { %s4253_s14 = scalar_lea.vmem [#allocation5], %s3178_s17 }
  0xb8   : > { %3886 = dma.done.wait (%p4195_p7), %s486_s24, 128  }
  0xb9   : > { %3888 = vsyncadd (%p4195_p7), %s486_s24, 4294967168  ;;  %p5577_p6 = scmp.eq.s32.totalorder %s4030_s19, 0 }
  0xbb   : > { %3890 = dma.done.wait (%p5577_p6), [#allocation9], 1024   ;;  %p5578_p10 = pmov %p5577_p6 }
  0xbc   : > { %p5579_p11 = pmov %p5577_p6 }
  0xbd   : > { %3892 = vsyncadd (%p5578_p10), [#allocation9], 4294966272 }
  0xbe   : > { %3894 = dma.done.wait (%p5579_p11), [#allocation12], 1088   ;;  %p5580_p8 = pmov %p5577_p6 }
  0xbf   : > { %p5581_p5 = pmov %p5577_p6 }
  0xc0   : > { %3896 = vsyncadd (%p5580_p8), [#allocation12], 4294966208 }
  0xc1   : > { %3898 = dma.done.wait (%p5581_p5), [#allocation15], 1024   ;;  %p5582_p9 = pmov %p5581_p5 }
  0xc2   : > { %v3929_v0 = vmov 0.0|0.0   ;;  %vm3930_vm0 = vmmov 0   ;;  %v3931_v1 = vmov 0.0   ;;  %v554_v2 = vld [vmem:[#allocation8] sm:$0xff]  ;;  %v555_v3 = vld [vmem:[#allocation8 + $0x8] sm:$0xff]  ;;  %v556_v4 = vld [vmem:[#allocation8 + $0x10] sm:$0xff]  ;;  %v713_v39 = vlaneseq }
  0xc3   : > { %3900 = vsyncadd (%p5582_p9), [#allocation15], 4294966272  ;;  %3362 = vmatprep.subr.bf16.mxu0 %v3929_v0  ;;  %3261 = vmatprep.mubr.msk.f32.mxu0 %vm3930_vm0, %v3931_v1  ;;  %v3363_v5 = vpack.c.bf16 %v555_v3, %v554_v2  ;;  %v557_v6 = vld [vmem:[#allocation8 + $0x18] sm:$0xff]  ;;  %v632_v7 = vld [vmem:[#allocation10] sm:$0xff]  ;;  %vm558_vm1 = vcmask 261120   ;;  %vm782_vm5 = vcmask 523264  }
  0xc4   : > { %3368 = vmatprep.subr.bf16.mxu1 %v3929_v0  ;;  %3272 = vmatprep.mubr.msk.f32.mxu1 %vm3930_vm0, %v3931_v1  ;;  %v633_v8 = vld [vmem:[#allocation10 + $0x8] sm:$0xff]  ;;  %v634_v9 = vld [vmem:[#allocation10 + $0x10] sm:$0xff]  ;;  %v635_v10 = vld [vmem:[#allocation10 + $0x18] sm:$0xff]  ;;  %v3366_v11 = vpack.c.bf16 %v557_v6, %v556_v4  ;;  %v4344_v40 = vshrl.u32 %v713_v39, 7  ;;  %s5583_s17 = sld [smem:[#allocation47_spill]]  ;;  %s5584_s20 = sld [smem:[#allocation49_spill]] }
  0xc5   : > { %3364 = vmatpush3.bf16.msra.mxu0 %v3363_v5  ;;  %v3369_v12 = vpack.c.bf16 %v633_v8, %v632_v7  ;;  %v3372_v13 = vpack.c.bf16 %v635_v10, %v634_v9  ;;  %v553_v14 = vld [vmem:[%s4253_s14] sm:$0xff]  ;;  %v769_v21 = vld [vmem:[%s5519_s5 + $0x10] sm:$0xff]  ;;  %v770_v22 = vld [vmem:[%s5519_s5 + $0x18] sm:$0xff]  ;;  %s5585_s23 = sld [smem:[#allocation50_spill]]  ;;  %s5635_s22 = sld [smem:[#allocation48_spill]]  ;;  %vm3038_vm8 = vcmask 24576  }
  0xc6   : > { %3365 = vmatprep.subr.bf16.mxu0 %v3929_v0  ;;  %v767_v15 = vld [vmem:[%s5519_s5] sm:$0xff]  ;;  %v768_v16 = vld [vmem:[%s5519_s5 + $0x8] sm:$0xff]  ;;  %v3378_v23 = vpack.c.bf16 %v770_v22, %v769_v21  ;;  %v872_v24 = vld [vmem:[%s5521_s7 + $0x10] sm:$0xff]  ;;  %vm716_vm2 = vcmp.lt.s32.totalorder %v4344_v40, 3  ;;  %vm726_vm3 = vcmp.lt.s32.totalorder %v4344_v40, 2  ;;  %vm736_vm4 = vcmp.lt.s32.totalorder %v4344_v40, 1 }
  0xc7   : > { %3370 = vmatpush3.bf16.msra.mxu1 %v3369_v12  ;;  %v3375_v17 = vpack.c.bf16 %v768_v16, %v767_v15  ;;  %v870_v18 = vld [vmem:[%s5521_s7] sm:$0xff]  ;;  %v871_v19 = vld [vmem:[%s5521_s7 + $0x8] sm:$0xff]  ;;  %v873_v25 = vld [vmem:[%s5521_s7 + $0x18] sm:$0xff]  ;;  %s5636_s13 = sld [smem:[#allocation51_spill]]  ;;  %s3199_s18 = sshll.u32 %s4030_s19, 4 }
  0xc8   : > { %3371 = vmatprep.subr.bf16.mxu1 %v3929_v0  ;;  %v3387_v20 = vpack.c.bf16 %v871_v19, %v870_v18  ;;  %v3390_v26 = vpack.c.bf16 %v873_v25, %v872_v24  ;;  %v771_v27 = vld [vmem:[%s5519_s5 + $0x20] sm:$0xff]  ;;  %v772_v28 = vld [vmem:[%s5519_s5 + $0x28] sm:$0xff]  ;;  %v773_v33 = vld [vmem:[%s5519_s5 + $0x30] sm:$0xff]  ;;  %s552_s6 = scalar_lea.vmem [#allocation16], %s4249_s1  ;;  %s5637_s14 = sld [smem:[#allocation52_spill]] }
  0xc9   : > { %3367 = vmatpush3.bf16.msra.mxu0 %v3366_v11  ;;  %v3381_v29 = vpack.c.bf16 %v772_v28, %v771_v27  ;;  %v874_v30 = vld [vmem:[%s5521_s7 + $0x20] sm:$0xff]  ;;  %v875_v31 = vld [vmem:[%s5521_s7 + $0x28] sm:$0xff]  ;;  %v774_v34 = vld [vmem:[%s5519_s5 + $0x38] sm:$0xff]  ;;  %v1468_v28 = vsub.s32 1, %v4344_v40  ;;  %s3053_s28 = sshll.u32 %s552_s6, 4  ;;  %p5638_p4 = scmp.ne.s32.totalorder %s5573_s26, 0  ;;  %s5472_s28 = int_to_ptr.vmem [resolvable:$true] %s3053_s28 }
  0xca   : > { %3374 = vmatprep.subr.bf16.mxu0 %v3929_v0  ;;  %v3393_v32 = vpack.c.bf16 %v875_v31, %v874_v30  ;;  %v3384_v35 = vpack.c.bf16 %v774_v34, %v773_v33  ;;  %v876_v36 = vld [vmem:[%s5521_s7 + $0x30] sm:$0xff]  ;;  %v877_v37 = vld [vmem:[%s5521_s7 + $0x38] sm:$0xff]  ;;  %v3191_v61 = vld [vmem:[%s5518_s4] ss:$0 sm:$0xff]  ;;  %v1503_v30 = vsub.s32 2, %v4344_v40  ;;  %v1538_v31 = vsub.s32 3, %v4344_v40 }
  0xcb   : > { %3373 = vmatpush3.bf16.msra.mxu1 %v3372_v13  ;;  %v3396_v38 = vpack.c.bf16 %v877_v37, %v876_v36  ;;  %v3187_v42 = vld [vmem:[#allocation11] ss:$0 sm:$0xff]  ;;  %v3188_v45 = vld [vmem:[#allocation11 + $0x1] ss:$0 sm:$0xff]  ;;  %v3189_v52 = vld [vmem:[#allocation11 + $0x2] ss:$0 sm:$0xff] }
  0xcc   : > { %3262 = vmatmul.mubr.msk.f32.vlgmr.msra.gmra.mrb[0].mxu0 %vm558_vm1, %v553_v14  ;;  %3386 = vmatprep.subr.bf16.mxu1 %v3929_v0  ;;  %v3190_v56 = vld [vmem:[#allocation11 + $0x3] ss:$0 sm:$0xff]  ;;  %v948_v5 = vld [vmem:[#allocation13] sm:$0xff]  ;;  %v949_v6 = vld [vmem:[#allocation13 + $0x8] sm:$0xff]  ;;  %v1608_v33 = vsub.s32 5, %v4344_v40  ;;  %v1643_v34 = vsub.s32 6, %v4344_v40 }
  0xcd   : > { %3291 = vmatprep.mubr.msk.f32.mxu0 %vm3930_vm0, %v3931_v1  ;;  %3376 = vmatpush3.bf16.msra.mxu0 %v3375_v17  ;;  %v3399_v8 = vpack.c.bf16 %v949_v6, %v948_v5  ;;  %v950_v10 = vld [vmem:[#allocation13 + $0x10] sm:$0xff]  ;;  %v951_v11 = vld [vmem:[#allocation13 + $0x18] sm:$0xff]  ;;  %v952_v13 = vld [vmem:[#allocation13 + $0x20] sm:$0xff]  ;;  %v1678_v37 = vsub.s32 7, %v4344_v40  ;;  %s3841_s11 = scalar_lea.vmem %s5472_s28, 16  ;;  %s3933_s19 = smov [#allocation16]  }
  0xce   : > { %3273 = vmatmul.mubr.msk.f32.vlgmr.msra.gmra.mrb[0].mxu1 %vm558_vm1, %v553_v14  ;;  %3377 = vmatprep.subr.bf16.mxu0 %v3929_v0  ;;  %v3402_v12 = vpack.c.bf16 %v951_v11, %v950_v10  ;;  %v953_v14 = vld [vmem:[#allocation13 + $0x28] sm:$0xff]  ;;  %v954_v16 = vld [vmem:[#allocation13 + $0x30] sm:$0xff]  ;;  %v955_v17 = vld [vmem:[#allocation13 + $0x38] sm:$0xff]  ;;  %s5470_s12 = scalar_lea.hbm %s5637_s14, %s3199_s18  ;;  %p3842_p7 = scmp.ne.s32.totalorder %s5472_s28, %s3841_s11 }
  0xcf   : > { %3310 = vmatprep.mubr.msk.f32.mxu1 %vm3930_vm0, %v3931_v1  ;;  %3388 = vmatpush3.bf16.msra.mxu1 %v3387_v20  ;;  %v3405_v15 = vpack.c.bf16 %v953_v14, %v952_v13  ;;  %v3408_v18 = vpack.c.bf16 %v955_v17, %v954_v16  ;;  %v3193_v19 = vld [vmem:[%s5583_s17] ss:$0 sm:$0xff]  ;;  %v4376_v20 = vsub.s32 0, %v4344_v40  ;;  %v4443_v5 = vld [vmem:[#allocation14] sm:$0xff]  ;;  %s3845_s25 = sshll.u32 %s3933_s19, 4  ;;  %s3846_s25 = int_to_ptr.vmem [resolvable:$false] %s3845_s25 }
  0xd0   : > { %3389 = vmatprep.subr.bf16.mxu1 %v3929_v0  ;;  %v4446_v6 = vld [vmem:[#allocation14 + $0x8] sm:$0xff]  ;;  %p3843_p12 = pnand %p3842_p7, %p5638_p4  ;;  %p3848_p13 = scmp.lt.s32.totalorder %s5472_s28, %s3846_s25 }
  0xd1   : > { %3379 = vmatpush3.bf16.msra.mxu0 %v3378_v23  ;;  %v4460_v13 = vld [vmem:[#allocation14 + $0x28] sm:$0xff] }
  0xd2   : > { %3380 = vmatprep.subr.bf16.mxu0 %v3929_v0  ;;  %p3844_p1 = pneg %p3843_p12 }
  0xd3   : > { %3391 = vmatpush3.bf16.msra.mxu1 %v3390_v26 }
  0xd4   : > { %3392 = vmatprep.subr.bf16.mxu1 %v3929_v0 }
  0xd5   : > { %3382 = vmatpush3.bf16.msra.mxu0 %v3381_v29 }
  0xd6   : > { %3383 = vmatprep.subr.bf16.mxu0 %v3929_v0 }
  0xd7   : > { %3394 = vmatpush3.bf16.msra.mxu1 %v3393_v32  ;;  %v1573_v32 = vsub.s32 4, %v4344_v40 }
  0xd8   : > { %3395 = vmatprep.subr.bf16.mxu1 %v3929_v0 }
  0xd9   : > { %3385 = vmatpush3.bf16.msra.mxu0 %v3384_v35 }
  0xda   : > { %3398 = vmatprep.subr.bf16.mxu0 %v3929_v0 }
  0xdb   : > { %3397 = vmatpush3.bf16.msra.mxu1 %v3396_v38 }
  0xdc   : > { %3410 = vmatprep.subr.bf16.mxu1 %v3929_v0 }
 0x19f   : > { %v628_v41 = vpop.f32.mrb[0].mxu0 }
 0x1a0   : > { %v715_v43 = vrot.slane %v628_v41, 5  ;;  %v725_v44 = vrot.slane %v628_v41, 6  ;;  %v735_v46 = vrot.slane %v628_v41, 7  ;;  %v3263_v47 = vpop.f32.mrb[1].mxu0  ;;  %v750_v60 = vmul.f32 %v3190_v56, %v628_v41 }
 0x1a1   : > { %v4349_v48 = vpop.f32.mrb[0].mxu1 }
 0x1a2   : > { %v717_v49 = vsel %vm716_vm2, 0.0, %v715_v43  ;;  %v727_v50 = vsel %vm726_vm3, 0.0, %v725_v44  ;;  %v737_v51 = vsel %vm736_vm4, 0.0, %v735_v46  ;;  %v3274_v53 = vpop.f32.mrb[1].mxu1 }
 0x1a3   : > { %v723_v54 = vmul.f32 %v3187_v42, %v717_v49  ;;  %v733_v55 = vmul.f32 %v3188_v45, %v727_v50  ;;  %v743_v58 = vmul.f32 %v3189_v52, %v737_v51 }
 0x1a5   : > { %v734_v57 = vadd.f32 %v733_v55, %v723_v54  ;;  %v3932_v54 = vmov 1966171168  }
 0x1a6   : > { %v1038_v55 = vunpack.c.l.s4 %v3932_v54 }
 0x1a7   : > { %v744_v59 = vadd.f32 %v743_v58, %v734_v57 }
 0x1a8   : > { %v1039_v58 = vunpack.c.0.s8 %v1038_v55 }
 0x1a9   : > { %v751_v62 = vadd.f32 %v750_v60, %v744_v59 }
 0x1ab   : > { %v759_v63 = vadd.f32 %v3191_v61, %v751_v62  ;;  %v4434_v62 = vsub.s32 %v1039_v58, %v4344_v40 }
 0x1ad   : > { %v3192_v2 = vmul.f32 -1.442695, %v759_v63 }
 0x1af   : > { %3531 = vpow2.f32 %v3192_v2 }
 0x1b9   : > { %v3532_v3 = vpop.eup %3531 }
 0x1ba   : > { %v763_v4 = vadd.f32 1.0, %v3532_v3 }
 0x1bc   : > { %3533 = vrcp.f32 %v763_v4 }
 0x1c6   : > { %v3534_v7 = vpop.eup %3533 }
 0x1c7   : > { %v4354_v9 = vmul.f32 %v3534_v7, %v759_v63  ;;  %v4448_v7 = vld [vmem:[#allocation14 + $0x10] sm:$0xff] }
 0x1c9   : > { %3292 = vmatmul.mubr.msk.f32.vlgmr.msra.gmra.mrb[2].mxu0 %vm782_vm5, %v4354_v9  ;;  %3311 = vmatmul.mubr.msk.f32.vlgmr.msra.gmra.mrb[2].mxu1 %vm782_vm5, %v4354_v9 }
 0x1ca   : > { %3400 = vmatpush3.bf16.msra.mxu0 %v3399_v8  ;;  %3329 = vmatprep.mubr.msk.f32.mxu0 %vm3930_vm0, %v3931_v1  ;;  %v4450_v8 = vld [vmem:[#allocation14 + $0x18] sm:$0xff] }
 0x1cb   : > { %3401 = vmatprep.subr.bf16.mxu0 %v3929_v0  ;;  %3348 = vmatprep.mubr.msk.f32.mxu1 %vm3930_vm0, %v3931_v1 }
 0x1ce   : > { %3403 = vmatpush3.bf16.msra.mxu0 %v3402_v12  ;;  %v4458_v12 = vld [vmem:[#allocation14 + $0x20] sm:$0xff] }
 0x1cf   : > { %3404 = vmatprep.subr.bf16.mxu0 %v3929_v0 }
 0x1d2   : > { %3406 = vmatpush3.bf16.msra.mxu0 %v3405_v15  ;;  %v4464_v15 = vld [vmem:[#allocation14 + $0x30] sm:$0xff] }
 0x1d3   : > { %3407 = vmatprep.subr.bf16.mxu0 %v3929_v0 }
 0x1d6   : > { %3409 = vmatpush3.bf16.msra.mxu0 %v3408_v18 }
 0x1d7   : > { %3422 = vmatprep.subr.bf16.mxu0 %v3929_v0 }
 0x1d9   : > { %3330 = vmatmul.mubr.msk.f32.vlgmr.msra.gmra.mrb[4].mxu0 %vm782_vm5, %v4354_v9 }
 0x1da   : > { %3359 = vmatprep.mubr.msk.f32.mxu0 %vm3930_vm0, %v3931_v1 }
 0x29c   : > { %v852_v21 = vpop.f32.mrb[2].mxu0  ;;  %v4378_v22 = vpop.f32.mrb[2].mxu1 }
 0x29d   : > { %v853_v23 = vadd.f32 %v3193_v19, %v852_v21  ;;  %v1434_v24 = vrot.slane %v4378_v22, %v4376_v20  ;;  %v3293_v25 = vpop.f32.mrb[3].mxu0  ;;  %v3312_v26 = vpop.f32.mrb[3].mxu1  ;;  %v1469_v29 = vrot.slane %v4378_v22, %v1468_v28  ;;  %v4420_v49 = vrot.slane %v4378_v22, %v1503_v30  ;;  %v4470_v19 = vld [vmem:[#allocation14 + $0x38] sm:$0xff] }
 0x29e   : > { %v4427_v60 = vrot.slane %v4378_v22, %v1538_v31  ;;  %v4456_v11 = vrot.slane %v4378_v22, %v1573_v32 }
 0x29f   : > { %v857_v27 = vmin.f32 %v853_v23, 20.0  ;;  %1444 = vbcast.lane.b32.xlu1 %v1434_v24, 272  ;;  %1436 = vbcast.lane.b32.xlu0 %v1434_v24, 256  ;;  %vm856_vm7 = vcmp.gt.f32.partialorder %v853_v23, 20.0 }
 0x2a1   : > { %v858_v1 = vmul.f32 1.442695, %v857_v27 }
 0x2a3   : > { %3535 = vpow2.f32 %v858_v1  ;;  %1448 = vbcast.lane.b32.xlu1 %v1434_v24, 280  ;;  %1440 = vbcast.lane.b32.xlu0 %v1434_v24, 264 }
 0x2a7   : > { %1475 = vbcast.lane.b32.xlu1 %v1469_v29, 264  ;;  %1471 = vbcast.lane.b32.xlu0 %v1469_v29, 256 }
 0x2ab   : > { %1479 = vbcast.lane.b32.xlu1 %v1469_v29, 272  ;;  %1452 = vbcast.lane.b32.xlu0 %v1434_v24, 288 }
 0x2ac   : > { %v4389_v35 = vpop.f32.mrb[4].mxu0 }
 0x2ad   : > { %v3536_v36 = vpop.eup %3535  ;;  %v4393_v38 = vrot.slane %v4389_v35, %v1468_v28  ;;  %v4396_v39 = vrot.slane %v4389_v35, %v1503_v30  ;;  %v4399_v41 = vrot.slane %v4389_v35, %v1538_v31  ;;  %v3331_v42 = vpop.f32.mrb[5].mxu0  ;;  %v4402_v44 = vrot.slane %v4389_v35, %v1573_v32 }
 0x2ae   : > { %v860_v43 = vadd.f32 1.0, %v3536_v36  ;;  %v4407_v45 = vrot.slane %v4389_v35, %v1608_v33  ;;  %v4412_v46 = vrot.slane %v4389_v35, %v1643_v34  ;;  %v4417_v47 = vrot.slane %v4389_v35, %v1678_v37 }
 0x2af   : > { %1483 = vbcast.lane.b32.xlu1 %v1469_v29, 280  ;;  %1456 = vbcast.lane.b32.xlu0 %v1434_v24, 296  ;;  %v863_v50 = vmul.f32 -0.5, %v3536_v36  ;;  %v866_v53 = vand.u32 2147483647, %v3536_v36 }
 0x2b0   : > { %3537 = vlog2.f32 %v860_v43 }
 0x2b1   : > { %v864_v52 = vadd.f32 1.0, %v863_v50  ;;  %vm867_vm6 = vcmp.lt.f32.partialorder %v866_v53, 0.0004427343 }
 0x2b3   : > { %1510 = vbcast.lane.b32.xlu1 %v4420_v49, 264  ;;  %1506 = vbcast.lane.b32.xlu0 %v4420_v49, 256  ;;  %v865_v57 = vmul.f32 %v3536_v36, %v864_v52 }
 0x2b7   : > { %1487 = vbcast.lane.b32.xlu1 %v1469_v29, 288  ;;  %1460 = vbcast.lane.b32.xlu0 %v1434_v24, 304 }
 0x2ba   : > { %v3538_v51 = vpop.eup %3537 }
 0x2bb   : > { %1464 = vbcast.lane.b32.xlu1 %v1434_v24, 312  ;;  %1514 = vbcast.lane.b32.xlu0 %v4420_v49, 272  ;;  %v862_v56 = vmul.f32 0.6931472, %v3538_v51 }
 0x2bd   : > { %v868_v59 = vsel %vm867_vm6, %v865_v57, %v862_v56 }
 0x2be   : > { %v4430_v61 = vsel %vm856_vm7, %v853_v23, %v868_v59 }
 0x2bf   : > { %1518 = vbcast.lane.b32.xlu1 %v4420_v49, 280  ;;  %1491 = vbcast.lane.b32.xlu0 %v1469_v29, 296  ;;  %v1043_v63 = vrot.slane %v4430_v61, %v4434_v62 }
 0x2c1   : > { %v1059_v2 = vrot.slane %v1043_v63, %v4434_v62  ;;  %v1051_v3 = vcombine.high %v1043_v63, %v1043_v63  ;;  %v1036_v63 = vcombine.high %v4430_v61, %v4430_v61 }
 0x2c3   : > { %1545 = vbcast.lane.b32.xlu1 %v4427_v60, 264  ;;  %1541 = vbcast.lane.b32.xlu0 %v4427_v60, 256  ;;  %v1088_v4 = vrot.slane %v1059_v2, %v4376_v20  ;;  %v4453_v10 = vrot.slane %v1051_v3, %v4434_v62  ;;  %v1081_v30 = vcombine.high %v1059_v2, %v1059_v2 }
 0x2c5   : > { %v1125_v14 = vmul.f32 %v1088_v4, %v4443_v5  ;;  %v1126_v16 = vmul.f32 %v1088_v4, %v4446_v6  ;;  %v1127_v17 = vmul.f32 %v1088_v4, %v4448_v7  ;;  %v1128_v18 = vmul.f32 %v1088_v4, %v4450_v8 }
 0x2c6   : > { %v1092_v21 = vrot.slane %v4453_v10, %v4376_v20  ;;  %v1129_v23 = vmul.f32 %v1088_v4, %v4458_v12  ;;  %v1130_v24 = vmul.f32 %v1088_v4, %v4460_v13  ;;  %v1131_v25 = vmul.f32 %v1088_v4, %v4464_v15 }
 0x2c7   : > { %1522 = vbcast.lane.b32.xlu1 %v4420_v49, 288  ;;  %1495 = vbcast.lane.b32.xlu0 %v1469_v29, 304  ;;  %v1189_v26 = vmul.f32 1.442695, %v1125_v14  ;;  %v1132_v27 = vmul.f32 %v1088_v4, %v4470_v19  ;;  %v1191_v1 = vmul.f32 1.442695, %v1126_v16  ;;  %v1096_v53 = vrot.slane %v1081_v30, %v4376_v20 }
 0x2c8   : > { %v1193_v28 = vmul.f32 1.442695, %v1127_v17  ;;  %v1133_v31 = vmul.f32 %v1092_v21, %v4443_v5  ;;  %v1197_v32 = vmul.f32 1.442695, %v1129_v23  ;;  %v1134_v36 = vmul.f32 %v1092_v21, %v4446_v6 }
 0x2c9   : > { %3539 = vpow2.f32 %v1189_v26  ;;  %v1199_v42 = vmul.f32 1.442695, %v1130_v24  ;;  %v1135_v43 = vmul.f32 %v1092_v21, %v4448_v7  ;;  %v1201_v50 = vmul.f32 1.442695, %v1131_v25 }
 0x2ca   : > { %3541 = vpow2.f32 %v1191_v1  ;;  %v1136_v51 = vmul.f32 %v1092_v21, %v4450_v8  ;;  %v1203_v52 = vmul.f32 1.442695, %v1132_v27  ;;  %v1137_v54 = vmul.f32 %v1092_v21, %v4458_v12 }
 0x2cb   : > { %1499 = vbcast.lane.b32.xlu1 %v1469_v29, 312  ;;  %1549 = vbcast.lane.b32.xlu0 %v4427_v60, 272  ;;  %v1195_v29 = vmul.f32 1.442695, %v1128_v18  ;;  %3543 = vpow2.f32 %v1193_v28  ;;  %v1205_v55 = vmul.f32 1.442695, %v1133_v31  ;;  %v1138_v56 = vmul.f32 %v1092_v21, %v4460_v13 }
 0x2cc   : > { %v1207_v57 = vmul.f32 1.442695, %v1134_v36  ;;  %v1139_v58 = vmul.f32 %v1092_v21, %v4464_v15  ;;  %v1209_v59 = vmul.f32 1.442695, %v1135_v43  ;;  %v1140_v2 = vmul.f32 %v1092_v21, %v4470_v19 }
 0x2cd   : > { %3545 = vpow2.f32 %v1195_v29  ;;  %v1211_v3 = vmul.f32 1.442695, %v1136_v51  ;;  %v1083_v4 = vcombine.high %v4453_v10, %v4453_v10  ;;  %v1141_v14 = vmul.f32 %v1096_v53, %v4443_v5 }
 0x2ce   : > { %3547 = vpow2.f32 %v1197_v32  ;;  %v1213_v16 = vmul.f32 1.442695, %v1137_v54  ;;  %v1142_v17 = vmul.f32 %v1096_v53, %v4446_v6  ;;  %v1215_v18 = vmul.f32 1.442695, %v1138_v56 }
 0x2cf   : > { %1553 = vbcast.lane.b32.xlu1 %v4427_v60, 280  ;;  %1526 = vbcast.lane.b32.xlu0 %v4420_v49, 296  ;;  %3549 = vpow2.f32 %v1199_v42  ;;  %v1143_v24 = vmul.f32 %v1096_v53, %v4448_v7  ;;  %v1217_v25 = vmul.f32 1.442695, %v1139_v58  ;;  %v4496_v21 = vrot.slane %v1036_v63, %v4434_v62 }
 0x2d0   : > { %3551 = vpow2.f32 %v1201_v50  ;;  %v1144_v27 = vmul.f32 %v1096_v53, %v4450_v8  ;;  %v1219_v10 = vmul.f32 1.442695, %v1140_v2  ;;  %v1100_v28 = vrot.slane %v1083_v4, %v4376_v20 }
 0x2d1   : > { %3553 = vpow2.f32 %v1203_v52  ;;  %v1145_v29 = vmul.f32 %v1096_v53, %v4458_v12  ;;  %v1221_v30 = vmul.f32 1.442695, %v1141_v14  ;;  %v1146_v32 = vmul.f32 %v1096_v53, %v4460_v13 }
 0x2d2   : > { %3555 = vpow2.f32 %v1205_v55  ;;  %v1223_v36 = vmul.f32 1.442695, %v1142_v17  ;;  %v1147_v43 = vmul.f32 %v1096_v53, %v4464_v15  ;;  %v1225_v50 = vmul.f32 1.442695, %v1143_v24 }
 0x2d3   : > { %1580 = vbcast.lane.b32.xlu1 %v4456_v11, 264  ;;  %1576 = vbcast.lane.b32.xlu0 %v4456_v11, 256  ;;  %3557 = vpow2.f32 %v1207_v57  ;;  %v3540_v23 = vpop.eup %3539  ;;  %v1148_v52 = vmul.f32 %v1096_v53, %v4470_v19  ;;  %v1227_v54 = vmul.f32 1.442695, %v1144_v27  ;;  %v4511_v56 = vrot.slane %v4496_v21, %v4434_v62 }
 0x2d4   : > { %3559 = vpow2.f32 %v1209_v59  ;;  %v3542_v26 = vpop.eup %3541  ;;  %1317 = vst.msk [vmem:[#allocation2] sm:$0xff] %vm782_vm5, %v3540_v23  ;;  %v1149_v57 = vmul.f32 %v1100_v28, %v4443_v5  ;;  %v1229_v58 = vmul.f32 1.442695, %v1145_v29  ;;  %v1150_v63 = vmul.f32 %v1100_v28, %v4446_v6 }
 0x2d5   : > { %3561 = vpow2.f32 %v1211_v3  ;;  %v3544_v1 = vpop.eup %3543  ;;  %1318 = vst.msk [vmem:[#allocation2 + $0x8] sm:$0xff] %vm782_vm5, %v3542_v26  ;;  %v1231_v53 = vmul.f32 1.442695, %v1146_v32  ;;  %v1151_v3 = vmul.f32 %v1100_v28, %v4448_v7  ;;  %v1233_v4 = vmul.f32 1.442695, %v1147_v43 }
 0x2d6   : > { %3563 = vpow2.f32 %v1213_v16  ;;  %1319 = vst.msk [vmem:[#allocation2 + $0x10] sm:$0xff] %vm782_vm5, %v3544_v1  ;;  %v1052_v16 = vcombine.high %v4496_v21, %v4496_v21  ;;  %v1152_v17 = vmul.f32 %v1100_v28, %v4450_v8  ;;  %v4525_v24 = vrot.slane %v4511_v56, %v4376_v20 }
 0x2d7   : > { %1557 = vbcast.lane.b32.xlu1 %v4427_v60, 288  ;;  %v3546_v31 = vpop.eup %3545  ;;  %3565 = vpow2.f32 %v1215_v18  ;;  %v1235_v18 = vmul.f32 1.442695, %v1148_v52  ;;  %v1237_v26 = vmul.f32 1.442695, %v1149_v57  ;;  %1530 = vbcast.lane.b32.xlu0 %v4420_v49, 304  ;;  %v1154_v27 = vmul.f32 %v1100_v28, %v4460_v13 }
 0x2d8   : > { %v3548_v42 = vpop.eup %3547  ;;  %3567 = vpow2.f32 %v1217_v25  ;;  %1320 = vst.msk [vmem:[#allocation2 + $0x18] sm:$0xff] %vm782_vm5, %v3546_v31  ;;  %v1153_v25 = vmul.f32 %v1100_v28, %v4458_v12  ;;  %v1155_v29 = vmul.f32 %v1100_v28, %v4464_v15  ;;  %v1156_v32 = vmul.f32 %v1100_v28, %v4470_v19 }
 0x2d9   : > { %v3550_v51 = vpop.eup %3549  ;;  %3569 = vpow2.f32 %v1219_v10  ;;  %1321 = vst.msk [vmem:[#allocation2 + $0x20] sm:$0xff] %vm782_vm5, %v3548_v42  ;;  %v1239_v10 = vmul.f32 1.442695, %v1150_v63  ;;  %v4538_v42 = vrot.slane %v1052_v16, %v4434_v62  ;;  %v1157_v43 = vmul.f32 %v4525_v24, %v4443_v5 }
 0x2da   : > { %v3552_v55 = vpop.eup %3551  ;;  %3571 = vpow2.f32 %v1221_v30  ;;  %1322 = vst.msk [vmem:[#allocation2 + $0x28] sm:$0xff] %vm782_vm5, %v3550_v51  ;;  %v1241_v30 = vmul.f32 1.442695, %v1151_v3  ;;  %v1158_v51 = vmul.f32 %v4525_v24, %v4446_v6  ;;  %v1247_v52 = vmul.f32 1.442695, %v1154_v27 }
 0x2db   : > { %v3554_v59 = vpop.eup %3553  ;;  %3573 = vpow2.f32 %v1223_v36  ;;  %1323 = vst.msk [vmem:[#allocation2 + $0x30] sm:$0xff] %vm782_vm5, %v3552_v55  ;;  %1534 = vbcast.lane.b32.xlu1 %v4420_v49, 312  ;;  %v1243_v36 = vmul.f32 1.442695, %v1152_v17  ;;  %1584 = vbcast.lane.b32.xlu0 %v4456_v11, 272  ;;  %v1159_v55 = vmul.f32 %v4525_v24, %v4448_v7  ;;  %v1160_v63 = vmul.f32 %v4525_v24, %v4450_v8 }
 0x2dc   : > { %v3556_v2 = vpop.eup %3555  ;;  %3575 = vpow2.f32 %v1225_v50  ;;  %1324 = vst.msk [vmem:[#allocation2 + $0x38] sm:$0xff] %vm782_vm5, %v3554_v59  ;;  %v1245_v50 = vmul.f32 1.442695, %v1153_v25  ;;  %v1249_v57 = vmul.f32 1.442695, %v1155_v29  ;;  %v4561_v3 = vrot.slane %v4538_v42, %v4376_v20 }
 0x2dd   : > { %v3558_v14 = vpop.eup %3557  ;;  %3577 = vpow2.f32 %v1227_v54  ;;  %1325 = vst.msk [vmem:[#allocation2 + $0x40] sm:$0xff] %vm782_vm5, %v3556_v2  ;;  %v1162_v16 = vmul.f32 %v4525_v24, %v4460_v13  ;;  %v1255_v17 = vmul.f32 1.442695, %v1158_v51  ;;  %v1257_v25 = vmul.f32 1.442695, %v1159_v55 }
 0x2de   : > { %v3560_v23 = vpop.eup %3559  ;;  %3579 = vpow2.f32 %v1229_v58  ;;  %1326 = vst.msk [vmem:[#allocation2 + $0x48] sm:$0xff] %vm782_vm5, %v3558_v14  ;;  %v4554_v58 = vrot.slane %v4378_v22, %v1608_v33  ;;  %v1253_v14 = vmul.f32 1.442695, %v1157_v43  ;;  %v1259_v27 = vmul.f32 1.442695, %v1160_v63 }
 0x2df   : > { %v3562_v21 = vpop.eup %3561  ;;  %3581 = vpow2.f32 %v1231_v53  ;;  %1327 = vst.msk [vmem:[#allocation2 + $0x50] sm:$0xff] %vm782_vm5, %v3560_v23  ;;  %1588 = vbcast.lane.b32.xlu1 %v4456_v11, 280  ;;  %v1251_v53 = vmul.f32 1.442695, %v1156_v32  ;;  %1561 = vbcast.lane.b32.xlu0 %v4427_v60, 296  ;;  %v1163_v23 = vmul.f32 %v4525_v24, %v4464_v15  ;;  %v1165_v29 = vmul.f32 %v4561_v3, %v4443_v5 }
 0x2e0   : > { %v3564_v1 = vpop.eup %3563  ;;  %3583 = vpow2.f32 %v1233_v4  ;;  %1328 = vst.msk [vmem:[#allocation2 + $0x58] sm:$0xff] %vm782_vm5, %v3562_v21  ;;  %v1161_v4 = vmul.f32 %v4525_v24, %v4458_v12  ;;  %v1164_v21 = vmul.f32 %v4525_v24, %v4470_v19  ;;  %v1263_v32 = vmul.f32 1.442695, %v1162_v16 }
 0x2e1   : > { %v3566_v31 = vpop.eup %3565  ;;  %3585 = vpow2.f32 %v1235_v18  ;;  %1329 = vst.msk [vmem:[#allocation2 + $0x60] sm:$0xff] %vm782_vm5, %v3564_v1  ;;  %v1082_v1 = vcombine.high %v4511_v56, %v4511_v56  ;;  %v1269_v55 = vmul.f32 1.442695, %v1165_v29  ;;  %v1172_v16 = vmul.f32 %v4561_v3, %v4470_v19 }
 0x2e2   : > { %v3568_v49 = vpop.eup %3567  ;;  %3587 = vpow2.f32 %v1237_v26  ;;  %1330 = vst.msk [vmem:[#allocation2 + $0x68] sm:$0xff] %vm782_vm5, %v3566_v31  ;;  %v1166_v31 = vmul.f32 %v4561_v3, %v4446_v6  ;;  %v4630_v29 = vmul.f32 %v4430_v61, %v4354_v9 }
 0x2e3   : > { %v3570_v28 = vpop.eup %3569  ;;  %3589 = vpow2.f32 %v1239_v10  ;;  %1331 = vst.msk [vmem:[#allocation2 + $0x70] sm:$0xff] %vm782_vm5, %v3568_v49  ;;  %1615 = vbcast.lane.b32.xlu1 %v4554_v58, 264  ;;  %1611 = vbcast.lane.b32.xlu0 %v4554_v58, 256  ;;  %v1265_v49 = vmul.f32 1.442695, %v1163_v23  ;;  %v1084_v23 = vcombine.high %v4538_v42, %v4538_v42 }
 0x2e4   : > { %v3572_v54 = vpop.eup %3571  ;;  %3591 = vpow2.f32 %v1241_v30  ;;  %1332 = vst.msk [vmem:[#allocation2 + $0x78] sm:$0xff] %vm782_vm5, %v3570_v28  ;;  %v1261_v30 = vmul.f32 1.442695, %v1161_v4  ;;  %v1267_v28 = vmul.f32 1.442695, %v1164_v21 }
 0x2e5   : > { %v3574_v59 = vpop.eup %3573  ;;  %3593 = vpow2.f32 %v1243_v36  ;;  %1333 = vst.msk [vmem:[#allocation2 + $0x80] sm:$0xff] %vm782_vm5, %v3572_v54  ;;  %v1167_v36 = vmul.f32 %v4561_v3, %v4448_v7  ;;  %v1169_v54 = vmul.f32 %v4561_v3, %v4458_v12  ;;  %v1271_v63 = vmul.f32 1.442695, %v1166_v31 }
 0x2e6   : > { %v3576_v2 = vpop.eup %3575  ;;  %3595 = vpow2.f32 %v1245_v50  ;;  %1334 = vst.msk [vmem:[#allocation2 + $0x88] sm:$0xff] %vm782_vm5, %v3574_v59  ;;  %v1168_v50 = vmul.f32 %v4561_v3, %v4450_v8  ;;  %v1170_v59 = vmul.f32 %v4561_v3, %v4460_v13 }
 0x2e7   : > { %v3578_v33 = vpop.eup %3577  ;;  %3597 = vpow2.f32 %v1247_v52  ;;  %1335 = vst.msk [vmem:[#allocation2 + $0x90] sm:$0xff] %vm782_vm5, %v3576_v2  ;;  %1592 = vbcast.lane.b32.xlu1 %v4456_v11, 288  ;;  %v4594_v52 = vrot.slane %v1082_v1, %v4376_v20  ;;  %1565 = vbcast.lane.b32.xlu0 %v4427_v60, 304  ;;  %v1171_v2 = vmul.f32 %v4561_v3, %v4464_v15  ;;  %v1273_v4 = vmul.f32 1.442695, %v1167_v36 }
 0x2e8   : > { %v3580_v18 = vpop.eup %3579  ;;  %3599 = vpow2.f32 %v1249_v57  ;;  %1336 = vst.msk [vmem:[#allocation2 + $0x98] sm:$0xff] %vm782_vm5, %v3578_v33  ;;  %v1279_v21 = vmul.f32 1.442695, %v1170_v59 }
 0x2e9   : > { %v3582_v26 = vpop.eup %3581  ;;  %3601 = vpow2.f32 %v1251_v53  ;;  %1337 = vst.msk [vmem:[#allocation2 + $0xa0] sm:$0xff] %vm782_vm5, %v3580_v18  ;;  %v1174_v3 = vmul.f32 %v4594_v52, %v4446_v6 }
 0x2ea   : > { %v3584_v10 = vpop.eup %3583  ;;  %3603 = vpow2.f32 %v1253_v14  ;;  %1338 = vst.msk [vmem:[#allocation2 + $0xa8] sm:$0xff] %vm782_vm5, %v3582_v26  ;;  %v4610_v14 = vrot.slane %v4378_v22, %v1643_v34  ;;  %v1277_v26 = vmul.f32 1.442695, %v1169_v54 }
 0x2eb   : > { %v3586_v24 = vpop.eup %3585  ;;  %3605 = vpow2.f32 %v1255_v17  ;;  %1339 = vst.msk [vmem:[#allocation2 + $0xb0] sm:$0xff] %vm782_vm5, %v3584_v10  ;;  %1596 = vbcast.lane.b32.xlu1 %v4456_v11, 296  ;;  %v1275_v17 = vmul.f32 1.442695, %v1168_v50  ;;  %1619 = vbcast.lane.b32.xlu0 %v4554_v58, 272 }
 0x2ec   : > { %v3588_v56 = vpop.eup %3587  ;;  %3607 = vpow2.f32 %v1257_v25  ;;  %1340 = vst.msk [vmem:[#allocation2 + $0xb8] sm:$0xff] %vm782_vm5, %v3586_v24  ;;  %v1173_v25 = vmul.f32 %v4594_v52, %v4443_v5  ;;  %v1281_v10 = vmul.f32 1.442695, %v1171_v2  ;;  %v1283_v24 = vmul.f32 1.442695, %v1172_v16 }
 0x2ed   : > { %v3590_v43 = vpop.eup %3589  ;;  %3609 = vpow2.f32 %v1259_v27  ;;  %1341 = vst.msk [vmem:[#allocation2 + $0xc0] sm:$0xff] %vm782_vm5, %v3588_v56  ;;  %v1175_v27 = vmul.f32 %v4594_v52, %v4448_v7  ;;  %v1177_v56 = vmul.f32 %v4594_v52, %v4458_v12 }
 0x2ee   : > { %v3592_v51 = vpop.eup %3591  ;;  %3611 = vpow2.f32 %v1261_v30  ;;  %1342 = vst.msk [vmem:[#allocation2 + $0xc8] sm:$0xff] %vm782_vm5, %v3590_v43  ;;  %v1176_v30 = vmul.f32 %v4594_v52, %v4450_v8  ;;  %v1285_v36 = vmul.f32 1.442695, %v1173_v25  ;;  %v1287_v43 = vmul.f32 1.442695, %v1174_v3 }
 0x2ef   : > { %v3594_v57 = vpop.eup %3593  ;;  %3613 = vpow2.f32 %v1263_v32  ;;  %1343 = vst.msk [vmem:[#allocation2 + $0xd0] sm:$0xff] %vm782_vm5, %v3592_v51  ;;  %1646 = vbcast.lane.b32.xlu1 %v4610_v14, 256  ;;  %v4636_v32 = vrot.slane %v1084_v23, %v4376_v20  ;;  %1569 = vbcast.lane.b32.xlu0 %v4427_v60, 312  ;;  %v1289_v51 = vmul.f32 1.442695, %v1175_v27  ;;  %v1180_v60 = vmul.f32 %v4594_v52, %v4470_v19 }
 0x2f0   : > { %v3596_v53 = vpop.eup %3595  ;;  %3615 = vpow2.f32 %v1265_v49  ;;  %1344 = vst.msk [vmem:[#allocation2 + $0xd8] sm:$0xff] %vm782_vm5, %v3594_v57  ;;  %v1178_v49 = vmul.f32 %v4594_v52, %v4460_v13  ;;  %v4654_v57 = vrot.slane %v4630_v29, %v4434_v62 }
 0x2f1   : > { %v3598_v33 = vpop.eup %3597  ;;  %3617 = vpow2.f32 %v1267_v28  ;;  %1345 = vst.msk [vmem:[#allocation2 + $0xe0] sm:$0xff] %vm782_vm5, %v3596_v53  ;;  %v1179_v28 = vmul.f32 %v4594_v52, %v4464_v15  ;;  %v1293_v53 = vmul.f32 1.442695, %v1177_v56  ;;  %v1182_v2 = vmul.f32 %v4636_v32, %v4446_v6 }
 0x2f2   : > { %v3600_v18 = vpop.eup %3599  ;;  %3619 = vpow2.f32 %v1269_v55  ;;  %1346 = vst.msk [vmem:[#allocation2 + $0xe8] sm:$0xff] %vm782_vm5, %v3598_v33  ;;  %v1291_v55 = vmul.f32 1.442695, %v1176_v30  ;;  %v1299_v23 = vmul.f32 1.442695, %v1180_v60  ;;  %v4671_v6 = vrot.slane %v4654_v57, %v4434_v62 }
 0x2f3   : > { %v3602_v34 = vpop.eup %3601  ;;  %3621 = vpow2.f32 %v1271_v63  ;;  %1347 = vst.msk [vmem:[#allocation2 + $0xf0] sm:$0xff] %vm782_vm5, %v3600_v18  ;;  %1600 = vbcast.lane.b32.xlu1 %v4456_v11, 304  ;;  %v1181_v63 = vmul.f32 %v4636_v32, %v4443_v5  ;;  %1623 = vbcast.lane.b32.xlu0 %v4554_v58, 280  ;;  %v1183_v5 = vmul.f32 %v4636_v32, %v4448_v7  ;;  %v1297_v16 = vmul.f32 1.442695, %v1179_v28 }
 0x2f4   : > { %v3604_v42 = vpop.eup %3603  ;;  %3623 = vpow2.f32 %v1273_v4  ;;  %1348 = vst.msk [vmem:[#allocation2 + $0xf8] sm:$0xff] %vm782_vm5, %v3602_v34  ;;  %v1295_v4 = vmul.f32 1.442695, %v1178_v49  ;;  %v1184_v18 = vmul.f32 %v4636_v32, %v4450_v8  ;;  %v1185_v7 = vmul.f32 %v4636_v32, %v4458_v12 }
 0x2f5   : > { %v3606_v1 = vpop.eup %3605  ;;  %3625 = vpow2.f32 %v1275_v17  ;;  %1349 = vst.msk [vmem:[#allocation2 + $0x100] sm:$0xff] %vm782_vm5, %v3604_v42  ;;  %v1186_v34 = vmul.f32 %v4636_v32, %v4460_v13  ;;  %v1303_v3 = vmul.f32 1.442695, %v1182_v2  ;;  %v1187_v12 = vmul.f32 %v4636_v32, %v4464_v15 }
 0x2f6   : > { %v3608_v31 = vpop.eup %3607  ;;  %3627 = vpow2.f32 %v1277_v26  ;;  %1350 = vst.msk [vmem:[#allocation2 + $0x108] sm:$0xff] %vm782_vm5, %v3606_v1  ;;  %v1301_v26 = vmul.f32 1.442695, %v1181_v63  ;;  %v1305_v42 = vmul.f32 1.442695, %v1183_v5  ;;  %v1397_v27 = vcombine.high %v4654_v57, %v4654_v57 }
 0x2f7   : > { %v3610_v61 = vpop.eup %3609  ;;  %3629 = vpow2.f32 %v1279_v21  ;;  %1351 = vst.msk [vmem:[#allocation2 + $0x110] sm:$0xff] %vm782_vm5, %v3608_v31  ;;  %1654 = vbcast.lane.b32.xlu1 %v4610_v14, 272  ;;  %1650 = vbcast.lane.b32.xlu0 %v4610_v14, 264  ;;  %v1307_v13 = vmul.f32 1.442695, %v1184_v18  ;;  %v4691_v1 = vrot.slane %v4671_v6, %v4376_v20 }
 0x2f8   : > { %v3612_v50 = vpop.eup %3611  ;;  %3631 = vpow2.f32 %v1281_v10  ;;  %1352 = vst.msk [vmem:[#allocation2 + $0x118] sm:$0xff] %vm782_vm5, %v3610_v61  ;;  %v1188_v10 = vmul.f32 %v4636_v32, %v4470_v19  ;;  %v1309_v30 = vmul.f32 1.442695, %v1185_v7  ;;  %v1311_v32 = vmul.f32 1.442695, %v1186_v34 }
 0x2f9   : > { %v3614_v54 = vpop.eup %3613  ;;  %3633 = vpow2.f32 %v1283_v24  ;;  %1353 = vst.msk [vmem:[#allocation2 + $0x120] sm:$0xff] %vm782_vm5, %v3612_v50  ;;  %v1313_v49 = vmul.f32 1.442695, %v1187_v12 }
 0x2fa   : > { %v3616_v59 = vpop.eup %3615  ;;  %3635 = vpow2.f32 %v1285_v36  ;;  %1354 = vst.msk [vmem:[#allocation2 + $0x128] sm:$0xff] %vm782_vm5, %v3614_v54  ;;  %v1315_v28 = vmul.f32 1.442695, %v1188_v10 }
 0x2fb   : > { %v3618_v52 = vpop.eup %3617  ;;  %3637 = vpow2.f32 %v1287_v43  ;;  %1355 = vst.msk [vmem:[#allocation2 + $0x130] sm:$0xff] %vm782_vm5, %v3616_v59  ;;  %1604 = vbcast.lane.b32.xlu1 %v4456_v11, 312  ;;  %1627 = vbcast.lane.b32.xlu0 %v4554_v58, 288  ;;  %v4704_v43 = vrot.slane %v4378_v22, %v1678_v37 }
 0x2fc   : > { %v3620_v33 = vpop.eup %3619  ;;  %3639 = vpow2.f32 %v1289_v51  ;;  %1356 = vst.msk [vmem:[#allocation2 + $0x138] sm:$0xff] %vm782_vm5, %v3618_v52  ;;  %v4707_v51 = vrot.slane %v1397_v27, %v4434_v62 }
 0x2fd   : > { %v3622_v17 = vpop.eup %3621  ;;  %3641 = vpow2.f32 %v1291_v55  ;;  %1357 = vst.msk [vmem:[#allocation2 + $0x140] sm:$0xff] %vm782_vm5, %v3620_v33 }
 0x2fe   : > { %v3624_v25 = vpop.eup %3623  ;;  %3643 = vpow2.f32 %v1293_v53  ;;  %1358 = vst.msk [vmem:[#allocation2 + $0x148] sm:$0xff] %vm782_vm5, %v3622_v17  ;;  %v4721_v63 = vrot.slane %v4707_v51, %v4376_v20 }
 0x2ff   : > { %v3626_v8 = vpop.eup %3625  ;;  %3645 = vpow2.f32 %v1295_v4  ;;  %1359 = vst.msk [vmem:[#allocation2 + $0x150] sm:$0xff] %vm782_vm5, %v3624_v25  ;;  %1658 = vbcast.lane.b32.xlu1 %v4610_v14, 280  ;;  %1631 = vbcast.lane.b32.xlu0 %v4554_v58, 296 }
 0x300   : > { %v3628_v21 = vpop.eup %3627  ;;  %3647 = vpow2.f32 %v1297_v16  ;;  %1360 = vst.msk [vmem:[#allocation2 + $0x158] sm:$0xff] %vm782_vm5, %v3626_v8 }
 0x301   : > { %v3630_v11 = vpop.eup %3629  ;;  %3649 = vpow2.f32 %v1299_v23  ;;  %1361 = vst.msk [vmem:[#allocation2 + $0x160] sm:$0xff] %vm782_vm5, %v3628_v21  ;;  %v1427_v21 = vcombine.high %v4671_v6, %v4671_v6 }
 0x302   : > { %v3632_v15 = vpop.eup %3631  ;;  %3651 = vpow2.f32 %v1301_v26  ;;  %1362 = vst.msk [vmem:[#allocation2 + $0x168] sm:$0xff] %vm782_vm5, %v3630_v11 }
 0x303   : > { %v3634_v19 = vpop.eup %3633  ;;  %3653 = vpow2.f32 %v1303_v3  ;;  %1363 = vst.msk [vmem:[#allocation2 + $0x170] sm:$0xff] %vm782_vm5, %v3632_v15  ;;  %1685 = vbcast.lane.b32.xlu1 %v4704_v43, 264  ;;  %1681 = vbcast.lane.b32.xlu0 %v4704_v43, 256 }
 0x304   : > { %v3636_v61 = vpop.eup %3635  ;;  %3655 = vpow2.f32 %v1305_v42  ;;  %1364 = vst.msk [vmem:[#allocation2 + $0x178] sm:$0xff] %vm782_vm5, %v3634_v19  ;;  %v4766_v19 = vrot.slane %v4389_v35, %v4376_v20 }
 0x305   : > { %v3638_v50 = vpop.eup %3637  ;;  %3657 = vpow2.f32 %v1307_v13  ;;  %1365 = vst.msk [vmem:[#allocation2 + $0x180] sm:$0xff] %vm782_vm5, %v3636_v61  ;;  %v4756_v13 = vrot.slane %v1427_v21, %v4376_v20 }
 0x306   : > { %v3640_v54 = vpop.eup %3639  ;;  %3659 = vpow2.f32 %v1309_v30  ;;  %1366 = vst.msk [vmem:[#allocation2 + $0x188] sm:$0xff] %vm782_vm5, %v3638_v50 }
 0x307   : > { %v3642_v37 = vpop.eup %3641  ;;  %3661 = vpow2.f32 %v1311_v32  ;;  %1367 = vst.msk [vmem:[#allocation2 + $0x190] sm:$0xff] %vm782_vm5, %v3640_v54  ;;  %1662 = vbcast.lane.b32.xlu1 %v4610_v14, 288  ;;  %1635 = vbcast.lane.b32.xlu0 %v4554_v58, 304 }
 0x308   : > { %v3644_v57 = vpop.eup %3643  ;;  %3663 = vpow2.f32 %v1313_v49  ;;  %1368 = vst.msk [vmem:[#allocation2 + $0x198] sm:$0xff] %vm782_vm5, %v3642_v37 }
 0x309   : > { %v3646_v59 = vpop.eup %3645  ;;  %3665 = vpow2.f32 %v1315_v28  ;;  %1369 = vst.msk [vmem:[#allocation2 + $0x1a0] sm:$0xff] %vm782_vm5, %v3644_v57  ;;  %v1429_v28 = vcombine.high %v4707_v51, %v4707_v51  ;;  %v1382_v57 = vcombine.high %v4630_v29, %v4630_v29 }
 0x30a   : > { %v3648_v53 = vpop.eup %3647  ;;  %1370 = vst.msk [vmem:[#allocation2 + $0x1a8] sm:$0xff] %vm782_vm5, %v3646_v59 }
 0x30b   : > { %v3650_v4 = vpop.eup %3649  ;;  %1371 = vst.msk [vmem:[#allocation2 + $0x1b0] sm:$0xff] %vm782_vm5, %v3648_v53  ;;  %1666 = vbcast.lane.b32.xlu1 %v4610_v14, 296  ;;  %1689 = vbcast.lane.b32.xlu0 %v4704_v43, 272 }
 0x30c   : > { %v3652_v16 = vpop.eup %3651  ;;  %1372 = vst.msk [vmem:[#allocation2 + $0x1b8] sm:$0xff] %vm782_vm5, %v3650_v4  ;;  %v1396_v4 = vrot.slane %v1382_v57, %v4434_v62 }
 0x30d   : > { %v3654_v17 = vpop.eup %3653  ;;  %1373 = vst.msk [vmem:[#allocation2 + $0x1c0] sm:$0xff] %vm782_vm5, %v3652_v16 }
 0x30e   : > { %v3656_v18 = vpop.eup %3655  ;;  %1374 = vst.msk [vmem:[#allocation2 + $0x1c8] sm:$0xff] %vm782_vm5, %v3654_v17  ;;  %v4813_v16 = vrot.slane %v1396_v4, %v4434_v62 }
 0x30f   : > { %v3658_v7 = vpop.eup %3657  ;;  %1375 = vst.msk [vmem:[#allocation2 + $0x1d0] sm:$0xff] %vm782_vm5, %v3656_v18  ;;  %1670 = vbcast.lane.b32.xlu1 %v4610_v14, 304  ;;  %1639 = vbcast.lane.b32.xlu0 %v4554_v58, 312 }
 0x310   : > { %v3660_v34 = vpop.eup %3659  ;;  %1376 = vst.msk [vmem:[#allocation2 + $0x1d8] sm:$0xff] %vm782_vm5, %v3658_v7 }
 0x311   : > { %v1445_v24 = vpop.permute.xlu1 %1444  ;;  %v1437_v31 = vpop.permute.xlu0 %1436  ;;  %1377 = vst.msk [vmem:[#allocation2 + $0x1e0] sm:$0xff] %vm782_vm5, %v3660_v34 }
 0x312   : > { %v1753_v56 = vmul.f32 %v4691_v1, %v1445_v24  ;;  %v1751_v36 = vmul.f32 %v4691_v1, %v1437_v31  ;;  %v3662_v3 = vpop.eup %3661 }
 0x313   : > { %v3664_v12 = vpop.eup %3663  ;;  %1378 = vst.msk [vmem:[#allocation2 + $0x1e8] sm:$0xff] %vm782_vm5, %v3662_v3  ;;  %1701 = vbcast.lane.b32.xlu1 %v4704_v43, 296  ;;  %1693 = vbcast.lane.b32.xlu0 %v4704_v43, 280 }
 0x314   : > { %1817 = vst.msk [vmem:[#allocation3 + $0x10] sm:$0xff] %vm782_vm5, %v1753_v56  ;;  %1815 = vst.msk [vmem:[#allocation3] sm:$0xff] %vm782_vm5, %v1751_v36  ;;  %v3666_v11 = vpop.eup %3665 }
 0x315   : > { %v1449_v40 = vpop.permute.xlu1 %1448  ;;  %v1441_v22 = vpop.permute.xlu0 %1440  ;;  %1379 = vst.msk [vmem:[#allocation2 + $0x1f0] sm:$0xff] %vm782_vm5, %v3664_v12  ;;  %1380 = vst.msk [vmem:[#allocation2 + $0x1f8] sm:$0xff] %vm782_vm5, %v3666_v11  ;;  %v1398_v12 = vcombine.high %v1396_v4, %v1396_v4 }
 0x316   : > { %v1754_v60 = vmul.f32 %v4691_v1, %v1449_v40  ;;  %v1752_v55 = vmul.f32 %v4691_v1, %v1441_v22 }
 0x317   : > { %1934 = vbcast.lane.b32.xlu1 %v4766_v19, 256  ;;  %1697 = vbcast.lane.b32.xlu0 %v4704_v43, 288 }
 0x318   : > { %1818 = vst.msk [vmem:[#allocation3 + $0x18] sm:$0xff] %vm782_vm5, %v1754_v60  ;;  %1816 = vst.msk [vmem:[#allocation3 + $0x8] sm:$0xff] %vm782_vm5, %v1752_v55 }
 0x319   : > { %v1476_v52 = vpop.permute.xlu1 %1475  ;;  %v1472_v2 = vpop.permute.xlu0 %1471 }
 0x31a   : > { %v1760_v33 = vmul.f32 %v4721_v63, %v1476_v52  ;;  %v1759_v5 = vmul.f32 %v4721_v63, %v1472_v2 }
 0x31b   : > { %1969 = vbcast.lane.b32.xlu1 %v4393_v38, 256  ;;  %1674 = vbcast.lane.b32.xlu0 %v4610_v14, 312 }
 0x31c   : > { %1824 = vst.msk [vmem:[#allocation3 + $0x48] sm:$0xff] %vm782_vm5, %v1760_v33  ;;  %1823 = vst.msk [vmem:[#allocation3 + $0x40] sm:$0xff] %vm782_vm5, %v1759_v5 }
 0x31d   : > { %v1480_v23 = vpop.permute.xlu1 %1479  ;;  %v1453_v25 = vpop.permute.xlu0 %1452 }
 0x31e   : > { %v1761_v26 = vmul.f32 %v4721_v63, %v1480_v23  ;;  %v1755_v8 = vmul.f32 %v4691_v1, %v1453_v25  ;;  %v4823_v25 = vrot.slane %v4813_v16, %v4376_v20 }
 0x31f   : > { %1977 = vbcast.lane.b32.xlu1 %v4393_v38, 272  ;;  %1705 = vbcast.lane.b32.xlu0 %v4704_v43, 304 }
 0x320   : > { %1825 = vst.msk [vmem:[#allocation3 + $0x50] sm:$0xff] %vm782_vm5, %v1761_v26  ;;  %1819 = vst.msk [vmem:[#allocation3 + $0x20] sm:$0xff] %vm782_vm5, %v1755_v8 }
 0x321   : > { %v1484_v42 = vpop.permute.xlu1 %1483  ;;  %v1457_v27 = vpop.permute.xlu0 %1456 }
 0x322   : > { %v1762_v6 = vmul.f32 %v4721_v63, %v1484_v42  ;;  %v1756_v10 = vmul.f32 %v4691_v1, %v1457_v27 }
 0x323   : > { %2008 = vbcast.lane.b32.xlu1 %v4396_v39, 264  ;;  %1709 = vbcast.lane.b32.xlu0 %v4704_v43, 312 }
 0x324   : > { %1826 = vst.msk [vmem:[#allocation3 + $0x58] sm:$0xff] %vm782_vm5, %v1762_v6  ;;  %1820 = vst.msk [vmem:[#allocation3 + $0x28] sm:$0xff] %vm782_vm5, %v1756_v10  ;;  %v4852_v10 = vrot.slane %v1398_v12, %v4434_v62 }
 0x325   : > { %v1511_v15 = vpop.permute.xlu1 %1510  ;;  %v1507_v30 = vpop.permute.xlu0 %1506 }
 0x326   : > { %v1768_v24 = vmul.f32 %v4756_v13, %v1511_v15  ;;  %v1767_v31 = vmul.f32 %v4756_v13, %v1507_v30 }
 0x327   : > { %1946 = vbcast.lane.b32.xlu1 %v4766_v19, 280  ;;  %1938 = vbcast.lane.b32.xlu0 %v4766_v19, 264 }
 0x328   : > { %1832 = vst.msk [vmem:[#allocation3 + $0x88] sm:$0xff] %vm782_vm5, %v1768_v24  ;;  %1831 = vst.msk [vmem:[#allocation3 + $0x80] sm:$0xff] %vm782_vm5, %v1767_v31 }
 0x329   : > { %v1488_v58 = vpop.permute.xlu1 %1487  ;;  %v1461_v32 = vpop.permute.xlu0 %1460 }
 0x32a   : > { %v1763_v56 = vmul.f32 %v4721_v63, %v1488_v58  ;;  %v1757_v36 = vmul.f32 %v4691_v1, %v1461_v32 }
 0x32b   : > { %2012 = vbcast.lane.b32.xlu1 %v4396_v39, 272  ;;  %1973 = vbcast.lane.b32.xlu0 %v4393_v38, 264 }
 0x32c   : > { %1827 = vst.msk [vmem:[#allocation3 + $0x60] sm:$0xff] %vm782_vm5, %v1763_v56  ;;  %1821 = vst.msk [vmem:[#allocation3 + $0x30] sm:$0xff] %vm782_vm5, %v1757_v36 }
 0x32d   : > { %v1465_v35 = vpop.permute.xlu1 %1464  ;;  %v1515_v61 = vpop.permute.xlu0 %1514 }
 0x32e   : > { %v1758_v49 = vmul.f32 %v4691_v1, %v1465_v35  ;;  %v1769_v50 = vmul.f32 %v4756_v13, %v1515_v61  ;;  %v4789_v1 = vrot.slane %v1429_v28, %v4376_v20  ;;  %v3186_v28 = vmul.f32 -1.442695, %v4349_v48 }
 0x32f   : > { %2043 = vbcast.lane.b32.xlu1 %v4399_v41, 264  ;;  %1942 = vbcast.lane.b32.xlu0 %v4766_v19, 272 }
 0x330   : > { %1822 = vst.msk [vmem:[#allocation3 + $0x38] sm:$0xff] %vm782_vm5, %v1758_v49  ;;  %1833 = vst.msk [vmem:[#allocation3 + $0x90] sm:$0xff] %vm782_vm5, %v1769_v50  ;;  %3667 = vpow2.f32 %v3186_v28 }
 0x331   : > { %v1519_v54 = vpop.permute.xlu1 %1518  ;;  %v1492_v40 = vpop.permute.xlu0 %1491 }
 0x332   : > { %v1770_v22 = vmul.f32 %v4756_v13, %v1519_v54  ;;  %v1764_v37 = vmul.f32 %v4721_v63, %v1492_v40  ;;  %v1428_v54 = vcombine.high %v4813_v16, %v4813_v16 }
 0x333   : > { %1950 = vbcast.lane.b32.xlu1 %v4766_v19, 288  ;;  %2004 = vbcast.lane.b32.xlu0 %v4396_v39, 256 }
 0x334   : > { %1834 = vst.msk [vmem:[#allocation3 + $0x98] sm:$0xff] %vm782_vm5, %v1770_v22  ;;  %1828 = vst.msk [vmem:[#allocation3 + $0x68] sm:$0xff] %vm782_vm5, %v1764_v37 }
 0x335   : > { %v1546_v14 = vpop.permute.xlu1 %1545  ;;  %v1542_v60 = vpop.permute.xlu0 %1541 }
 0x336   : > { %v1776_v51 = vmul.f32 %v4789_v1, %v1546_v14  ;;  %v1775_v55 = vmul.f32 %v4789_v1, %v1542_v60 }
 0x337   : > { %2016 = vbcast.lane.b32.xlu1 %v4396_v39, 280  ;;  %1981 = vbcast.lane.b32.xlu0 %v4393_v38, 280 }
 0x338   : > { %1840 = vst.msk [vmem:[#allocation3 + $0xc8] sm:$0xff] %vm782_vm5, %v1776_v51  ;;  %1839 = vst.msk [vmem:[#allocation3 + $0xc0] sm:$0xff] %vm782_vm5, %v1775_v55  ;;  %v4886_v51 = vrot.slane %v1428_v54, %v4376_v20 }
 0x339   : > { %v1523_v59 = vpop.permute.xlu1 %1522  ;;  %v1496_v52 = vpop.permute.xlu0 %1495 }
 0x33a   : > { %v1771_v53 = vmul.f32 %v4756_v13, %v1523_v59  ;;  %v1765_v2 = vmul.f32 %v4721_v63, %v1496_v52 }
 0x33b   : > { %2074 = vbcast.lane.b32.xlu1 %v4402_v44, 256  ;;  %2039 = vbcast.lane.b32.xlu0 %v4399_v41, 256 }
 0x33c   : > { %1835 = vst.msk [vmem:[#allocation3 + $0xa0] sm:$0xff] %vm782_vm5, %v1771_v53  ;;  %1829 = vst.msk [vmem:[#allocation3 + $0x70] sm:$0xff] %vm782_vm5, %v1765_v2 }
 0x33d   : > { %v1500_v29 = vpop.permute.xlu1 %1499  ;;  %v1550_v33 = vpop.permute.xlu0 %1549 }
 0x33e   : > { %v1766_v43 = vmul.f32 %v4721_v63, %v1500_v29  ;;  %v1777_v5 = vmul.f32 %v4789_v1, %v1550_v33 }
 0x33f   : > { %1989 = vbcast.lane.b32.xlu1 %v4393_v38, 296  ;;  %1985 = vbcast.lane.b32.xlu0 %v4393_v38, 288 }
 0x340   : > { %1830 = vst.msk [vmem:[#allocation3 + $0x78] sm:$0xff] %vm782_vm5, %v1766_v43  ;;  %1841 = vst.msk [vmem:[#allocation3 + $0xd0] sm:$0xff] %vm782_vm5, %v1777_v5  ;;  %v3668_v43 = vpop.eup %3667 }
 0x341   : > { %v1554_v17 = vpop.permute.xlu1 %1553  ;;  %v1527_v23 = vpop.permute.xlu0 %1526 }
 0x342   : > { %v1778_v18 = vmul.f32 %v4789_v1, %v1554_v17  ;;  %v1772_v63 = vmul.f32 %v4756_v13, %v1527_v23 }
 0x343   : > { %2051 = vbcast.lane.b32.xlu1 %v4399_v41, 280  ;;  %2047 = vbcast.lane.b32.xlu0 %v4399_v41, 272 }
 0x344   : > { %1842 = vst.msk [vmem:[#allocation3 + $0xd8] sm:$0xff] %vm782_vm5, %v1778_v18  ;;  %1836 = vst.msk [vmem:[#allocation3 + $0xa8] sm:$0xff] %vm782_vm5, %v1772_v63  ;;  %v1430_v63 = vcombine.high %v4852_v10, %v4852_v10 }
 0x345   : > { %v1581_v7 = vpop.permute.xlu1 %1580  ;;  %v1577_v8 = vpop.permute.xlu0 %1576 }
 0x346   : > { %v1784_v26 = vmul.f32 %v4823_v25, %v1581_v7  ;;  %v1783_v34 = vmul.f32 %v4823_v25, %v1577_v8 }
 0x347   : > { %2109 = vbcast.lane.b32.xlu1 %v4407_v45, 256  ;;  %2078 = vbcast.lane.b32.xlu0 %v4402_v44, 264 }
 0x348   : > { %1848 = vst.msk [vmem:[#allocation3 + $0x108] sm:$0xff] %vm782_vm5, %v1784_v26  ;;  %1847 = vst.msk [vmem:[#allocation3 + $0x100] sm:$0xff] %vm782_vm5, %v1783_v34 }
 0x349   : > { %v1558_v3 = vpop.permute.xlu1 %1557  ;;  %v1531_v42 = vpop.permute.xlu0 %1530 }
 0x34a   : > { %v1779_v21 = vmul.f32 %v4789_v1, %v1558_v3  ;;  %v1773_v11 = vmul.f32 %v4756_v13, %v1531_v42 }
 0x34b   : > { %1993 = vbcast.lane.b32.xlu1 %v4393_v38, 304  ;;  %1954 = vbcast.lane.b32.xlu0 %v4766_v19, 296 }
 0x34c   : > { %1843 = vst.msk [vmem:[#allocation3 + $0xe0] sm:$0xff] %vm782_vm5, %v1779_v21  ;;  %1837 = vst.msk [vmem:[#allocation3 + $0xb0] sm:$0xff] %vm782_vm5, %v1773_v11 }
 0x34d   : > { %v1535_v27 = vpop.permute.xlu1 %1534  ;;  %v1585_v15 = vpop.permute.xlu0 %1584 }
 0x34e   : > { %v1774_v6 = vmul.f32 %v4756_v13, %v1535_v27  ;;  %v1785_v24 = vmul.f32 %v4823_v25, %v1585_v15  ;;  %v4862_v13 = vrot.slane %v4852_v10, %v4376_v20 }
 0x34f   : > { %2055 = vbcast.lane.b32.xlu1 %v4399_v41, 288  ;;  %2020 = vbcast.lane.b32.xlu0 %v4396_v39, 288 }
 0x350   : > { %1838 = vst.msk [vmem:[#allocation3 + $0xb8] sm:$0xff] %vm782_vm5, %v1774_v6  ;;  %1849 = vst.msk [vmem:[#allocation3 + $0x110] sm:$0xff] %vm782_vm5, %v1785_v24 }
 0x351   : > { %v1589_v30 = vpop.permute.xlu1 %1588  ;;  %v1562_v58 = vpop.permute.xlu0 %1561 }
 0x352   : > { %v1786_v31 = vmul.f32 %v4823_v25, %v1589_v30  ;;  %v1780_v56 = vmul.f32 %v4789_v1, %v1562_v58 }
 0x353   : > { %2117 = vbcast.lane.b32.xlu1 %v4407_v45, 272  ;;  %2082 = vbcast.lane.b32.xlu0 %v4402_v44, 272 }
 0x354   : > { %1850 = vst.msk [vmem:[#allocation3 + $0x118] sm:$0xff] %vm782_vm5, %v1786_v31  ;;  %1844 = vst.msk [vmem:[#allocation3 + $0xe8] sm:$0xff] %vm782_vm5, %v1780_v56 }
 0x355   : > { %v1616_v32 = vpop.permute.xlu1 %1615  ;;  %v1612_v35 = vpop.permute.xlu0 %1611 }
 0x356   : > { %v1792_v36 = vmul.f32 %v4862_v13, %v1616_v32  ;;  %v1791_v49 = vmul.f32 %v4862_v13, %v1612_v35 }
 0x357   : > { %2148 = vbcast.lane.b32.xlu1 %v4412_v46, 264  ;;  %2113 = vbcast.lane.b32.xlu0 %v4407_v45, 264 }
 0x358   : > { %1856 = vst.msk [vmem:[#allocation3 + $0x148] sm:$0xff] %vm782_vm5, %v1792_v36  ;;  %1855 = vst.msk [vmem:[#allocation3 + $0x140] sm:$0xff] %vm782_vm5, %v1791_v49 }
 0x359   : > { %v1593_v61 = vpop.permute.xlu1 %1592  ;;  %v1566_v40 = vpop.permute.xlu0 %1565 }
 0x35a   : > { %v1787_v50 = vmul.f32 %v4823_v25, %v1593_v61  ;;  %v1781_v37 = vmul.f32 %v4789_v1, %v1566_v40 }
 0x35b   : > { %1962 = vbcast.lane.b32.xlu1 %v4766_v19, 312  ;;  %1958 = vbcast.lane.b32.xlu0 %v4766_v19, 304 }
 0x35c   : > { %1851 = vst.msk [vmem:[#allocation3 + $0x120] sm:$0xff] %vm782_vm5, %v1787_v50  ;;  %1845 = vst.msk [vmem:[#allocation3 + $0xf0] sm:$0xff] %vm782_vm5, %v1781_v37 }
 0x35d   : > { %v1597_v22 = vpop.permute.xlu1 %1596  ;;  %v1620_v60 = vpop.permute.xlu0 %1619 }
 0x35e   : > { %v1788_v14 = vmul.f32 %v4823_v25, %v1597_v22  ;;  %v1793_v57 = vmul.f32 %v4862_v13, %v1620_v60 }
 0x35f   : > { %2028 = vbcast.lane.b32.xlu1 %v4396_v39, 304  ;;  %2024 = vbcast.lane.b32.xlu0 %v4396_v39, 296 }
 0x360   : > { %1852 = vst.msk [vmem:[#allocation3 + $0x128] sm:$0xff] %vm782_vm5, %v1788_v14  ;;  %1857 = vst.msk [vmem:[#allocation3 + $0x150] sm:$0xff] %vm782_vm5, %v1793_v57 }
 0x361   : > { %v1647_v55 = vpop.permute.xlu1 %1646  ;;  %v1570_v19 = vpop.permute.xlu0 %1569 }
 0x362   : > { %v1799_v59 = vmul.f32 %v4886_v51, %v1647_v55  ;;  %v1782_v52 = vmul.f32 %v4789_v1, %v1570_v19  ;;  %v709_v1 = vadd.f32 1.0, %v3668_v43 }
 0x363   : > { %2090 = vbcast.lane.b32.xlu1 %v4402_v44, 288  ;;  %2086 = vbcast.lane.b32.xlu0 %v4402_v44, 280 }
 0x364   : > { %1863 = vst.msk [vmem:[#allocation3 + $0x180] sm:$0xff] %vm782_vm5, %v1799_v59  ;;  %1846 = vst.msk [vmem:[#allocation3 + $0xf8] sm:$0xff] %vm782_vm5, %v1782_v52  ;;  %3669 = vrcp.f32 %v709_v1  ;;  %v2881_v1 = vld [vmem:[%s5584_s20 + $0x10] sm:$0xff] }
 0x365   : > { %v1601_v53 = vpop.permute.xlu1 %1600  ;;  %v1624_v4 = vpop.permute.xlu0 %1623 }
 0x366   : > { %v1789_v2 = vmul.f32 %v4823_v25, %v1601_v53  ;;  %v1794_v33 = vmul.f32 %v4862_v13, %v1624_v4 }
 0x367   : > { %2152 = vbcast.lane.b32.xlu1 %v4412_v46, 272  ;;  %2144 = vbcast.lane.b32.xlu0 %v4412_v46, 256 }
 0x368   : > { %1853 = vst.msk [vmem:[#allocation3 + $0x130] sm:$0xff] %vm782_vm5, %v1789_v2  ;;  %1858 = vst.msk [vmem:[#allocation3 + $0x158] sm:$0xff] %vm782_vm5, %v1794_v33 }
 0x369   : > { %v1655_v29 = vpop.permute.xlu1 %1654  ;;  %v1651_v16 = vpop.permute.xlu0 %1650 }
 0x36a   : > { %v1801_v5 = vmul.f32 %v4886_v51, %v1655_v29  ;;  %v1800_v18 = vmul.f32 %v4886_v51, %v1651_v16  ;;  %v2882_v16 = vld [vmem:[%s5584_s20 + $0x18] sm:$0xff] }
 0x36b   : > { %2183 = vbcast.lane.b32.xlu1 %v4417_v47, 264  ;;  %1997 = vbcast.lane.b32.xlu0 %v4393_v38, 312  ;;  %v4921_v38 = vrot.slane %v1430_v63, %v4376_v20 }
 0x36c   : > { %1865 = vst.msk [vmem:[#allocation3 + $0x190] sm:$0xff] %vm782_vm5, %v1801_v5  ;;  %1864 = vst.msk [vmem:[#allocation3 + $0x188] sm:$0xff] %vm782_vm5, %v1800_v18 }
 0x36d   : > { %v1605_v17 = vpop.permute.xlu1 %1604  ;;  %v1628_v7 = vpop.permute.xlu0 %1627 }
 0x36e   : > { %v1790_v23 = vmul.f32 %v4823_v25, %v1605_v17  ;;  %v1795_v8 = vmul.f32 %v4862_v13, %v1628_v7  ;;  %v3670_v6 = vpop.eup %3669 }
 0x36f   : > { %2032 = vbcast.lane.b32.xlu1 %v4396_v39, 312  ;;  %2059 = vbcast.lane.b32.xlu0 %v4399_v41, 296  ;;  %v4938_v30 = vmul.f32 %v3670_v6, %v4349_v48 }
 0x370   : > { %1854 = vst.msk [vmem:[#allocation3 + $0x138] sm:$0xff] %vm782_vm5, %v1790_v23  ;;  %1859 = vst.msk [vmem:[#allocation3 + $0x160] sm:$0xff] %vm782_vm5, %v1795_v8  ;;  %v3414_v23 = vpack.c.bf16 %v2882_v16, %v2881_v1  ;;  %v2884_v8 = vld [vmem:[%s5584_s20 + $0x28] sm:$0xff] }
 0x371   : > { %v1659_v26 = vpop.permute.xlu1 %1658  ;;  %v1632_v39 = vpop.permute.xlu0 %1631  ;;  %v1887_v58 = vrot.slane %v4938_v30, %v4434_v62 }
 0x372   : > { %v1802_v34 = vmul.f32 %v4886_v51, %v1659_v26  ;;  %v1796_v3 = vmul.f32 %v4862_v13, %v1632_v39  ;;  %v2883_v26 = vld [vmem:[%s5584_s20 + $0x20] sm:$0xff] }
 0x373   : > { %2094 = vbcast.lane.b32.xlu1 %v4402_v44, 296  ;;  %2121 = vbcast.lane.b32.xlu0 %v4407_v45, 280  ;;  %v1903_v35 = vrot.slane %v1887_v58, %v4434_v62 }
 0x374   : > { %1866 = vst.msk [vmem:[#allocation3 + $0x198] sm:$0xff] %vm782_vm5, %v1802_v34  ;;  %1860 = vst.msk [vmem:[#allocation3 + $0x168] sm:$0xff] %vm782_vm5, %v1796_v3  ;;  %v3417_v3 = vpack.c.bf16 %v2884_v8, %v2883_v26 }
 0x375   : > { %v1686_v25 = vpop.permute.xlu1 %1685  ;;  %v1682_v12 = vpop.permute.xlu0 %1681  ;;  %v4963_v40 = vrot.slane %v1903_v35, %v4376_v20  ;;  %v1925_v53 = vcombine.high %v1903_v35, %v1903_v35 }
 0x376   : > { %v1808_v21 = vmul.f32 %v4921_v38, %v1686_v25  ;;  %v1807_v27 = vmul.f32 %v4921_v38, %v1682_v12 }
 0x377   : > { %2156 = vbcast.lane.b32.xlu1 %v4412_v46, 280  ;;  %2179 = vbcast.lane.b32.xlu0 %v4417_v47, 256  ;;  %v4988_v43 = vrot.slane %v1925_v53, %v4376_v20 }
 0x378   : > { %1872 = vst.msk [vmem:[#allocation3 + $0x1c8] sm:$0xff] %vm782_vm5, %v1808_v21  ;;  %1871 = vst.msk [vmem:[#allocation3 + $0x1c0] sm:$0xff] %vm782_vm5, %v1807_v27 }
 0x379   : > { %v1663_v42 = vpop.permute.xlu1 %1662  ;;  %v1636_v10 = vpop.permute.xlu0 %1635 }
 0x37a   : > { %v1803_v11 = vmul.f32 %v4886_v51, %v1663_v42  ;;  %v1797_v24 = vmul.f32 %v4862_v13, %v1636_v10 }
 0x37b   : > { %2067 = vbcast.lane.b32.xlu1 %v4399_v41, 312  ;;  %2063 = vbcast.lane.b32.xlu0 %v4399_v41, 304  ;;  %v1895_v41 = vcombine.high %v1887_v58, %v1887_v58 }
 0x37c   : > { %1867 = vst.msk [vmem:[#allocation3 + $0x1a0] sm:$0xff] %vm782_vm5, %v1803_v11  ;;  %1861 = vst.msk [vmem:[#allocation3 + $0x170] sm:$0xff] %vm782_vm5, %v1797_v24  ;;  %v1880_v11 = vcombine.high %v4938_v30, %v4938_v30 }
 0x37d   : > { %v1667_v15 = vpop.permute.xlu1 %1666  ;;  %v1690_v32 = vpop.permute.xlu0 %1689  ;;  %v4960_v54 = vrot.slane %v1895_v41, %v4434_v62 }
 0x37e   : > { %v1804_v31 = vmul.f32 %v4886_v51, %v1667_v15  ;;  %v1809_v48 = vmul.f32 %v4921_v38, %v1690_v32  ;;  %v1894_v58 = vrot.slane %v1880_v11, %v4434_v62 }
 0x37f   : > { %2129 = vbcast.lane.b32.xlu1 %v4407_v45, 296  ;;  %2125 = vbcast.lane.b32.xlu0 %v4407_v45, 288  ;;  %v4973_v60 = vrot.slane %v4960_v54, %v4376_v20  ;;  %v1927_v25 = vcombine.high %v4960_v54, %v4960_v54 }
 0x380   : > { %1868 = vst.msk [vmem:[#allocation3 + $0x1a8] sm:$0xff] %vm782_vm5, %v1804_v31  ;;  %1873 = vst.msk [vmem:[#allocation3 + $0x1d0] sm:$0xff] %vm782_vm5, %v1809_v48  ;;  %v5051_v41 = vrot.slane %v1894_v58, %v4434_v62 }
 0x381   : > { %v1671_v56 = vpop.permute.xlu1 %1670  ;;  %v1640_v61 = vpop.permute.xlu0 %1639  ;;  %v5038_v6 = vrot.slane %v1927_v25, %v4376_v20  ;;  %v2394_v25 = vld [vmem:[#allocation3 + $0x8] sm:$0xff] }
 0x382   : > { %v1805_v36 = vmul.f32 %v4886_v51, %v1671_v56  ;;  %v1798_v50 = vmul.f32 %v4862_v13, %v1640_v61 }
 0x383   : > { %2191 = vbcast.lane.b32.xlu1 %v4417_v47, 280  ;;  %2187 = vbcast.lane.b32.xlu0 %v4417_v47, 272 }
 0x384   : > { %1869 = vst.msk [vmem:[#allocation3 + $0x1b0] sm:$0xff] %vm782_vm5, %v1805_v36  ;;  %1862 = vst.msk [vmem:[#allocation3 + $0x178] sm:$0xff] %vm782_vm5, %v1798_v50 }
 0x385   : > { %v1702_v49 = vpop.permute.xlu1 %1701  ;;  %v1694_v22 = vpop.permute.xlu0 %1693 }
 0x386   : > { %v1812_v28 = vmul.f32 %v4921_v38, %v1702_v49  ;;  %v1810_v13 = vmul.f32 %v4921_v38, %v1694_v22 }
 0x387   : > { %2133 = vbcast.lane.b32.xlu1 %v4407_v45, 304  ;;  %2098 = vbcast.lane.b32.xlu0 %v4402_v44, 304 }
 0x388   : > { %1876 = vst.msk [vmem:[#allocation3 + $0x1e8] sm:$0xff] %vm782_vm5, %v1812_v28  ;;  %1874 = vst.msk [vmem:[#allocation3 + $0x1d8] sm:$0xff] %vm782_vm5, %v1810_v13  ;;  %v5059_v28 = vrot.slane %v5051_v41, %v4376_v20 }
 0x389   : > { %v1935_v37 = vpop.permute.xlu1 %1934  ;;  %v1698_v55 = vpop.permute.xlu0 %1697 }
 0x38a   : > { %v2249_v14 = vmul.f32 %v4963_v40, %v1935_v37  ;;  %v1811_v59 = vmul.f32 %v4921_v38, %v1698_v55 }
 0x38b   : > { %2195 = vbcast.lane.b32.xlu1 %v4417_v47, 288  ;;  %2160 = vbcast.lane.b32.xlu0 %v4412_v46, 288 }
 0x38c   : > { %2313 = vst.msk [vmem:[#allocation4] sm:$0xff] %vm782_vm5, %v2249_v14  ;;  %1875 = vst.msk [vmem:[#allocation3 + $0x1e0] sm:$0xff] %vm782_vm5, %v1811_v59  ;;  %v1896_v14 = vcombine.high %v1894_v58, %v1894_v58  ;;  %v2381_v58 = vld [vmem:[#allocation2 + $0x20] sm:$0xff] }
 0x38d   : > { %v1970_v57 = vpop.permute.xlu1 %1969  ;;  %v1675_v52 = vpop.permute.xlu0 %1674 }
 0x38e   : > { %v2257_v19 = vmul.f32 %v4973_v60, %v1970_v57  ;;  %v1806_v4 = vmul.f32 %v4886_v51, %v1675_v52  ;;  %v2880_v51 = vld [vmem:[%s5584_s20 + $0x8] sm:$0xff]  ;;  %v5070_v53 = vrot.slane %v1896_v14, %v4434_v62  ;;  %v2397_v14 = vld [vmem:[#allocation3 + $0x20] sm:$0xff] }
 0x38f   : > { %2137 = vbcast.lane.b32.xlu1 %v4407_v45, 312  ;;  %2102 = vbcast.lane.b32.xlu0 %v4402_v44, 312  ;;  %v2879_v45 = vld [vmem:[%s5584_s20] sm:$0xff] }
 0x390   : > { %2321 = vst.msk [vmem:[#allocation4 + $0x40] sm:$0xff] %vm782_vm5, %v2257_v19  ;;  %1870 = vst.msk [vmem:[#allocation3 + $0x1b8] sm:$0xff] %vm782_vm5, %v1806_v4  ;;  %v3411_v44 = vpack.c.bf16 %v2880_v51, %v2879_v45  ;;  %v2960_v4 = vld [vmem:[%s5585_s23] sm:$0xff]  ;;  %v2962_v45 = vld [vmem:[%s5585_s23 + $0x10] sm:$0xff] }
 0x391   : > { %v1978_v2 = vpop.permute.xlu1 %1977  ;;  %v1706_v33 = vpop.permute.xlu0 %1705 }
 0x392   : > { %v2259_v29 = vmul.f32 %v4973_v60, %v1978_v2  ;;  %v1813_v17 = vmul.f32 %v4921_v38, %v1706_v33  ;;  %3412 = vmatpush3.bf16.msra.mxu1 %v3411_v44  ;;  %v5090_v44 = vrot.slane %v5070_v53, %v4376_v20 }
 0x393   : > { %2199 = vbcast.lane.b32.xlu1 %v4417_v47, 296  ;;  %2164 = vbcast.lane.b32.xlu0 %v4412_v46, 296 }
 0x394   : > { %2323 = vst.msk [vmem:[#allocation4 + $0x50] sm:$0xff] %vm782_vm5, %v2259_v29  ;;  %1877 = vst.msk [vmem:[#allocation3 + $0x1f0] sm:$0xff] %vm782_vm5, %v1813_v17  ;;  %3413 = vmatprep.subr.bf16.mxu1 %v3929_v0  ;;  %v2961_v29 = vld [vmem:[%s5585_s23 + $0x8] sm:$0xff] }
 0x395   : > { %v2009_v5 = vpop.permute.xlu1 %2008  ;;  %v1710_v63 = vpop.permute.xlu0 %1709  ;;  %v3423_v33 = vpack.c.bf16 %v2961_v29, %v2960_v4  ;;  %v2434_v29 = vld [vmem:[#allocation2 + $0x40] sm:$0xff] }
 0x396   : > { %v2266_v18 = vmul.f32 %v4988_v43, %v2009_v5  ;;  %v1814_v34 = vmul.f32 %v4921_v38, %v1710_v63  ;;  %3415 = vmatpush3.bf16.msra.mxu1 %v3414_v23  ;;  %v2885_v38 = vld [vmem:[%s5584_s20 + $0x30] sm:$0xff]  ;;  %v2963_v5 = vld [vmem:[%s5585_s23 + $0x18] sm:$0xff] }
 0x397   : > { %2172 = vbcast.lane.b32.xlu1 %v4412_v46, 312  ;;  %2168 = vbcast.lane.b32.xlu0 %v4412_v46, 304  ;;  %v2886_v46 = vld [vmem:[%s5584_s20 + $0x38] sm:$0xff]  ;;  %v3426_v1 = vpack.c.bf16 %v2963_v5, %v2962_v45  ;;  %v2383_v45 = vld [vmem:[#allocation2 + $0x30] sm:$0xff] }
 0x398   : > { %2330 = vst.msk [vmem:[#allocation4 + $0x88] sm:$0xff] %vm782_vm5, %v2266_v18  ;;  %1878 = vst.msk [vmem:[#allocation3 + $0x1f8] sm:$0xff] %vm782_vm5, %v1814_v34  ;;  %3416 = vmatprep.subr.bf16.mxu1 %v3929_v0  ;;  %v3420_v10 = vpack.c.bf16 %v2886_v46, %v2885_v38  ;;  %3424 = vmatpush3.bf16.msra.mxu0 %v3423_v33  ;;  %v2378_v34 = vld [vmem:[#allocation2 + $0x8] sm:$0xff]  ;;  %v1926_v38 = vcombine.high %v5051_v41, %v5051_v41  ;;  %v2377_v46 = vld [vmem:[#allocation2] sm:$0xff] }
 0x399   : > { %v1947_v7 = vpop.permute.xlu1 %1946  ;;  %v1939_v21 = vpop.permute.xlu0 %1938  ;;  %3425 = vmatprep.subr.bf16.mxu0 %v3929_v0  ;;  %v2382_v41 = vld [vmem:[#allocation2 + $0x28] sm:$0xff]  ;;  %v2436_v33 = vld [vmem:[#allocation2 + $0x50] sm:$0xff] }
 0x39a   : > { %v2252_v39 = vmul.f32 %v4963_v40, %v1947_v7  ;;  %v2250_v42 = vmul.f32 %v4963_v40, %v1939_v21  ;;  %3418 = vmatpush3.bf16.msra.mxu1 %v3417_v3 }
 0x39b   : > { %2207 = vbcast.lane.b32.xlu1 %v4417_v47, 312  ;;  %2203 = vbcast.lane.b32.xlu0 %v4417_v47, 304 }
 0x39c   : > { %2316 = vst.msk [vmem:[#allocation4 + $0x18] sm:$0xff] %vm782_vm5, %v2252_v39  ;;  %2314 = vst.msk [vmem:[#allocation4 + $0x8] sm:$0xff] %vm782_vm5, %v2250_v42  ;;  %3419 = vmatprep.subr.bf16.mxu1 %v3929_v0  ;;  %3427 = vmatpush3.bf16.msra.mxu0 %v3426_v1  ;;  %v2437_v1 = vld [vmem:[#allocation2 + $0x58] sm:$0xff] }
 0x39d   : > { %v2013_v12 = vpop.permute.xlu1 %2012  ;;  %v1974_v15 = vpop.permute.xlu0 %1973 }
 0x39e   : > { %v2267_v27 = vmul.f32 %v4988_v43, %v2013_v12  ;;  %v2258_v31 = vmul.f32 %v4973_v60, %v1974_v15  ;;  %3421 = vmatpush3.bf16.msra.mxu1 %v3420_v10  ;;  %v2386_v12 = vmul.f32 0.0, %v2378_v34  ;;  %v2379_v10 = vld [vmem:[#allocation2 + $0x10] sm:$0xff] }
 0x3a0   : > { %2331 = vst.msk [vmem:[#allocation4 + $0x90] sm:$0xff] %vm782_vm5, %v2267_v27  ;;  %2322 = vst.msk [vmem:[#allocation4 + $0x48] sm:$0xff] %vm782_vm5, %v2258_v31  ;;  %v5109_v42 = vadd.f32 %v2394_v25, %v2386_v12  ;;  %v2393_v31 = vld [vmem:[#allocation3] sm:$0xff]  ;;  %v2454_v25 = vld [vmem:[#allocation3 + $0x58] sm:$0xff] }
 0x3a1   : > { %v2044_v24 = vpop.permute.xlu1 %2043  ;;  %v1943_v32 = vpop.permute.xlu0 %1942 }
 0x3a2   : > { %v2274_v47 = vmul.f32 %v5038_v6, %v2044_v24  ;;  %v2251_v48 = vmul.f32 %v4963_v40, %v1943_v32  ;;  %v5114_v32 = vrot.slane %v1926_v38, %v4376_v20 }
 0x3a4   : > { %2338 = vst.msk [vmem:[#allocation4 + $0xc8] sm:$0xff] %vm782_vm5, %v2274_v47  ;;  %2315 = vst.msk [vmem:[#allocation4 + $0x10] sm:$0xff] %vm782_vm5, %v2251_v48  ;;  %v2380_v47 = vld [vmem:[#allocation2 + $0x18] sm:$0xff]  ;;  %v2385_v48 = vmul.f32 0.0, %v2377_v46  ;;  %v2455_v46 = vld [vmem:[#allocation3 + $0x60] sm:$0xff] }
 0x3a5   : > { %v1951_v56 = vpop.permute.xlu1 %1950  ;;  %v2005_v35 = vpop.permute.xlu0 %2004  ;;  %5586 = vst [vmem:[#allocation22_spill] sm:$0xff] %v5114_v32 }
 0x3a6   : > { %v2253_v36 = vmul.f32 %v4963_v40, %v1951_v56  ;;  %v2265_v49 = vmul.f32 %v4988_v43, %v2005_v35  ;;  %v2395_v56 = vld [vmem:[#allocation3 + $0x10] sm:$0xff]  ;;  %v2387_v35 = vmul.f32 0.0, %v2379_v10  ;;  %v2456_v10 = vld [vmem:[#allocation3 + $0x68] sm:$0xff] }
 0x3a8   : > { %2317 = vst.msk [vmem:[#allocation4 + $0x20] sm:$0xff] %vm782_vm5, %v2253_v36  ;;  %2329 = vst.msk [vmem:[#allocation4 + $0x80] sm:$0xff] %vm782_vm5, %v2265_v49  ;;  %v2435_v36 = vld [vmem:[#allocation2 + $0x48] sm:$0xff] }
 0x3a9   : > { %v2017_v61 = vpop.permute.xlu1 %2016  ;;  %v1982_v54 = vpop.permute.xlu0 %1981  ;;  %v2443_v49 = vmul.f32 %v2435_v36, %v5109_v42 }
 0x3aa   : > { %v2268_v50 = vmul.f32 %v4988_v43, %v2017_v61  ;;  %v2260_v37 = vmul.f32 %v4973_v60, %v1982_v54  ;;  %v2396_v61 = vld [vmem:[#allocation3 + $0x18] sm:$0xff] }
 0x3ac   : > { %2332 = vst.msk [vmem:[#allocation4 + $0x98] sm:$0xff] %vm782_vm5, %v2268_v50  ;;  %2324 = vst.msk [vmem:[#allocation4 + $0x58] sm:$0xff] %vm782_vm5, %v2260_v37  ;;  %v2388_v37 = vmul.f32 0.0, %v2380_v47  ;;  %v2400_v47 = vld [vmem:[#allocation3 + $0x38] sm:$0xff] }
 0x3ad   : > { %v2075_v22 = vpop.permute.xlu1 %2074  ;;  %v2040_v55 = vpop.permute.xlu0 %2039 }
 0x3ae   : > { %v2281_v13 = vmul.f32 %v5059_v28, %v2075_v22  ;;  %v2273_v59 = vmul.f32 %v5038_v6, %v2040_v55  ;;  %v5119_v22 = vadd.f32 %v2393_v31, %v2385_v48  ;;  %v2398_v55 = vld [vmem:[#allocation3 + $0x28] sm:$0xff]  ;;  %v5125_v4 = vadd.f32 %v2396_v61, %v2388_v37 }
 0x3b0   : > { %2345 = vst.msk [vmem:[#allocation4 + $0x100] sm:$0xff] %vm782_vm5, %v2281_v13  ;;  %2337 = vst.msk [vmem:[#allocation4 + $0xc0] sm:$0xff] %vm782_vm5, %v2273_v59  ;;  %v2452_v13 = vld [vmem:[#allocation3 + $0x48] sm:$0xff]  ;;  %v2445_v38 = vmul.f32 %v2437_v1, %v5125_v4  ;;  %v2513_v1 = vld [vmem:[#allocation3 + $0x98] sm:$0xff] }
 0x3b1   : > { %v1990_v57 = vpop.permute.xlu1 %1989  ;;  %v1986_v52 = vpop.permute.xlu0 %1985 }
 0x3b2   : > { %v2262_v19 = vmul.f32 %v4973_v60, %v1990_v57  ;;  %v2261_v62 = vmul.f32 %v4973_v60, %v1986_v52  ;;  %v2389_v52 = vmul.f32 0.0, %v2381_v58  ;;  %v5149_v36 = vadd.f32 %v2454_v25, %v2445_v38  ;;  %v2441_v38 = vld [vmem:[#allocation2 + $0x78] sm:$0xff] }
 0x3b4   : > { %2326 = vst.msk [vmem:[#allocation4 + $0x68] sm:$0xff] %vm782_vm5, %v2262_v19  ;;  %2325 = vst.msk [vmem:[#allocation4 + $0x60] sm:$0xff] %vm782_vm5, %v2261_v62  ;;  %v5123_v19 = vadd.f32 %v2395_v56, %v2387_v35  ;;  %v5129_v62 = vadd.f32 %v2452_v13, %v2443_v49  ;;  %v5131_v5 = vadd.f32 %v2397_v14, %v2389_v52  ;;  %v2495_v14 = vld [vmem:[#allocation2 + $0x90] sm:$0xff] }
 0x3b5   : > { %v2052_v2 = vpop.permute.xlu1 %2051  ;;  %v2048_v16 = vpop.permute.xlu0 %2047 }
 0x3b6   : > { %v2276_v51 = vmul.f32 %v5038_v6, %v2052_v2  ;;  %v2275_v18 = vmul.f32 %v5038_v6, %v2048_v16  ;;  %v2390_v2 = vmul.f32 0.0, %v2382_v41  ;;  %v2493_v41 = vld [vmem:[#allocation2 + $0x80] sm:$0xff] }
 0x3b8   : > { %2340 = vst.msk [vmem:[#allocation4 + $0xd8] sm:$0xff] %vm782_vm5, %v2276_v51  ;;  %2339 = vst.msk [vmem:[#allocation4 + $0xd0] sm:$0xff] %vm782_vm5, %v2275_v18  ;;  %v2451_v51 = vld [vmem:[#allocation3 + $0x40] sm:$0xff]  ;;  %v5133_v16 = vadd.f32 %v2398_v55, %v2390_v2  ;;  %v2496_v55 = vld [vmem:[#allocation2 + $0x98] sm:$0xff] }
 0x3b9   : > { %v2110_v17 = vpop.permute.xlu1 %2109  ;;  %v2079_v63 = vpop.permute.xlu0 %2078  ;;  %v2553_v2 = vld [vmem:[#allocation2 + $0xc8] sm:$0xff] }
 0x3ba   : > { %v2289_v23 = vmul.f32 %v5090_v44, %v2110_v17  ;;  %v2282_v26 = vmul.f32 %v5059_v28, %v2079_v63  ;;  %v2384_v17 = vld [vmem:[#allocation2 + $0x38] sm:$0xff]  ;;  %v2442_v63 = vmul.f32 %v2434_v29, %v5119_v22  ;;  %v2497_v29 = vld [vmem:[#allocation2 + $0xa0] sm:$0xff] }
 0x3bb   : > { %v2392_v35 = vmul.f32 0.0, %v2384_v17  ;;  %v2570_v17 = vld [vmem:[#allocation3 + $0xc8] sm:$0xff] }
 0x3bc   : > { %2353 = vst.msk [vmem:[#allocation4 + $0x140] sm:$0xff] %vm782_vm5, %v2289_v23  ;;  %2346 = vst.msk [vmem:[#allocation4 + $0x108] sm:$0xff] %vm782_vm5, %v2282_v26  ;;  %v2438_v26 = vld [vmem:[#allocation2 + $0x60] sm:$0xff]  ;;  %v5139_v12 = vadd.f32 %v2451_v51, %v2442_v63 }
 0x3bd   : > { %v1994_v7 = vpop.permute.xlu1 %1993  ;;  %v1955_v0 = vpop.permute.xlu0 %1954  ;;  %v2446_v31 = vmul.f32 %v2438_v26, %v5131_v5  ;;  %v5162_v52 = vadd.f32 %v2400_v47, %v2392_v35  ;;  %v2514_v26 = vld [vmem:[#allocation3 + $0xa0] sm:$0xff] }
 0x3be   : > { %v2263_v8 = vmul.f32 %v4973_v60, %v1994_v7  ;;  %v2254_v3 = vmul.f32 %v4963_v40, %v1955_v0  ;;  %v2453_v7 = vld [vmem:[#allocation3 + $0x50] sm:$0xff] }
 0x3bf   : > { %v5155_v37 = vadd.f32 %v2455_v46, %v2446_v31  ;;  %5588 = vst [vmem:[#allocation24_spill] sm:$0xff] %v5162_v52  ;;  %v2458_v31 = vld [vmem:[#allocation3 + $0x78] sm:$0xff] }
 0x3c0   : > { %2327 = vst.msk [vmem:[#allocation4 + $0x70] sm:$0xff] %vm782_vm5, %v2263_v8  ;;  %2318 = vst.msk [vmem:[#allocation4 + $0x28] sm:$0xff] %vm782_vm5, %v2254_v3  ;;  %v2439_v8 = vld [vmem:[#allocation2 + $0x68] sm:$0xff] }
 0x3c1   : > { %v2056_v39 = vpop.permute.xlu1 %2055  ;;  %v2021_v27 = vpop.permute.xlu0 %2020  ;;  %v2494_v3 = vld [vmem:[#allocation2 + $0x88] sm:$0xff]  ;;  %v2447_v58 = vmul.f32 %v2439_v8, %v5133_v16  ;;  %v2457_v8 = vld [vmem:[#allocation3 + $0x70] sm:$0xff] }
 0x3c2   : > { %v2277_v21 = vmul.f32 %v5038_v6, %v2056_v39  ;;  %v2269_v15 = vmul.f32 %v4988_v43, %v2021_v27  ;;  %v2444_v39 = vmul.f32 %v2436_v33, %v5123_v19  ;;  %v2391_v27 = vmul.f32 0.0, %v2383_v45  ;;  %v2498_v45 = vld [vmem:[#allocation2 + $0xa8] sm:$0xff]  ;;  %v2512_v33 = vld [vmem:[#allocation3 + $0x90] sm:$0xff] }
 0x3c4   : > { %2341 = vst.msk [vmem:[#allocation4 + $0xe0] sm:$0xff] %vm782_vm5, %v2277_v21  ;;  %2333 = vst.msk [vmem:[#allocation4 + $0xa0] sm:$0xff] %vm782_vm5, %v2269_v15  ;;  %v2511_v21 = vld [vmem:[#allocation3 + $0x88] sm:$0xff]  ;;  %v5144_v15 = vadd.f32 %v2453_v7, %v2444_v39  ;;  %v2504_v7 = vmul.f32 %v2496_v55, %v5149_v36  ;;  %v2556_v55 = vld [vmem:[#allocation2 + $0xe0] sm:$0xff] }
 0x3c5   : > { %v2118_v11 = vpop.permute.xlu1 %2117  ;;  %v2083_v50 = vpop.permute.xlu0 %2082 }
 0x3c6   : > { %v2291_v24 = vmul.f32 %v5090_v44, %v2118_v11  ;;  %v2283_v57 = vmul.f32 %v5059_v28, %v2083_v50  ;;  %v2399_v11 = vld [vmem:[#allocation3 + $0x30] sm:$0xff]  ;;  %v2503_v51 = vmul.f32 %v2495_v14, %v5144_v15  ;;  %v2555_v14 = vld [vmem:[#allocation2 + $0xd8] sm:$0xff] }
 0x3c7   : > { %v5157_v13 = vadd.f32 %v2399_v11, %v2391_v27  ;;  %v1928_v27 = vcombine.high %v5070_v53, %v5070_v53  ;;  %v2554_v53 = vld [vmem:[#allocation2 + $0xd0] sm:$0xff] }
 0x3c8   : > { %2355 = vst.msk [vmem:[#allocation4 + $0x150] sm:$0xff] %vm782_vm5, %v2291_v24  ;;  %2347 = vst.msk [vmem:[#allocation4 + $0x110] sm:$0xff] %vm782_vm5, %v2283_v57  ;;  %v2502_v24 = vmul.f32 %v2494_v3, %v5129_v62  ;;  %v5159_v57 = vadd.f32 %v2456_v10, %v2447_v58  ;;  %v2505_v3 = vmul.f32 %v2497_v29, %v5155_v37  ;;  %v2552_v58 = vld [vmem:[#allocation2 + $0xc0] sm:$0xff] }
 0x3c9   : > { %v2149_v54 = vpop.permute.xlu1 %2148  ;;  %v2114_v18 = vpop.permute.xlu0 %2113  ;;  %5587 = vst [vmem:[#allocation23_spill] sm:$0xff] %v5157_v13  ;;  %v5178_v11 = vadd.f32 %v2512_v33, %v2503_v51  ;;  %v5180_v10 = vadd.f32 %v2513_v1, %v2504_v7  ;;  %v2571_v51 = vld [vmem:[#allocation3 + $0xd0] sm:$0xff]  ;;  %v2572_v33 = vld [vmem:[#allocation3 + $0xd8] sm:$0xff]  ;;  %v2612_v1 = vld [vmem:[#allocation2 + $0x108] sm:$0xff] }
 0x3ca   : > { %v2298_v59 = vmul.f32 %v5114_v32, %v2149_v54  ;;  %v2290_v34 = vmul.f32 %v5090_v44, %v2114_v18  ;;  %v5153_v50 = vadd.f32 %v2511_v21, %v2502_v24  ;;  %v2510_v54 = vld [vmem:[#allocation3 + $0x80] sm:$0xff]  ;;  %v2506_v46 = vmul.f32 %v2498_v45, %v5159_v57 }
 0x3cb   : > { %v2449_v24 = vmul.f32 %v2441_v38, %v5162_v52  ;;  %v2563_v7 = vmul.f32 %v2555_v14, %v5180_v10 }
 0x3cc   : > { %2362 = vst.msk [vmem:[#allocation4 + $0x188] sm:$0xff] %vm782_vm5, %v2298_v59  ;;  %2354 = vst.msk [vmem:[#allocation4 + $0x148] sm:$0xff] %vm782_vm5, %v2290_v34  ;;  %v2501_v59 = vmul.f32 %v2493_v41, %v5139_v12  ;;  %v2515_v34 = vld [vmem:[#allocation3 + $0xa8] sm:$0xff]  ;;  %v2561_v25 = vmul.f32 %v2553_v2, %v5153_v50 }
 0x3cd   : > { %v1963_v23 = vpop.permute.xlu1 %1962  ;;  %v1959_v56 = vpop.permute.xlu0 %1958  ;;  %v5191_v35 = vadd.f32 %v2515_v34, %v2506_v46  ;;  %v2557_v2 = vld [vmem:[#allocation2 + $0xe8] sm:$0xff]  ;;  %v5196_v45 = vadd.f32 %v2458_v31, %v2449_v24  ;;  %v2517_v24 = vld [vmem:[#allocation3 + $0xb8] sm:$0xff] }
 0x3ce   : > { %v2256_v0 = vmul.f32 %v4963_v40, %v1963_v23  ;;  %v2255_v61 = vmul.f32 %v4963_v40, %v1959_v56  ;;  %v2440_v40 = vld [vmem:[#allocation2 + $0x70] sm:$0xff]  ;;  %v5167_v63 = vadd.f32 %v2510_v54, %v2501_v59  ;;  %v5185_v47 = vadd.f32 %v2570_v17, %v2561_v25  ;;  %v2569_v56 = vld [vmem:[#allocation3 + $0xc0] sm:$0xff]  ;;  %v2574_v34 = vld [vmem:[#allocation3 + $0xe8] sm:$0xff] }
 0x3cf   : > { %v2448_v21 = vmul.f32 %v2440_v40, %v5157_v13  ;;  %5590 = vst [vmem:[#allocation26_spill] sm:$0xff] %v5191_v35  ;;  %v2499_v59 = vld [vmem:[#allocation2 + $0xb0] sm:$0xff]  ;;  %5591 = vst [vmem:[#allocation27_spill] sm:$0xff] %v5196_v45  ;;  %v5199_v17 = vrot.slane %v1928_v27, %v4376_v20  ;;  %v5213_v27 = vadd.f32 %v2572_v33, %v2563_v7 }
 0x3d0   : > { %2320 = vst.msk [vmem:[#allocation4 + $0x38] sm:$0xff] %vm782_vm5, %v2256_v0  ;;  %2319 = vst.msk [vmem:[#allocation4 + $0x30] sm:$0xff] %vm782_vm5, %v2255_v61  ;;  %v2560_v54 = vmul.f32 %v2552_v58, %v5167_v63 }
 0x3d1   : > { %v2029_v48 = vpop.permute.xlu1 %2028  ;;  %v2025_v18 = vpop.permute.xlu0 %2024  ;;  %v5189_v41 = vadd.f32 %v2457_v8, %v2448_v21  ;;  %v2516_v8 = vld [vmem:[#allocation3 + $0xb0] sm:$0xff] }
 0x3d2   : > { %v2271_v49 = vmul.f32 %v4988_v43, %v2029_v48  ;;  %v2270_v0 = vmul.f32 %v4988_v43, %v2025_v18  ;;  %v5187_v48 = vadd.f32 %v2514_v26, %v2505_v3  ;;  %v5201_v18 = vadd.f32 %v2569_v56, %v2560_v54  ;;  %v2573_v26 = vld [vmem:[#allocation3 + $0xe0] sm:$0xff]  ;;  %v2500_v56 = vld [vmem:[#allocation2 + $0xb8] sm:$0xff]  ;;  %v2613_v54 = vld [vmem:[#allocation2 + $0x110] sm:$0xff] }
 0x3d3   : > { %5589 = vst [vmem:[#allocation25_spill] sm:$0xff] %v5189_v41  ;;  %v2507_v20 = vmul.f32 %v2499_v59, %v5189_v41  ;;  %v2565_v3 = vmul.f32 %v2557_v2, %v5191_v35  ;;  %v2628_v2 = vld [vmem:[#allocation3 + $0x100] sm:$0xff]  ;;  %v2635_v35 = vld [vmem:[#allocation3 + $0x138] sm:$0xff] }
 0x3d4   : > { %2335 = vst.msk [vmem:[#allocation4 + $0xb0] sm:$0xff] %vm782_vm5, %v2271_v49  ;;  %2334 = vst.msk [vmem:[#allocation4 + $0xa8] sm:$0xff] %vm782_vm5, %v2270_v0  ;;  %v2620_v0 = vmul.f32 %v2612_v1, %v5185_v47  ;;  %v2564_v25 = vmul.f32 %v2556_v55, %v5187_v48  ;;  %v2508_v55 = vmul.f32 %v2500_v56, %v5196_v45  ;;  %v2630_v1 = vld [vmem:[#allocation3 + $0x110] sm:$0xff]  ;;  %v2688_v45 = vld [vmem:[#allocation3 + $0x148] sm:$0xff] }
 0x3d5   : > { %v2091_v23 = vpop.permute.xlu1 %2090  ;;  %v2087_v61 = vpop.permute.xlu0 %2086  ;;  %v5221_v14 = vadd.f32 %v2574_v34, %v2565_v3  ;;  %v2616_v34 = vld [vmem:[#allocation2 + $0x128] sm:$0xff]  ;;  %v2694_v41 = vld [vmem:[#allocation3 + $0x178] sm:$0xff] }
 0x3d6   : > { %v2285_v39 = vmul.f32 %v5059_v28, %v2091_v23  ;;  %v2284_v29 = vmul.f32 %v5059_v28, %v2087_v61  ;;  %v2562_v23 = vmul.f32 %v2554_v53, %v5178_v11  ;;  %v2611_v53 = vld [vmem:[#allocation2 + $0x100] sm:$0xff]  ;;  %v5217_v61 = vadd.f32 %v2573_v26, %v2564_v25  ;;  %v2633_v3 = vld [vmem:[#allocation3 + $0x128] sm:$0xff] }
 0x3d7   : > { %5594 = vst [vmem:[#allocation30_spill] sm:$0xff] %v5221_v14  ;;  %v2619_v33 = vmul.f32 %v2611_v53, %v5201_v18  ;;  %v2632_v25 = vld [vmem:[#allocation3 + $0x120] sm:$0xff]  ;;  %v2624_v53 = vmul.f32 %v2616_v34, %v5221_v14  ;;  %v2672_v34 = vld [vmem:[#allocation2 + $0x150] sm:$0xff]  ;;  %v2690_v14 = vld [vmem:[#allocation3 + $0x158] sm:$0xff] }
 0x3d8   : > { %2349 = vst.msk [vmem:[#allocation4 + $0x120] sm:$0xff] %vm782_vm5, %v2285_v39  ;;  %2348 = vst.msk [vmem:[#allocation4 + $0x118] sm:$0xff] %vm782_vm5, %v2284_v29  ;;  %v2629_v39 = vld [vmem:[#allocation3 + $0x108] sm:$0xff]  ;;  %v5211_v46 = vadd.f32 %v2571_v51, %v2562_v23  ;;  %v2614_v29 = vld [vmem:[#allocation2 + $0x118] sm:$0xff] }
 0x3d9   : > { %v2153_v49 = vpop.permute.xlu1 %2152  ;;  %v2145_v21 = vpop.permute.xlu0 %2144  ;;  %5592 = vst [vmem:[#allocation28_spill] sm:$0xff] %v5217_v61  ;;  %v5224_v59 = vadd.f32 %v2629_v39, %v2620_v0  ;;  %v2558_v51 = vld [vmem:[#allocation2 + $0xf0] sm:$0xff]  ;;  %v2631_v23 = vld [vmem:[#allocation3 + $0x118] sm:$0xff]  ;;  %v2622_v39 = vmul.f32 %v2614_v29, %v5213_v27 }
 0x3da   : > { %v2299_v40 = vmul.f32 %v5114_v32, %v2153_v49  ;;  %v2297_v31 = vmul.f32 %v5114_v32, %v2145_v21  ;;  %v5219_v49 = vadd.f32 %v2516_v8, %v2507_v20  ;;  %v5229_v8 = vadd.f32 %v2517_v24, %v2508_v55  ;;  %v2575_v20 = vld [vmem:[#allocation3 + $0xf0] sm:$0xff] }
 0x3db   : > { %v2621_v0 = vmul.f32 %v2613_v54, %v5211_v46  ;;  %v5242_v54 = vadd.f32 %v2631_v23, %v2622_v39  ;;  %v2670_v23 = vld [vmem:[#allocation2 + $0x140] sm:$0xff] }
 0x3dc   : > { %2363 = vst.msk [vmem:[#allocation4 + $0x190] sm:$0xff] %vm782_vm5, %v2299_v40  ;;  %5593 = vst [vmem:[#allocation29_spill] sm:$0xff] %v5219_v49  ;;  %v2615_v40 = vld [vmem:[#allocation2 + $0x120] sm:$0xff]  ;;  %v2566_v24 = vmul.f32 %v2558_v51, %v5219_v49  ;;  %v2868_v49 = vmul.f32 %v4354_v9, %v4938_v30  ;;  %v2748_v30 = vld [vmem:[#allocation3 + $0x190] sm:$0xff] }
 0x3dd   : > { %v2184_v38 = vpop.permute.xlu1 %2183  ;;  %2361 = vst.msk [vmem:[#allocation4 + $0x180] sm:$0xff] %vm782_vm5, %v2297_v31  ;;  %v1998_v7 = vpop.permute.xlu0 %1997  ;;  %5595 = vst [vmem:[#allocation31_spill] sm:$0xff] %v5229_v8  ;;  %v5235_v31 = vadd.f32 %v2628_v2, %v2619_v33  ;;  %v2623_v56 = vmul.f32 %v2615_v40, %v5217_v61  ;;  %v5240_v55 = vadd.f32 %v2630_v1, %v2621_v0  ;;  %v2788_v61 = vld [vmem:[#allocation2 + $0x1c0] sm:$0xff] }
 0x3de   : > { %v2306_v58 = vmul.f32 %v5199_v17, %v2184_v38  ;;  %v2264_v21 = vmul.f32 %v4973_v60, %v1998_v7  ;;  %5596 = vst [vmem:[#allocation32_spill] sm:$0xff] %v5242_v54  ;;  %v2559_v60 = vld [vmem:[#allocation2 + $0xf8] sm:$0xff]  ;;  %v5250_v7 = vadd.f32 %v2575_v20, %v2566_v24  ;;  %v5252_v1 = vadd.f32 %v2633_v3, %v2624_v53  ;;  %v2634_v24 = vld [vmem:[#allocation3 + $0x130] sm:$0xff]  ;;  %v2674_v53 = vld [vmem:[#allocation2 + $0x160] sm:$0xff] }
 0x3df   : > { %v5247_v2 = vadd.f32 %v2632_v25, %v2623_v56  ;;  %v2567_v51 = vmul.f32 %v2559_v60, %v5229_v8  ;;  %v2678_v25 = vmul.f32 %v2670_v23, %v5235_v31  ;;  %v2673_v56 = vld [vmem:[#allocation2 + $0x158] sm:$0xff]  ;;  %v2680_v20 = vmul.f32 %v2672_v34, %v5240_v55 }
 0x3e0   : > { %2370 = vst.msk [vmem:[#allocation4 + $0x1c8] sm:$0xff] %vm782_vm5, %v2306_v58  ;;  %v2671_v58 = vld [vmem:[#allocation2 + $0x148] sm:$0xff]  ;;  %2328 = vst.msk [vmem:[#allocation4 + $0x78] sm:$0xff] %vm782_vm5, %v2264_v21  ;;  %v2617_v21 = vld [vmem:[#allocation2 + $0x130] sm:$0xff]  ;;  %v2681_v3 = vmul.f32 %v2673_v56, %v5242_v54 }
 0x3e1   : > { %v2033_v26 = vpop.permute.xlu1 %2032  ;;  %v2679_v29 = vmul.f32 %v2671_v58, %v5224_v59  ;;  %5597 = vst [vmem:[#allocation33_spill] sm:$0xff] %v5247_v2  ;;  %v2060_v40 = vpop.permute.xlu0 %2059  ;;  %5598 = vst [vmem:[#allocation34_spill] sm:$0xff] %v5250_v7  ;;  %v2689_v58 = vld [vmem:[#allocation3 + $0x150] sm:$0xff]  ;;  %v2618_v8 = vld [vmem:[#allocation2 + $0x138] sm:$0xff] }
 0x3e2   : > { %v2272_v38 = vmul.f32 %v4988_v43, %v2033_v26  ;;  %v2576_v43 = vld [vmem:[#allocation3 + $0xf8] sm:$0xff]  ;;  %5599 = vst [vmem:[#allocation35_spill] sm:$0xff] %v5252_v1  ;;  %v2687_v26 = vld [vmem:[#allocation3 + $0x140] sm:$0xff]  ;;  %v2278_v0 = vmul.f32 %v5038_v6, %v2060_v40  ;;  %v2675_v40 = vld [vmem:[#allocation2 + $0x168] sm:$0xff]  ;;  %v5270_v52 = vadd.f32 %v2689_v58, %v2680_v20 }
 0x3e3   : > { %v5259_v60 = vadd.f32 %v2576_v43, %v2567_v51  ;;  %v2625_v43 = vmul.f32 %v2617_v21, %v5250_v7  ;;  %v2682_v51 = vmul.f32 %v2674_v53, %v5247_v2  ;;  %v2683_v34 = vmul.f32 %v2675_v40, %v5252_v1  ;;  %v2692_v56 = vld [vmem:[#allocation3 + $0x168] sm:$0xff]  ;;  %v2729_v58 = vld [vmem:[#allocation2 + $0x180] sm:$0xff]  ;;  %v2732_v7 = vld [vmem:[#allocation2 + $0x198] sm:$0xff] }
 0x3e4   : > { %2336 = vst.msk [vmem:[#allocation4 + $0xb8] sm:$0xff] %vm782_vm5, %v2272_v38  ;;  %v5256_v38 = vadd.f32 %v2688_v45, %v2679_v29  ;;  %2342 = vst.msk [vmem:[#allocation4 + $0xe8] sm:$0xff] %vm782_vm5, %v2278_v0  ;;  %v5265_v45 = vadd.f32 %v2687_v26, %v2678_v25  ;;  %v2691_v29 = vld [vmem:[#allocation3 + $0x160] sm:$0xff]  ;;  %v5272_v0 = vadd.f32 %v2690_v14, %v2681_v3  ;;  %v2747_v54 = vld [vmem:[#allocation3 + $0x188] sm:$0xff] }
 0x3e5   : > { %v2095_v33 = vpop.permute.xlu1 %2094  ;;  %5600 = vst [vmem:[#allocation36_spill] sm:$0xff] %v5259_v60  ;;  %5601 = vst [vmem:[#allocation37_spill] sm:$0xff] %v5270_v52  ;;  %v2626_v53 = vmul.f32 %v2618_v8, %v5259_v60  ;;  %v5280_v40 = vadd.f32 %v2634_v24, %v2625_v43  ;;  %v2746_v20 = vld [vmem:[#allocation3 + $0x180] sm:$0xff]  ;;  %v2731_v14 = vld [vmem:[#allocation2 + $0x190] sm:$0xff] }
 0x3e6   : > { %v2286_v39 = vmul.f32 %v5059_v28, %v2095_v33  ;;  %v2122_v33 = vpop.permute.xlu0 %2121  ;;  %5602 = vst [vmem:[#allocation38_spill] sm:$0xff] %v5272_v0  ;;  %v2676_v3 = vld [vmem:[#allocation2 + $0x170] sm:$0xff]  ;;  %v2737_v9 = vmul.f32 %v2729_v58, %v5265_v45  ;;  %v2749_v8 = vld [vmem:[#allocation3 + $0x198] sm:$0xff]  ;;  %v2469_v1 = vld [vmem:[#allocation4 + $0x48] sm:$0xff]  ;;  %v2740_v58 = vmul.f32 %v2732_v7, %v5272_v0 }
 0x3e7   : > { %v2292_v26 = vmul.f32 %v5090_v44, %v2122_v33  ;;  %5603 = vst [vmem:[#allocation39_spill] sm:$0xff] %v5280_v40  ;;  %v5284_v33 = vadd.f32 %v2691_v29, %v2682_v51  ;;  %v5291_v60 = vadd.f32 %v2635_v35, %v2626_v53  ;;  %v2677_v51 = vld [vmem:[#allocation2 + $0x178] sm:$0xff]  ;;  %v2684_v35 = vmul.f32 %v2676_v3, %v5280_v40  ;;  %v2734_v53 = vld [vmem:[#allocation2 + $0x1a8] sm:$0xff]  ;;  %v2750_v2 = vld [vmem:[#allocation3 + $0x1a0] sm:$0xff] }
 0x3e8   : > { %2350 = vst.msk [vmem:[#allocation4 + $0x128] sm:$0xff] %vm782_vm5, %v2286_v39  ;;  %v2730_v39 = vld [vmem:[#allocation2 + $0x188] sm:$0xff]  ;;  %v2477_v40 = vmul.f32 %v2469_v1, %v5129_v62  ;;  %v2791_v62 = vld [vmem:[#allocation2 + $0x1d8] sm:$0xff] }
 0x3e9   : > { %v2157_v23 = vpop.permute.xlu1 %2156  ;;  %v2738_v21 = vmul.f32 %v2730_v39, %v5256_v38  ;;  %2356 = vst.msk [vmem:[#allocation4 + $0x158] sm:$0xff] %vm782_vm5, %v2292_v26  ;;  %5604 = vst [vmem:[#allocation40_spill] sm:$0xff] %v5284_v33  ;;  %v2739_v26 = vmul.f32 %v2731_v14, %v5270_v52  ;;  %v2751_v14 = vld [vmem:[#allocation3 + $0x1a8] sm:$0xff]  ;;  %v2685_v0 = vmul.f32 %v2677_v51, %v5291_v60 }
 0x3ea   : > { %v2300_v25 = vmul.f32 %v5114_v32, %v2157_v23  ;;  %v5286_v23 = vadd.f32 %v2692_v56, %v2683_v34  ;;  %v2180_v24 = vpop.permute.xlu0 %2179  ;;  %5606 = vst [vmem:[#allocation42_spill] sm:$0xff] %v5291_v60  ;;  %v2693_v34 = vld [vmem:[#allocation3 + $0x170] sm:$0xff]  ;;  %v2733_v56 = vld [vmem:[#allocation2 + $0x1a0] sm:$0xff] }
 0x3eb   : > { %v5289_v39 = vadd.f32 %v2747_v54, %v2738_v21  ;;  %v5298_v54 = vsel %vm782_vm5, %v2868_v49, 0.0  ;;  %v5300_v21 = vadd.f32 %v2746_v20, %v2737_v9  ;;  %v5303_v52 = vadd.f32 %v2748_v30, %v2739_v26  ;;  %v2806_v9 = vld [vmem:[#allocation3 + $0x1c8] sm:$0xff]  ;;  %v2468_v32 = vld [vmem:[#allocation4 + $0x40] sm:$0xff] }
 0x3ec   : > { %2364 = vst.msk [vmem:[#allocation4 + $0x198] sm:$0xff] %vm782_vm5, %v2300_v25  ;;  %5605 = vst [vmem:[#allocation41_spill] sm:$0xff] %v5286_v23  ;;  %v2305_v25 = vmul.f32 %v5199_v17, %v2180_v24  ;;  %v2789_v24 = vld [vmem:[#allocation2 + $0x1c8] sm:$0xff]  ;;  %v2741_v7 = vmul.f32 %v2733_v56, %v5284_v33  ;;  %v2742_v49 = vmul.f32 %v2734_v53, %v5286_v23  ;;  %v2792_v60 = vld [vmem:[#allocation2 + $0x1e0] sm:$0xff] }
 0x3ed   : > { %v2068_v43 = vpop.permute.xlu1 %2067  ;;  %5607 = vst [vmem:[#allocation43_spill] sm:$0xff] %v5298_v54  ;;  %v5309_v20 = vadd.f32 %v2749_v8, %v2740_v58  ;;  %v2797_v3 = vmul.f32 %v2789_v24, %v5289_v39  ;;  %v5314_v13 = vadd.f32 %v2693_v34, %v2684_v35  ;;  %v2735_v58 = vld [vmem:[#allocation2 + $0x1b0] sm:$0xff]  ;;  %v2796_v51 = vmul.f32 %v2788_v61, %v5300_v21  ;;  %v2793_v23 = vld [vmem:[#allocation2 + $0x1e8] sm:$0xff] }
 0x3ee   : > { %v2280_v29 = vmul.f32 %v5038_v6, %v2068_v43  ;;  %v2410_v43 = vld [vmem:[#allocation4 + $0x8] sm:$0xff]  ;;  %2369 = vst.msk [vmem:[#allocation4 + $0x1c0] sm:$0xff] %vm782_vm5, %v2305_v25  ;;  %v2064_v30 = vpop.permute.xlu0 %2063  ;;  %v2790_v25 = vld [vmem:[#allocation2 + $0x1d0] sm:$0xff]  ;;  %v5318_v53 = vadd.f32 %v2750_v2, %v2741_v7  ;;  %v5320_v24 = vadd.f32 %v2751_v14, %v2742_v49  ;;  %v5329_v2 = vadd.f32 %v2694_v41, %v2685_v0 }
 0x3ef   : > { %5608 = vst [vmem:[#allocation44_spill] sm:$0xff] %v5314_v13  ;;  %v2279_v56 = vmul.f32 %v5038_v6, %v2064_v30  ;;  %v2418_v34 = vmul.f32 %v2410_v43, %v5109_v42  ;;  %v2752_v35 = vld [vmem:[#allocation3 + $0x1b0] sm:$0xff]  ;;  %v5325_v33 = vadd.f32 %v2806_v9, %v2797_v3  ;;  %v2409_v6 = vld [vmem:[#allocation4] sm:$0xff]  ;;  %v2528_v30 = vld [vmem:[#allocation4 + $0x88] sm:$0xff]  ;;  %v2798_v14 = vmul.f32 %v2790_v25, %v5303_v52 }
 0x3f0   : > { %2344 = vst.msk [vmem:[#allocation4 + $0xf8] sm:$0xff] %vm782_vm5, %v2280_v29  ;;  %v2805_v29 = vld [vmem:[#allocation3 + $0x1c0] sm:$0xff]  ;;  %v2799_v61 = vmul.f32 %v2791_v62, %v5309_v20  ;;  %v2807_v42 = vld [vmem:[#allocation3 + $0x1d0] sm:$0xff]  ;;  %v2476_v43 = vmul.f32 %v2468_v32, %v5139_v12  ;;  %v2471_v9 = vld [vmem:[#allocation4 + $0x58] sm:$0xff]  ;;  %v2800_v25 = vmul.f32 %v2792_v60, %v5318_v53  ;;  %v2417_v62 = vmul.f32 %v2409_v6, %v5119_v22 }
 0x3f1   : > { %v2130_v26 = vpop.permute.xlu1 %2129  ;;  %5609 = vst [vmem:[#allocation45_spill] sm:$0xff] %v5325_v33  ;;  %2343 = vst.msk [vmem:[#allocation4 + $0xf0] sm:$0xff] %vm782_vm5, %v2279_v56  ;;  %v5333_v7 = vadd.f32 %v2805_v29, %v2796_v51  ;;  %v2485_v49 = vadd.f32 %v2477_v40, %v2418_v34  ;;  %v2411_v3 = vld [vmem:[#allocation4 + $0x10] sm:$0xff]  ;;  %v2743_v56 = vmul.f32 %v2735_v58, %v5314_v13  ;;  %v2587_v33 = vld [vmem:[#allocation4 + $0xc8] sm:$0xff] }
 0x3f2   : > { %v2294_v8 = vmul.f32 %v5090_v44, %v2130_v26  ;;  %v2527_v26 = vld [vmem:[#allocation4 + $0x80] sm:$0xff]  ;;  %v2126_v1 = vpop.permute.xlu0 %2125  ;;  %v2801_v29 = vmul.f32 %v2793_v23, %v5320_v24  ;;  %v2470_v32 = vld [vmem:[#allocation4 + $0x50] sm:$0xff]  ;;  %v2536_v12 = vmul.f32 %v2528_v30, %v5153_v50  ;;  %v2412_v40 = vld [vmem:[#allocation4 + $0x18] sm:$0xff]  ;;  %v2419_v13 = vmul.f32 %v2411_v3, %v5123_v19 }
 0x3f3   : > { %v2293_v41 = vmul.f32 %v5090_v44, %v2126_v1  ;;  %v2535_v51 = vmul.f32 %v2527_v26, %v5167_v63  ;;  %v2736_v34 = vld [vmem:[#allocation2 + $0x1b8] sm:$0xff]  ;;  %v5344_v58 = vadd.f32 %v2752_v35, %v2743_v56  ;;  %v2479_v1 = vmul.f32 %v2471_v9, %v5149_v36  ;;  %v2809_v23 = vld [vmem:[#allocation3 + $0x1e0] sm:$0xff]  ;;  %v2529_v63 = vld [vmem:[#allocation4 + $0x90] sm:$0xff] }
 0x3f4   : > { %2358 = vst.msk [vmem:[#allocation4 + $0x168] sm:$0xff] %vm782_vm5, %v2294_v8  ;;  %v2586_v8 = vld [vmem:[#allocation4 + $0xc0] sm:$0xff]  ;;  %v2744_v60 = vmul.f32 %v2736_v34, %v5329_v2  ;;  %v2808_v22 = vld [vmem:[#allocation3 + $0x1d8] sm:$0xff]  ;;  %v5351_v50 = vadd.f32 %v2807_v42, %v2798_v14  ;;  %v2484_v6 = vadd.f32 %v2476_v43, %v2417_v62  ;;  %v2544_v30 = vadd.f32 %v2536_v12, %v2485_v49  ;;  %v2588_v62 = vld [vmem:[#allocation4 + $0xd0] sm:$0xff] }
 0x3f5   : > { %v2192_v54 = vpop.permute.xlu1 %2191  ;;  %2357 = vst.msk [vmem:[#allocation4 + $0x160] sm:$0xff] %vm782_vm5, %v2293_v41  ;;  %v2595_v35 = vmul.f32 %v2587_v33, %v5185_v47  ;;  %v2594_v19 = vmul.f32 %v2586_v8, %v5201_v18  ;;  %v2753_v3 = vld [vmem:[#allocation3 + $0x1b8] sm:$0xff]  ;;  %v2478_v9 = vmul.f32 %v2470_v32, %v5144_v15  ;;  %v2420_v56 = vmul.f32 %v2412_v40, %v5125_v4  ;;  %v2413_v41 = vld [vmem:[#allocation4 + $0x20] sm:$0xff]  ;;  %v2646_v12 = vld [vmem:[#allocation4 + $0x108] sm:$0xff] }
 0x3f6   : > { %v2308_v0 = vmul.f32 %v5199_v17, %v2192_v54  ;;  %v2810_v54 = vld [vmem:[#allocation3 + $0x1e8] sm:$0xff]  ;;  %v2188_v26 = vpop.permute.xlu0 %2187  ;;  %v2543_v42 = vadd.f32 %v2535_v51, %v2484_v6  ;;  %v2645_v43 = vld [vmem:[#allocation4 + $0x100] sm:$0xff]  ;;  %v5359_v47 = vadd.f32 %v2808_v22, %v2799_v61  ;;  %v5361_v18 = vadd.f32 %v2809_v23, %v2800_v25  ;;  %v2589_v32 = vld [vmem:[#allocation4 + $0xd8] sm:$0xff] }
 0x3f7   : > { %v2307_v34 = vmul.f32 %v5199_v17, %v2188_v26  ;;  %v2472_v49 = vld [vmem:[#allocation4 + $0x60] sm:$0xff]  ;;  %v5363_v33 = vadd.f32 %v2810_v54, %v2801_v29  ;;  %v2537_v15 = vmul.f32 %v2529_v63, %v5178_v11  ;;  %v2486_v8 = vadd.f32 %v2478_v9, %v2419_v13  ;;  %v2647_v23 = vld [vmem:[#allocation4 + $0x110] sm:$0xff]  ;;  %v2473_v54 = vld [vmem:[#allocation4 + $0x68] sm:$0xff] }
 0x3f8   : > { %2372 = vst.msk [vmem:[#allocation4 + $0x1d8] sm:$0xff] %vm782_vm5, %v2308_v0  ;;  %v2530_v0 = vld [vmem:[#allocation4 + $0x98] sm:$0xff]  ;;  %v2487_v4 = vadd.f32 %v2479_v1, %v2420_v56  ;;  %v2704_v40 = vld [vmem:[#allocation4 + $0x140] sm:$0xff]  ;;  %v5368_v51 = vadd.f32 %v2753_v3, %v2744_v60  ;;  %v2603_v6 = vadd.f32 %v2595_v35, %v2544_v30  ;;  %v2421_v61 = vmul.f32 %v2413_v41, %v5131_v5  ;;  %v2414_v26 = vld [vmem:[#allocation4 + $0x28] sm:$0xff] }
 0x3f9   : > { %v2134_v36 = vpop.permute.xlu1 %2133  ;;  %2371 = vst.msk [vmem:[#allocation4 + $0x1d0] sm:$0xff] %vm782_vm5, %v2307_v34  ;;  %v2538_v25 = vmul.f32 %v2530_v0, %v5180_v10  ;;  %v2602_v29 = vadd.f32 %v2594_v19, %v2543_v42  ;;  %v2531_v22 = vld [vmem:[#allocation4 + $0xa0] sm:$0xff]  ;;  %v2480_v1 = vmul.f32 %v2472_v49, %v5155_v37  ;;  %v2596_v63 = vmul.f32 %v2588_v62, %v5211_v46  ;;  %v2415_v56 = vld [vmem:[#allocation4 + $0x30] sm:$0xff] }
 0x3fa   : > { %v2295_v14 = vmul.f32 %v5090_v44, %v2134_v36  ;;  %v2099_v11 = vpop.permute.xlu0 %2098  ;;  %v2705_v36 = vld [vmem:[#allocation4 + $0x148] sm:$0xff]  ;;  %v2653_v5 = vmul.f32 %v2645_v43, %v5235_v31  ;;  %v2597_v10 = vmul.f32 %v2589_v32, %v5213_v27  ;;  %v2654_v35 = vmul.f32 %v2646_v12, %v5224_v59  ;;  %v2474_v0 = vld [vmem:[#allocation4 + $0x70] sm:$0xff]  ;;  %v2590_v59 = vld [vmem:[#allocation4 + $0xe0] sm:$0xff] }
 0x3fb   : > { %v2287_v60 = vmul.f32 %v5059_v28, %v2099_v11  ;;  %v2712_v19 = vmul.f32 %v2704_v40, %v5265_v45  ;;  %v2546_v3 = vadd.f32 %v2538_v25, %v2487_v4  ;;  %v2545_v9 = vadd.f32 %v2537_v15, %v2486_v8  ;;  %v2706_v43 = vld [vmem:[#allocation4 + $0x150] sm:$0xff]  ;;  %v2764_v4 = vld [vmem:[#allocation4 + $0x188] sm:$0xff]  ;;  %v5611_v32 = vld [vmem:[#allocation23_spill] sm:$0xff] }
 0x3fc   : > { %2359 = vst.msk [vmem:[#allocation4 + $0x170] sm:$0xff] %vm782_vm5, %v2295_v14  ;;  %v2539_v37 = vmul.f32 %v2531_v22, %v5187_v48  ;;  %v2655_v46 = vmul.f32 %v2647_v23, %v5240_v55  ;;  %v2661_v41 = vadd.f32 %v2653_v5, %v2602_v29  ;;  %v2481_v31 = vmul.f32 %v2473_v54, %v5159_v57  ;;  %v2533_v55 = vld [vmem:[#allocation4 + $0xb0] sm:$0xff]  ;;  %v2532_v12 = vld [vmem:[#allocation4 + $0xa8] sm:$0xff]  ;;  %v2649_v23 = vld [vmem:[#allocation4 + $0x120] sm:$0xff] }
 0x3fd   : > { %v2196_v13 = vpop.permute.xlu1 %2195  ;;  %2351 = vst.msk [vmem:[#allocation4 + $0x130] sm:$0xff] %vm782_vm5, %v2287_v60  ;;  %v2422_v27 = vmul.f32 %v2414_v26, %v5133_v16  ;;  %v2713_v45 = vmul.f32 %v2705_v36, %v5256_v38  ;;  %v2488_v42 = vadd.f32 %v2480_v1, %v2421_v61  ;;  %v2604_v48 = vadd.f32 %v2596_v63, %v2545_v9  ;;  %v5610_v49 = vld [vmem:[#allocation22_spill] sm:$0xff]  ;;  %v5612_v25 = vld [vmem:[#allocation25_spill] sm:$0xff]  ;;  %v5613_v29 = vld [vmem:[#allocation28_spill] sm:$0xff] }
 0x3fe   : > { %v2309_v30 = vmul.f32 %v5199_v17, %v2196_v13  ;;  %v2161_v34 = vpop.permute.xlu0 %2160  ;;  %v2662_v8 = vadd.f32 %v2654_v35, %v2603_v6  ;;  %v2423_v57 = vmul.f32 %v2415_v56, %v5611_v32  ;;  %v2605_v16 = vadd.f32 %v2597_v10, %v2546_v3  ;;  %v2648_v61 = vld [vmem:[#allocation4 + $0x118] sm:$0xff]  ;;  %v2765_v11 = vld [vmem:[#allocation4 + $0x190] sm:$0xff]  ;;  %v2763_v63 = vld [vmem:[#allocation4 + $0x180] sm:$0xff] }
 0x3ff   : > { %v2301_v62 = vmul.f32 %v5610_v49, %v2161_v34  ;;  %v5390_v40 = vadd.f32 %v2712_v19, %v2661_v41  ;;  %v2482_v38 = vmul.f32 %v2474_v0, %v5612_v25  ;;  %v2598_v22 = vmul.f32 %v2590_v59, %v5613_v29  ;;  %v5614_v13 = vld [vmem:[#allocation37_spill] sm:$0xff]  ;;  %v2416_v54 = vld [vmem:[#allocation4 + $0x38] sm:$0xff]  ;;  %v2822_v59 = vld [vmem:[#allocation4 + $0x1c0] sm:$0xff] }
 0x400   : > { %2373 = vst.msk [vmem:[#allocation4 + $0x1e0] sm:$0xff] %vm782_vm5, %v2309_v30  ;;  %v2663_v6 = vadd.f32 %v2655_v46, %v2604_v48  ;;  %v2714_v1 = vmul.f32 %v2706_v43, %v5614_v13  ;;  %v2489_v60 = vadd.f32 %v2481_v31, %v2422_v27  ;;  %v5615_v30 = vld [vmem:[#allocation29_spill] sm:$0xff]  ;;  %v2721_v10 = vadd.f32 %v2713_v45, %v2662_v8  ;;  %v5616_v19 = vld [vmem:[#allocation26_spill] sm:$0xff]  ;;  %v5617_v46 = vld [vmem:[#allocation32_spill] sm:$0xff] }
 0x401   : > { %v2138_v14 = vpop.permute.xlu1 %2137  ;;  %2365 = vst.msk [vmem:[#allocation4 + $0x1a0] sm:$0xff] %vm782_vm5, %v2301_v62  ;;  %v2541_v5 = vmul.f32 %v2533_v55, %v5615_v30  ;;  %v2772_v35 = vmul.f32 %v2764_v4, %v5289_v39  ;;  %v2540_v3 = vmul.f32 %v2532_v12, %v5616_v19  ;;  %v2475_v9 = vld [vmem:[#allocation4 + $0x78] sm:$0xff]  ;;  %v2823_v56 = vld [vmem:[#allocation4 + $0x1c8] sm:$0xff]  ;;  %v2656_v0 = vmul.f32 %v2648_v61, %v5617_v46  ;;  %v2592_v30 = vld [vmem:[#allocation4 + $0xf0] sm:$0xff] }
 0x402   : > { %v2296_v15 = vmul.f32 %v5090_v44, %v2138_v14  ;;  %v2547_v44 = vadd.f32 %v2539_v37, %v2488_v42  ;;  %v2103_v26 = vpop.permute.xlu0 %2102  ;;  %v2490_v34 = vadd.f32 %v2482_v38, %v2423_v57  ;;  %v5618_v14 = vld [vmem:[#allocation33_spill] sm:$0xff]  ;;  %v2773_v31 = vmul.f32 %v2765_v11, %v5303_v52  ;;  %v5619_v39 = vld [vmem:[#allocation24_spill] sm:$0xff]  ;;  %v2534_v4 = vld [vmem:[#allocation4 + $0xb8] sm:$0xff] }
 0x403   : > { %v2288_v41 = vmul.f32 %v5059_v28, %v2103_v26  ;;  %v2657_v42 = vmul.f32 %v2649_v23, %v5618_v14  ;;  %v2771_v27 = vmul.f32 %v2763_v63, %v5300_v21  ;;  %v2591_v45 = vld [vmem:[#allocation4 + $0xe8] sm:$0xff]  ;;  %v2424_v48 = vmul.f32 %v2416_v54, %v5619_v39  ;;  %v2708_v57 = vld [vmem:[#allocation4 + $0x160] sm:$0xff]  ;;  %v2824_v52 = vld [vmem:[#allocation4 + $0x1d0] sm:$0xff] }
 0x404   : > { %2360 = vst.msk [vmem:[#allocation4 + $0x178] sm:$0xff] %vm782_vm5, %v2296_v15  ;;  %v2606_v28 = vadd.f32 %v2598_v22, %v2547_v44  ;;  %v2722_v43 = vadd.f32 %v2714_v1, %v2663_v6  ;;  %v5620_v15 = vld [vmem:[#allocation27_spill] sm:$0xff]  ;;  %v2549_v32 = vadd.f32 %v2541_v5, %v2490_v34  ;;  %v2780_v12 = vadd.f32 %v2772_v35, %v2721_v10  ;;  %v5621_v25 = vld [vmem:[#allocation45_spill] sm:$0xff]  ;;  %v5622_v44 = vld [vmem:[#allocation30_spill] sm:$0xff] }
 0x405   : > { %v2200_v36 = vpop.permute.xlu1 %2199  ;;  %2352 = vst.msk [vmem:[#allocation4 + $0x138] sm:$0xff] %vm782_vm5, %v2288_v41  ;;  %v2483_v8 = vmul.f32 %v2475_v9, %v5620_v15  ;;  %v2831_v21 = vmul.f32 %v2823_v56, %v5621_v25  ;;  %v2707_v38 = vld [vmem:[#allocation4 + $0x158] sm:$0xff]  ;;  %v2548_v23 = vadd.f32 %v2540_v3, %v2489_v60  ;;  %v2650_v11 = vld [vmem:[#allocation4 + $0x128] sm:$0xff]  ;;  %v2830_v22 = vmul.f32 %v2822_v59, %v5333_v7 }
 0x406   : > { %v2310_v37 = vmul.f32 %v5199_v17, %v2200_v36  ;;  %v2165_v55 = vpop.permute.xlu0 %2164  ;;  %v2599_v6 = vmul.f32 %v2591_v45, %v5622_v44  ;;  %v2664_v13 = vadd.f32 %v2656_v0, %v2605_v16  ;;  %v2665_v1 = vadd.f32 %v2657_v42, %v2606_v28  ;;  %v5623_v26 = vld [vmem:[#allocation31_spill] sm:$0xff]  ;;  %v5624_v10 = vld [vmem:[#allocation40_spill] sm:$0xff]  ;;  %v5626_v46 = vld [vmem:[#allocation38_spill] sm:$0xff] }
 0x407   : > { %v2302_v29 = vmul.f32 %v5610_v49, %v2165_v55  ;;  %v2781_v63 = vadd.f32 %v2773_v31, %v2722_v43  ;;  %v2542_v36 = vmul.f32 %v2534_v4, %v5623_v26  ;;  %v2593_v5 = vld [vmem:[#allocation4 + $0xf8] sm:$0xff]  ;;  %v2716_v35 = vmul.f32 %v2708_v57, %v5624_v10  ;;  %v2651_v42 = vld [vmem:[#allocation4 + $0x130] sm:$0xff]  ;;  %v5628_v39 = vld [vmem:[#allocation36_spill] sm:$0xff] }
 0x408   : > { %2374 = vst.msk [vmem:[#allocation4 + $0x1e8] sm:$0xff] %vm782_vm5, %v2310_v37  ;;  %v2767_v54 = vld [vmem:[#allocation4 + $0x1a0] sm:$0xff]  ;;  %v2766_v60 = vld [vmem:[#allocation4 + $0x198] sm:$0xff]  ;;  %v2779_v19 = vadd.f32 %v2771_v27, %v5390_v40  ;;  %v2832_v7 = vmul.f32 %v2824_v52, %v5351_v50  ;;  %v2491_v9 = vadd.f32 %v2483_v8, %v2424_v48  ;;  %v2709_v37 = vld [vmem:[#allocation4 + $0x168] sm:$0xff]  ;;  %v2715_v0 = vmul.f32 %v2707_v38, %v5626_v46 }
 0x409   : > { %v2173_v62 = vpop.permute.xlu1 %2172  ;;  %2366 = vst.msk [vmem:[#allocation4 + $0x1a8] sm:$0xff] %vm782_vm5, %v2302_v29  ;;  %v5625_v56 = vld [vmem:[#allocation35_spill] sm:$0xff]  ;;  %v2839_v59 = vadd.f32 %v2831_v21, %v2780_v12  ;;  %v2775_v31 = vmul.f32 %v2767_v54, %v5318_v53  ;;  %v5627_v27 = vld [vmem:[#allocation34_spill] sm:$0xff]  ;;  %v2601_v28 = vmul.f32 %v2593_v5, %v5628_v39  ;;  %v2607_v48 = vadd.f32 %v2599_v6, %v2548_v23 }
 0x40a   : > { %v2304_v61 = vmul.f32 %v5610_v49, %v2173_v62  ;;  %v2169_v3 = vpop.permute.xlu0 %2168  ;;  %v2658_v41 = vmul.f32 %v2650_v11, %v5625_v56  ;;  %v2825_v45 = vld [vmem:[#allocation4 + $0x1d8] sm:$0xff]  ;;  %v2838_v40 = vadd.f32 %v2830_v22, %v2779_v19  ;;  %v2600_v50 = vmul.f32 %v2592_v30, %v5627_v27  ;;  %v5629_v62 = vld [vmem:[#allocation41_spill] sm:$0xff]  ;;  %v2826_v21 = vld [vmem:[#allocation4 + $0x1e0] sm:$0xff] }
 0x40b   : > { %v2303_v34 = vmul.f32 %v5610_v49, %v2169_v3  ;;  %v2774_v55 = vmul.f32 %v2766_v60, %v5309_v20  ;;  %v2550_v49 = vadd.f32 %v2542_v36, %v2491_v9  ;;  %v2717_v15 = vmul.f32 %v2709_v37, %v5629_v62  ;;  %v5630_v57 = vld [vmem:[#allocation39_spill] sm:$0xff]  ;;  %v5631_v20 = vld [vmem:[#allocation42_spill] sm:$0xff]  ;;  %v5632_v37 = vld [vmem:[#allocation44_spill] sm:$0xff] }
 0x40c   : > { %2368 = vst.msk [vmem:[#allocation4 + $0x1b8] sm:$0xff] %vm782_vm5, %v2304_v61  ;;  %v2652_v43 = vld [vmem:[#allocation4 + $0x138] sm:$0xff]  ;;  %v2724_v8 = vadd.f32 %v2716_v35, %v2665_v1  ;;  %v2840_v4 = vadd.f32 %v2832_v7, %v2781_v63  ;;  %v2659_v12 = vmul.f32 %v2651_v42, %v5630_v57  ;;  %v2666_v52 = vadd.f32 %v2658_v41, %v2607_v48  ;;  %v2794_v9 = vld [vmem:[#allocation2 + $0x1f0] sm:$0xff] }
 0x40d   : > { %v2208_v16 = vpop.permute.xlu1 %2207  ;;  %2367 = vst.msk [vmem:[#allocation4 + $0x1b0] sm:$0xff] %vm782_vm5, %v2303_v34  ;;  %v2723_v25 = vadd.f32 %v2715_v0, %v2664_v13  ;;  %v2833_v38 = vmul.f32 %v2825_v45, %v5359_v47  ;;  %v2660_v61 = vmul.f32 %v2652_v43, %v5631_v20  ;;  %v2846_v11 = vsel %vm782_vm5, %v2838_v40, 0.0  ;;  %v2710_v13 = vld [vmem:[#allocation4 + $0x170] sm:$0xff]  ;;  %v2795_v36 = vld [vmem:[#allocation2 + $0x1f8] sm:$0xff] }
 0x40e   : > { %v2312_v14 = vmul.f32 %v5199_v17, %v2208_v16  ;;  %v2204_v53 = vpop.permute.xlu0 %2203  ;;  %v2783_v23 = vadd.f32 %v2775_v31, %v2724_v8  ;;  %v2608_v22 = vadd.f32 %v2600_v50, %v2549_v32  ;;  %v2609_v44 = vadd.f32 %v2601_v28, %v2550_v49  ;;  %v2711_v32 = vld [vmem:[#allocation4 + $0x178] sm:$0xff]  ;;  %v2811_v56 = vld [vmem:[#allocation3 + $0x1f0] sm:$0xff] }
 0x40f   : > { %v2311_v29 = vmul.f32 %v5199_v17, %v2204_v53  ;;  %v2782_v1 = vadd.f32 %v2774_v55, %v2723_v25  ;;  %v2827_v54 = vld [vmem:[#allocation4 + $0x1e8] sm:$0xff]  ;;  %v2847_v63 = vsel %vm782_vm5, %v2839_v59, 0.0  ;;  %v2725_v26 = vadd.f32 %v2717_v15, %v2666_v52  ;;  %v2812_v17 = vld [vmem:[#allocation3 + $0x1f8] sm:$0xff] }
 0x410   : > { %2376 = vst.msk [vmem:[#allocation4 + $0x1f8] sm:$0xff] %vm782_vm5, %v2312_v14  ;;  %v2768_v6 = vld [vmem:[#allocation4 + $0x1a8] sm:$0xff]  ;;  %v2834_v30 = vmul.f32 %v2826_v21, %v5361_v18  ;;  %v2849_v5 = vsel %vm782_vm5, %v2840_v4, 0.0  ;;  %v2667_v10 = vadd.f32 %v2659_v12, %v2608_v22  ;;  %v2803_v60 = vmul.f32 %v2795_v36, %v5368_v51  ;;  %v5633_v43 = vld [vmem:[#allocation43_spill] sm:$0xff] }
 0x411   : > { %2375 = vst.msk [vmem:[#allocation4 + $0x1f0] sm:$0xff] %vm782_vm5, %v2311_v29  ;;  %v2776_v47 = vmul.f32 %v2768_v6, %v5320_v24  ;;  %v2841_v19 = vadd.f32 %v2833_v38, %v2782_v1  ;;  %v2848_v7 = vadd.f32 %v2847_v63, %v2846_v11  ;;  %v2668_v3 = vadd.f32 %v2660_v61, %v2609_v44  ;;  %v2867_v1 = vld [vmem:[%s5635_s22] sm:$0x1]  ;;  %s3041_s22 = scalar_lea.sflag [#allocation7], %s4249_s1 }
 0x412   : > { %v2835_v41 = vmul.f32 %v2827_v54, %v5363_v33  ;;  %v2842_v24 = vadd.f32 %v2834_v30, %v2783_v23  ;;  %v2718_v46 = vmul.f32 %v2710_v13, %v5632_v37  ;;  %v2802_v18 = vmul.f32 %v2794_v9, %v5344_v58  ;;  %v2964_v30 = vld [vmem:[%s5636_s13] sm:$0x1]  ;;  %s3847_s13 = scalar_lea.vmem %s3846_s25, 32 }
 0x413   : > { %v2770_v35 = vld [vmem:[#allocation4 + $0x1b8] sm:$0xff]  ;;  %v2784_v16 = vadd.f32 %v2776_v47, %v2725_v26  ;;  %v2820_v59 = vadd.f32 %v2812_v17, %v2803_v60  ;;  %v2850_v14 = vadd.f32 %v2849_v5, %v2848_v7  ;;  %v2719_v42 = vmul.f32 %v2711_v32, %v5329_v2  ;;  %p3849_p0 = scmp.lt.s32.totalorder %s3847_s13, %s3841_s11 }
 0x414   : > { %v2769_v0 = vld [vmem:[#allocation4 + $0x1b0] sm:$0xff]  ;;  %v2778_v45 = vmul.f32 %v2770_v35, %v5368_v51  ;;  %v2819_v27 = vadd.f32 %v2811_v56, %v2802_v18  ;;  %v2851_v50 = vsel %vm782_vm5, %v2841_v19, 0.0  ;;  %v2726_v33 = vadd.f32 %v2718_v46, %v2667_v10 }
 0x415   : > { %v2777_v31 = vmul.f32 %v2769_v0, %v5344_v58  ;;  %v2843_v40 = vadd.f32 %v2835_v41, %v2784_v16  ;;  %v2727_v39 = vadd.f32 %v2719_v42, %v2668_v3  ;;  %v2853_v48 = vsel %vm782_vm5, %v2842_v24, 0.0  ;;  %p3850_p2 = por %p3849_p0, %p3848_p13 }
 0x416   : > { %v5634_v55 = vrot.slane %v5633_v43, 4  ;;  %v2852_v15 = vadd.f32 %v2851_v50, %v2850_v14 }
 0x417   : > { %v2829_v34 = vld [vmem:[#allocation4 + $0x1f8] sm:$0xff]  ;;  %v2785_v2 = vadd.f32 %v2777_v31, %v2726_v33  ;;  %v2786_v8 = vadd.f32 %v2778_v45, %v2727_v39  ;;  %v2855_v51 = vsel %vm782_vm5, %v2843_v40, 0.0  ;;  %p3851_p3 = pnand %p3850_p2, %p3844_p1 }
 0x418   : > { %v2837_v28 = vmul.f32 %v2829_v34, %v2820_v59  ;;  %v2871_v49 = vadd.f32 %v5634_v55, %v5633_v43  ;;  %v2828_v62 = vld [vmem:[#allocation4 + $0x1f0] sm:$0xff]  ;;  %v2854_v4 = vadd.f32 %v2853_v48, %v2852_v15 }
 0x419   : > { %v2836_v58 = vmul.f32 %v2828_v62, %v2819_v27 }
 0x41a   : > { %v2845_v57 = vadd.f32 %v2837_v28, %v2786_v8  ;;  %v2872_v12 = vrot.slane %v2871_v49, 2  ;;  %v2856_v52 = vadd.f32 %v2855_v51, %v2854_v4 }
 0x41b   : > { %v2844_v53 = vadd.f32 %v2836_v58, %v2785_v2 }
 0x41c   : > { %v2859_v38 = vsel %vm782_vm5, %v2845_v57, 0.0  ;;  %v2873_v29 = vadd.f32 %v2872_v12, %v2871_v49 }
 0x41d   : > { %v2857_v25 = vsel %vm782_vm5, %v2844_v53, 0.0 }
 0x41e   : > { %v2858_v21 = vadd.f32 %v2857_v25, %v2856_v52  ;;  %v2874_v23 = vrot.slane %v2873_v29, 1 }
 0x420   : > { %v2860_v20 = vadd.f32 %v2859_v38, %v2858_v21  ;;  %v2875_v44 = vadd.f32 %v2874_v23, %v2873_v29 }
 0x422   : > { %v2861_v61 = vrot.slane %v2860_v20, 4  ;;  %v2876_v13 = vmul.f32 %v2875_v44, %v2867_v1 }
 0x424   : > { %v2862_v11 = vadd.f32 %v2861_v61, %v2860_v20 }
 0x426   : > { %v2863_v22 = vrot.slane %v2862_v11, 2 }
 0x428   : > { %v2864_v6 = vadd.f32 %v2863_v22, %v2862_v11 }
 0x42a   : > { %v2865_v54 = vrot.slane %v2864_v6, 1 }
 0x42c   : > { %v2866_v63 = vadd.f32 %v2865_v54, %v2864_v6 }
 0x42e   : > { %v2877_v26 = vadd.f32 %v2876_v13, %v2866_v63 }
 0x430   : > { %v2878_v47 = vmul.f32 0.125, %v2877_v26 }
 0x432   : > { %3349 = vmatmul.mubr.msk.f32.vlgmr.msra.gmra.mrb[4].mxu1 %vm782_vm5, %v2878_v47 }
 0x505   : > { %v2956_v36 = vpop.f32.mrb[4].mxu1 }
 0x506   : > { %v3350_v17 = vpop.f32.mrb[5].mxu1  ;;  %3360 = vmatmul.mubr.msk.f32.vlgmr.msra.gmra.mrb[6].mxu0 %vm558_vm1, %v2956_v36 }
 0x5d9   : > { %v3034_v5 = vpop.f32.mrb[6].mxu0 }
 0x5da   : > { %v3035_v10 = vadd.f32 %v3034_v5, %v2964_v30  ;;  %v3361_v32 = vpop.f32.mrb[7].mxu0 }
 0x5dc   : > { %3039 = vst.msk [vmem:[%s552_s6] sm:$0x1] %vm3038_vm8, %v3035_v10 }
 0x5dd   : > { %3854 = shalt.err (!%p3851_p3)
}
 0x5de   : > { %s3855_s1 = scalar_lea.hbm %s5470_s12, 16  ;;  %s3859_s17 = scalar_lea.hbm %s5637_s14, 32 }
 0x5df   : > { %p3856_p6 = scmp.ne.s32.totalorder %s5470_s12, %s3855_s1  ;;  %p3860_p8 = scmp.lt.u32.totalorder %s5470_s12, %s5637_s14 }
 0x5e0   : > { %p3861_p5 = scmp.lt.u32.totalorder %s3859_s17, %s3855_s1  ;;  %p3863_p7 = scmp.lt.u32.totalorder %s3855_s1, %s5470_s12 }
 0x5e1   : > { %p3857_p10 = pnand %p3856_p6, %p5638_p4 }
 0x5e2   : > { %p3862_p9 = por %p3861_p5, %p3860_p8 }
 0x5e3   : > { %p3858_p11 = pneg %p3857_p10 }
 0x5e4   : > { %p3864_p12 = por %p3863_p7, %p3862_p9 }
 0x5e6   : > { %p3865_p1 = pnand %p3864_p12, %p3858_p11 }
 0x5e8   : > { %3868 = shalt.err (!%p3865_p1)
}
 0x5e9   : > { %3450 = dma.vmem_to_hbm [thread:$0]  (%p5638_p4), %s5472_s28, 16, %s5470_s12, %s3041_s22  }
 0x5ea PF: > { %s3065_s11 = sand.u32 1, %s3907_s29   ;;  %p5639_p13 = scmp.ne.s32.totalorder %s5574_s27, 0 }
 0x5eb   : > { %p5640_p0 = scmp.ge.s32.totalorder %s3919_s16, 2  ;;  %s3066_s25 = scalar_lea.sflag [#allocation7], %s3065_s11 }
 0x5ed   : > { %p3473_p2 = pnand %p5640_p0, %p5639_p13 }
 0x5ef   : > { %3902 = dma.done.wait (!%p3473_p2), %s3066_s25, 16  }
 0x5f0   : > { %3904 = vsyncadd (!%p3473_p2), %s3066_s25, 4294967280  ;;  %p30_p3 = scmp.ge.s32.totalorder %s4179_s21, 4   ;;  %s5641_s29 = smov %s3911_s30 }
 0x5f1   : > { %s5642_s30 = smov %s3915_s15  ;;  %s5643_s15 = smov %s4191_s10 }
 0x5f2   : > { %s5644_s16 = smov %s4179_s21  ;;  %32 = sbr.rel (!%p30_p3) target bundleno = 16 (0x10), region = 162 }
 0x5f9   :  { %3070 = vsyncpa [#allocation6], 1 }
 0x5fa   :  { %3072 = vsyncpa [#allocation6 + $0x1], 1 }
 0x5fb   :  { %3073 = vsyncpa [#allocation9], 1 }
 0x5fc   :  { %3074 = vsyncpa [#allocation12], 1 }
 0x5fd   :  { %3075 = vsyncpa [#allocation15], 1 }
 0x5fe   :  { %3076 = vsyncpa [#allocation7], 1 }
 0x5ff   :  { %3078 = vsyncpa [#allocation7 + $0x1], 1 }

</bundles_post_ra>
